<compile_context>
chip_gen: v5e
topology: v5e:2x2
jax: 0.10.0
libtpu: 0.0.40
codegen_flags: <defaults>
</compile_context>

<pallas_src>
import jax
import jax.numpy as jnp
import numpy as np
from jax.experimental import pallas as pl
from jax.experimental.pallas import tpu as pltpu

NUM_HEADS = 4                     # forced by the (28, 4, 4) attn_bias in forward()
DIM_NODE = 32                     # must equal dim_atten for the .view() in forward to work
DIM_ATTEN = 32
DIM_EDGE = 32                     # unused in forward()
D_N = DIM_NODE // NUM_HEADS       # 8
ATT_SIZE = DIM_ATTEN // NUM_HEADS # 8
BATCH = 28                        # forced by attn_bias.resize_(28, 4, 4)


def _mhea_kernel(qkv_ref, w_ref, b_ref, bias_ref, x_ref, prob_ref):
    """Fused q/k/v projection + cross-head attention; everything 2-D & lane-sliced."""
    H, A = NUM_HEADS, ATT_SIZE

    # One fused MXU matmul for all three projections (block-diagonal weight in
    # head-major column order), plus a single fused bias broadcast-add.
    proj = jnp.dot(qkv_ref[...], w_ref[...],
                   preferred_element_type=jnp.float32) + b_ref[...]        # (B, 96)

    # Static 2-D lane-slice views (zero cost); head h occupies 8 lanes.
    def q_h(h): return proj[:, h * A:(h + 1) * A]
    def k_h(h): return proj[:, DIM_ATTEN + h * A:DIM_ATTEN + (h + 1) * A]
    def v_h(h): return proj[:, 2 * DIM_ATTEN + h * A:2 * DIM_ATTEN + (h + 1) * A]

    # Scores: prob[b, h, g] = <q_h[b], k_g[b]> + bias[b, h, g]
    # 16 head pairs -> VPU multiplies of (B, 8) + XLU lane-sums; no batched matmul.
    cols = [[None] * H for _ in range(H)]
    for h in range(H):
        qh = q_h(h)
        for g in range(H):
            idx = h * H + g
            s = jnp.sum(qh * k_h(g), axis=1, keepdims=True)                # (B, 1)
            cols[h][g] = s + bias_ref[:, idx:idx + 1]

    # Lane-dense pre-softmax prob output (B, 16), flat layout h*4+g (reshaped
    # back to (B, 4, 4) in the wrapper -- matches torch's returned prob).
    prob_ref[...] = jnp.concatenate(
        [cols[h][g] for h in range(H) for g in range(H)], axis=1)

    # Softmax over h (dim=1 of the (B, 4, 4) view), fully unrolled per column g.
    sm = [[None] * H for _ in range(H)]
    for g in range(H):
        m = cols[0][g]
        for h in range(1, H):
            m = jnp.maximum(m, cols[h][g])
        e = [jnp.exp(cols[h][g] - m) for h in range(H)]
        ssum = e[0]
        for h in range(1, H):
            ssum = ssum + e[h]
        inv = pl.reciprocal(ssum, approx=False)      # EUP, keeps 1e-4 tolerance
        for h in range(H):
            sm[h][g] = e[h] * inv

    # x[b, h*8 + i] = sum_g sm[b, h, g] * v_g[b, i]  -- broadcast-MAC on the VPU.
    outs = []
    for h in range(H):
        acc = sm[h][0] * v_h(0)
        for g in range(1, H):
            acc = acc + sm[h][g] * v_h(g)
        outs.append(acc)                                                   # (B, 8)
    x_ref[...] = jnp.concatenate(outs, axis=1)       # (B, 32), head-major == torch .view()


def prepare_fused_params(params):
    """One-time numpy packing of the three Linear layers into a block-diagonal
    head-major weight + fused bias. Keeps the permutation gathers and concat
    entirely off the per-call hot path."""
    wq, bq, wk, bk, wv, bv = (np.asarray(p, dtype=np.float32) for p in params)
    # torch's .view(B, d_n, H).permute(0, 2, 1) head split == a head-major
    # column permutation of the projection weights.
    perm = np.array([i * NUM_HEADS + h for h in range(NUM_HEADS) for i in range(D_N)])
    w = np.zeros((3 * DIM_ATTEN, 3 * DIM_ATTEN), np.float32)
    w[0 * DIM_ATTEN:1 * DIM_ATTEN, 0 * DIM_ATTEN:1 * DIM_ATTEN] = wq[:, perm]
    w[1 * DIM_ATTEN:2 * DIM_ATTEN, 1 * DIM_ATTEN:2 * DIM_ATTEN] = wk[:, perm]
    w[2 * DIM_ATTEN:3 * DIM_ATTEN, 2 * DIM_ATTEN:3 * DIM_ATTEN] = wv[:, perm]
    b = np.concatenate([bq[perm], bk[perm], bv[perm]])[None, :]            # (1, 96)
    return jnp.asarray(w), jnp.asarray(b)


def multi_headed_edge_attention(q, k, v, attn_bias, fused_w, fused_b):
    """Pallas forward of MultiHeadedEdgeAttention.
    (self.scale and self.linear_prob are dead code in the torch forward.)"""
    qkv = jnp.concatenate([q, k, v], axis=1)                               # (B, 96)
    bias_flat = attn_bias.reshape(BATCH, NUM_HEADS * NUM_HEADS)            # (B, 16), h*4+g
    vspec = pl.BlockSpec(memory_space=pltpu.MemorySpace.VMEM)
    x, prob_flat = pl.pallas_call(
        _mhea_kernel,
        out_shape=(jax.ShapeDtypeStruct((BATCH, NUM_HEADS * ATT_SIZE), jnp.float32),
                   jax.ShapeDtypeStruct((BATCH, NUM_HEADS * NUM_HEADS), jnp.float32)),
        in_specs=[vspec] * 4,
        out_specs=(vspec, vspec),
    )(qkv, fused_w, fused_b, bias_flat)
    return x, prob_flat.reshape(BATCH, NUM_HEADS, NUM_HEADS)


def reference(q, k, v, attn_bias, params):
    """Pure-JAX replica of the PyTorch forward (for correctness check)."""
    wq, bq, wk, bk, wv, bv = params

    def split_heads(x, w, b):
        p = x @ w + b                                              # (B, H*att)
        return p.reshape(BATCH, D_N, NUM_HEADS).transpose(0, 2, 1) # (B, H, d_n)

    qh = split_heads(q, wq, bq)
    kh = split_heads(k, wk, bk)
    vh = split_heads(v, wv, bv)
    prob = jnp.matmul(qh, kh.transpose(0, 2, 1)) + attn_bias       # (B, H, H)
    x = jax.nn.softmax(prob, axis=1)
    x = jnp.matmul(x, vh)                                          # (B, H, d_n)
    return x.reshape(BATCH, D_N * NUM_HEADS), prob


if __name__ == "__main__":
    key = jax.random.PRNGKey(0)
    kq, kk, kv, kb, kw1, kw2, kw3, kb1, kb2, kb3 = jax.random.split(key, 10)

    # Deterministic synthetic parameters (JAX convention: W is (in, out)).
    lim = 1.0 / np.sqrt(DIM_ATTEN)
    wq = jax.random.uniform(kw1, (DIM_ATTEN, NUM_HEADS * ATT_SIZE), jnp.float32, -lim, lim)
    wk = jax.random.uniform(kw2, (DIM_ATTEN, NUM_HEADS * ATT_SIZE), jnp.float32, -lim, lim)
    wv = jax.random.uniform(kw3, (DIM_ATTEN, NUM_HEADS * ATT_SIZE), jnp.float32, -lim, lim)
    bq = jax.random.uniform(kb1, (NUM_HEADS * ATT_SIZE,), jnp.float32, -lim, lim)
    bk = jax.random.uniform(kb2, (NUM_HEADS * ATT_SIZE,), jnp.float32, -lim, lim)
    bv = jax.random.uniform(kb3, (NUM_HEADS * ATT_SIZE,), jnp.float32, -lim, lim)
    params = (wq, bq, wk, bk, wv, bv)
    # Note: self.scale and self.linear_prob (Linear(dim_node, num_heads*28)) are
    # never used in the torch forward(), so they are intentionally not materialized.

    # One-time, off-hot-path weight packing (numpy).
    fused_w, fused_b = prepare_fused_params(params)

    # Inputs.
    q = jax.random.normal(kq, (BATCH, DIM_ATTEN), jnp.float32)
    k = jax.random.normal(kk, (BATCH, DIM_ATTEN), jnp.float32)
    v = jax.random.normal(kv, (BATCH, DIM_ATTEN), jnp.float32)
    attn_bias = jax.random.normal(kb, (BATCH, NUM_HEADS, NUM_HEADS), jnp.float32)
    # TODO(synk): torch's in-place attn_bias.resize_ (metadata mutation of the caller's
    # tensor) has no Pallas equivalent; the bias is simply passed pre-shaped.

    x, prob = multi_headed_edge_attention(q, k, v, attn_bias, fused_w, fused_b)
    jax.block_until_ready((x, prob))

    x_ref, prob_ref = reference(q, k, v, attn_bias, params)
    np.testing.assert_allclose(np.asarray(prob), np.asarray(prob_ref), rtol=1e-4, atol=1e-4)
    np.testing.assert_allclose(np.asarray(x), np.asarray(x_ref), rtol=1e-4, atol=1e-4)

    print("KERNEL_OK")
</pallas_src>

<mosaic_0001>
module attributes {stable_mosaic.version = 11 : i64} {
  func.func @_mhea_kernel(%arg0: memref<28x96xf32, #tpu.memory_space<vmem>>, %arg1: memref<96x96xf32, #tpu.memory_space<vmem>>, %arg2: memref<1x96xf32, #tpu.memory_space<vmem>>, %arg3: memref<28x16xf32, #tpu.memory_space<vmem>>, %arg4: memref<28x32xf32, #tpu.memory_space<vmem>>, %arg5: memref<28x16xf32, #tpu.memory_space<vmem>>) attributes {dimension_semantics = [], scalar_prefetch = 0 : i64, scratch_operands = 0 : i64, tpu.core_type = #tpu.core_type<tc>} {
    %c0 = arith.constant 0 : index
    %c0_0 = arith.constant 0 : index
    %0 = vector.load %arg0[%c0, %c0_0] : memref<28x96xf32, #tpu.memory_space<vmem>>, vector<28x96xf32>
    %c0_1 = arith.constant 0 : index
    %c0_2 = arith.constant 0 : index
    %1 = vector.load %arg1[%c0_1, %c0_2] : memref<96x96xf32, #tpu.memory_space<vmem>>, vector<96x96xf32>
    %cst = arith.constant dense<0.000000e+00> : vector<28x96xf32>
    %2 = tpu.matmul %0, %1, %cst {dimension_numbers = #tpu.dot_dimension_numbers<[1], [0], [0], [1], [0, 0, 1, 1], [], []>} : vector<28x96xf32>, vector<96x96xf32>, vector<28x96xf32> -> vector<28x96xf32>
    %c0_3 = arith.constant 0 : index
    %c0_4 = arith.constant 0 : index
    %3 = vector.load %arg2[%c0_3, %c0_4] : memref<1x96xf32, #tpu.memory_space<vmem>>, vector<1x96xf32>
    %4 = vector.broadcast %3 : vector<1x96xf32> to vector<28x96xf32>
    %5 = arith.addf %2, %4 : vector<28x96xf32>
    %6 = vector.extract_strided_slice %5 {offsets = [0, 0], sizes = [28, 8], strides = [1, 1]} : vector<28x96xf32> to vector<28x8xf32>
    %7 = vector.extract_strided_slice %5 {offsets = [0, 32], sizes = [28, 8], strides = [1, 1]} : vector<28x96xf32> to vector<28x8xf32>
    %8 = arith.mulf %6, %7 : vector<28x8xf32>
    %cst_5 = arith.constant dense<0.000000e+00> : vector<28xf32>
    %9 = vector.multi_reduction <add>, %8, %cst_5 [1] : vector<28x8xf32> to vector<28xf32>
    %10 = vector.shape_cast %9 : vector<28xf32> to vector<28x1xf32>
    %c0_6 = arith.constant 0 : index
    %c0_7 = arith.constant 0 : index
    %11 = vector.load %arg3[%c0_6, %c0_7] : memref<28x16xf32, #tpu.memory_space<vmem>>, vector<28x1xf32>
    %12 = arith.addf %10, %11 : vector<28x1xf32>
    %13 = vector.extract_strided_slice %5 {offsets = [0, 40], sizes = [28, 8], strides = [1, 1]} : vector<28x96xf32> to vector<28x8xf32>
    %14 = arith.mulf %6, %13 : vector<28x8xf32>
    %cst_8 = arith.constant dense<0.000000e+00> : vector<28xf32>
    %15 = vector.multi_reduction <add>, %14, %cst_8 [1] : vector<28x8xf32> to vector<28xf32>
    %16 = vector.shape_cast %15 : vector<28xf32> to vector<28x1xf32>
    %c0_9 = arith.constant 0 : index
    %c1 = arith.constant 1 : index
    %17 = vector.load %arg3[%c0_9, %c1] : memref<28x16xf32, #tpu.memory_space<vmem>>, vector<28x1xf32>
    %18 = arith.addf %16, %17 : vector<28x1xf32>
    %19 = vector.extract_strided_slice %5 {offsets = [0, 48], sizes = [28, 8], strides = [1, 1]} : vector<28x96xf32> to vector<28x8xf32>
    %20 = arith.mulf %6, %19 : vector<28x8xf32>
    %cst_10 = arith.constant dense<0.000000e+00> : vector<28xf32>
    %21 = vector.multi_reduction <add>, %20, %cst_10 [1] : vector<28x8xf32> to vector<28xf32>
    %22 = vector.shape_cast %21 : vector<28xf32> to vector<28x1xf32>
    %c0_11 = arith.constant 0 : index
    %c2 = arith.constant 2 : index
    %23 = vector.load %arg3[%c0_11, %c2] : memref<28x16xf32, #tpu.memory_space<vmem>>, vector<28x1xf32>
    %24 = arith.addf %22, %23 : vector<28x1xf32>
    %25 = vector.extract_strided_slice %5 {offsets = [0, 56], sizes = [28, 8], strides = [1, 1]} : vector<28x96xf32> to vector<28x8xf32>
    %26 = arith.mulf %6, %25 : vector<28x8xf32>
    %cst_12 = arith.constant dense<0.000000e+00> : vector<28xf32>
    %27 = vector.multi_reduction <add>, %26, %cst_12 [1] : vector<28x8xf32> to vector<28xf32>
    %28 = vector.shape_cast %27 : vector<28xf32> to vector<28x1xf32>
    %c0_13 = arith.constant 0 : index
    %c3 = arith.constant 3 : index
    %29 = vector.load %arg3[%c0_13, %c3] : memref<28x16xf32, #tpu.memory_space<vmem>>, vector<28x1xf32>
    %30 = arith.addf %28, %29 : vector<28x1xf32>
    %31 = vector.extract_strided_slice %5 {offsets = [0, 8], sizes = [28, 8], strides = [1, 1]} : vector<28x96xf32> to vector<28x8xf32>
    %32 = vector.extract_strided_slice %5 {offsets = [0, 32], sizes = [28, 8], strides = [1, 1]} : vector<28x96xf32> to vector<28x8xf32>
    %33 = arith.mulf %31, %32 : vector<28x8xf32>
    %cst_14 = arith.constant dense<0.000000e+00> : vector<28xf32>
    %34 = vector.multi_reduction <add>, %33, %cst_14 [1] : vector<28x8xf32> to vector<28xf32>
    %35 = vector.shape_cast %34 : vector<28xf32> to vector<28x1xf32>
    %c0_15 = arith.constant 0 : index
    %c4 = arith.constant 4 : index
    %36 = vector.load %arg3[%c0_15, %c4] : memref<28x16xf32, #tpu.memory_space<vmem>>, vector<28x1xf32>
    %37 = arith.addf %35, %36 : vector<28x1xf32>
    %38 = vector.extract_strided_slice %5 {offsets = [0, 40], sizes = [28, 8], strides = [1, 1]} : vector<28x96xf32> to vector<28x8xf32>
    %39 = arith.mulf %31, %38 : vector<28x8xf32>
    %cst_16 = arith.constant dense<0.000000e+00> : vector<28xf32>
    %40 = vector.multi_reduction <add>, %39, %cst_16 [1] : vector<28x8xf32> to vector<28xf32>
    %41 = vector.shape_cast %40 : vector<28xf32> to vector<28x1xf32>
    %c0_17 = arith.constant 0 : index
    %c5 = arith.constant 5 : index
    %42 = vector.load %arg3[%c0_17, %c5] : memref<28x16xf32, #tpu.memory_space<vmem>>, vector<28x1xf32>
    %43 = arith.addf %41, %42 : vector<28x1xf32>
    %44 = vector.extract_strided_slice %5 {offsets = [0, 48], sizes = [28, 8], strides = [1, 1]} : vector<28x96xf32> to vector<28x8xf32>
    %45 = arith.mulf %31, %44 : vector<28x8xf32>
    %cst_18 = arith.constant dense<0.000000e+00> : vector<28xf32>
    %46 = vector.multi_reduction <add>, %45, %cst_18 [1] : vector<28x8xf32> to vector<28xf32>
    %47 = vector.shape_cast %46 : vector<28xf32> to vector<28x1xf32>
    %c0_19 = arith.constant 0 : index
    %c6 = arith.constant 6 : index
    %48 = vector.load %arg3[%c0_19, %c6] : memref<28x16xf32, #tpu.memory_space<vmem>>, vector<28x1xf32>
    %49 = arith.addf %47, %48 : vector<28x1xf32>
    %50 = vector.extract_strided_slice %5 {offsets = [0, 56], sizes = [28, 8], strides = [1, 1]} : vector<28x96xf32> to vector<28x8xf32>
    %51 = arith.mulf %31, %50 : vector<28x8xf32>
    %cst_20 = arith.constant dense<0.000000e+00> : vector<28xf32>
    %52 = vector.multi_reduction <add>, %51, %cst_20 [1] : vector<28x8xf32> to vector<28xf32>
    %53 = vector.shape_cast %52 : vector<28xf32> to vector<28x1xf32>
    %c0_21 = arith.constant 0 : index
    %c7 = arith.constant 7 : index
    %54 = vector.load %arg3[%c0_21, %c7] : memref<28x16xf32, #tpu.memory_space<vmem>>, vector<28x1xf32>
    %55 = arith.addf %53, %54 : vector<28x1xf32>
    %56 = vector.extract_strided_slice %5 {offsets = [0, 16], sizes = [28, 8], strides = [1, 1]} : vector<28x96xf32> to vector<28x8xf32>
    %57 = vector.extract_strided_slice %5 {offsets = [0, 32], sizes = [28, 8], strides = [1, 1]} : vector<28x96xf32> to vector<28x8xf32>
    %58 = arith.mulf %56, %57 : vector<28x8xf32>
    %cst_22 = arith.constant dense<0.000000e+00> : vector<28xf32>
    %59 = vector.multi_reduction <add>, %58, %cst_22 [1] : vector<28x8xf32> to vector<28xf32>
    %60 = vector.shape_cast %59 : vector<28xf32> to vector<28x1xf32>
    %c0_23 = arith.constant 0 : index
    %c8 = arith.constant 8 : index
    %61 = vector.load %arg3[%c0_23, %c8] : memref<28x16xf32, #tpu.memory_space<vmem>>, vector<28x1xf32>
    %62 = arith.addf %60, %61 : vector<28x1xf32>
    %63 = vector.extract_strided_slice %5 {offsets = [0, 40], sizes = [28, 8], strides = [1, 1]} : vector<28x96xf32> to vector<28x8xf32>
    %64 = arith.mulf %56, %63 : vector<28x8xf32>
    %cst_24 = arith.constant dense<0.000000e+00> : vector<28xf32>
    %65 = vector.multi_reduction <add>, %64, %cst_24 [1] : vector<28x8xf32> to vector<28xf32>
    %66 = vector.shape_cast %65 : vector<28xf32> to vector<28x1xf32>
    %c0_25 = arith.constant 0 : index
    %c9 = arith.constant 9 : index
    %67 = vector.load %arg3[%c0_25, %c9] : memref<28x16xf32, #tpu.memory_space<vmem>>, vector<28x1xf32>
    %68 = arith.addf %66, %67 : vector<28x1xf32>
    %69 = vector.extract_strided_slice %5 {offsets = [0, 48], sizes = [28, 8], strides = [1, 1]} : vector<28x96xf32> to vector<28x8xf32>
    %70 = arith.mulf %56, %69 : vector<28x8xf32>
    %cst_26 = arith.constant dense<0.000000e+00> : vector<28xf32>
    %71 = vector.multi_reduction <add>, %70, %cst_26 [1] : vector<28x8xf32> to vector<28xf32>
    %72 = vector.shape_cast %71 : vector<28xf32> to vector<28x1xf32>
    %c0_27 = arith.constant 0 : index
    %c10 = arith.constant 10 : index
    %73 = vector.load %arg3[%c0_27, %c10] : memref<28x16xf32, #tpu.memory_space<vmem>>, vector<28x1xf32>
    %74 = arith.addf %72, %73 : vector<28x1xf32>
    %75 = vector.extract_strided_slice %5 {offsets = [0, 56], sizes = [28, 8], strides = [1, 1]} : vector<28x96xf32> to vector<28x8xf32>
    %76 = arith.mulf %56, %75 : vector<28x8xf32>
    %cst_28 = arith.constant dense<0.000000e+00> : vector<28xf32>
    %77 = vector.multi_reduction <add>, %76, %cst_28 [1] : vector<28x8xf32> to vector<28xf32>
    %78 = vector.shape_cast %77 : vector<28xf32> to vector<28x1xf32>
    %c0_29 = arith.constant 0 : index
    %c11 = arith.constant 11 : index
    %79 = vector.load %arg3[%c0_29, %c11] : memref<28x16xf32, #tpu.memory_space<vmem>>, vector<28x1xf32>
    %80 = arith.addf %78, %79 : vector<28x1xf32>
    %81 = vector.extract_strided_slice %5 {offsets = [0, 24], sizes = [28, 8], strides = [1, 1]} : vector<28x96xf32> to vector<28x8xf32>
    %82 = vector.extract_strided_slice %5 {offsets = [0, 32], sizes = [28, 8], strides = [1, 1]} : vector<28x96xf32> to vector<28x8xf32>
    %83 = arith.mulf %81, %82 : vector<28x8xf32>
    %cst_30 = arith.constant dense<0.000000e+00> : vector<28xf32>
    %84 = vector.multi_reduction <add>, %83, %cst_30 [1] : vector<28x8xf32> to vector<28xf32>
    %85 = vector.shape_cast %84 : vector<28xf32> to vector<28x1xf32>
    %c0_31 = arith.constant 0 : index
    %c12 = arith.constant 12 : index
    %86 = vector.load %arg3[%c0_31, %c12] : memref<28x16xf32, #tpu.memory_space<vmem>>, vector<28x1xf32>
    %87 = arith.addf %85, %86 : vector<28x1xf32>
    %88 = vector.extract_strided_slice %5 {offsets = [0, 40], sizes = [28, 8], strides = [1, 1]} : vector<28x96xf32> to vector<28x8xf32>
    %89 = arith.mulf %81, %88 : vector<28x8xf32>
    %cst_32 = arith.constant dense<0.000000e+00> : vector<28xf32>
    %90 = vector.multi_reduction <add>, %89, %cst_32 [1] : vector<28x8xf32> to vector<28xf32>
    %91 = vector.shape_cast %90 : vector<28xf32> to vector<28x1xf32>
    %c0_33 = arith.constant 0 : index
    %c13 = arith.constant 13 : index
    %92 = vector.load %arg3[%c0_33, %c13] : memref<28x16xf32, #tpu.memory_space<vmem>>, vector<28x1xf32>
    %93 = arith.addf %91, %92 : vector<28x1xf32>
    %94 = vector.extract_strided_slice %5 {offsets = [0, 48], sizes = [28, 8], strides = [1, 1]} : vector<28x96xf32> to vector<28x8xf32>
    %95 = arith.mulf %81, %94 : vector<28x8xf32>
    %cst_34 = arith.constant dense<0.000000e+00> : vector<28xf32>
    %96 = vector.multi_reduction <add>, %95, %cst_34 [1] : vector<28x8xf32> to vector<28xf32>
    %97 = vector.shape_cast %96 : vector<28xf32> to vector<28x1xf32>
    %c0_35 = arith.constant 0 : index
    %c14 = arith.constant 14 : index
    %98 = vector.load %arg3[%c0_35, %c14] : memref<28x16xf32, #tpu.memory_space<vmem>>, vector<28x1xf32>
    %99 = arith.addf %97, %98 : vector<28x1xf32>
    %100 = vector.extract_strided_slice %5 {offsets = [0, 56], sizes = [28, 8], strides = [1, 1]} : vector<28x96xf32> to vector<28x8xf32>
    %101 = arith.mulf %81, %100 : vector<28x8xf32>
    %cst_36 = arith.constant dense<0.000000e+00> : vector<28xf32>
    %102 = vector.multi_reduction <add>, %101, %cst_36 [1] : vector<28x8xf32> to vector<28xf32>
    %103 = vector.shape_cast %102 : vector<28xf32> to vector<28x1xf32>
    %c0_37 = arith.constant 0 : index
    %c15 = arith.constant 15 : index
    %104 = vector.load %arg3[%c0_37, %c15] : memref<28x16xf32, #tpu.memory_space<vmem>>, vector<28x1xf32>
    %105 = arith.addf %103, %104 : vector<28x1xf32>
    %106 = tpu.concatenate %12, %18, %24, %30, %37, %43, %49, %55, %62, %68, %74, %80, %87, %93, %99, %105 in 1 : vector<28x1xf32>, vector<28x1xf32>, vector<28x1xf32>, vector<28x1xf32>, vector<28x1xf32>, vector<28x1xf32>, vector<28x1xf32>, vector<28x1xf32>, vector<28x1xf32>, vector<28x1xf32>, vector<28x1xf32>, vector<28x1xf32>, vector<28x1xf32>, vector<28x1xf32>, vector<28x1xf32>, vector<28x1xf32> -> vector<28x16xf32>
    %c0_38 = arith.constant 0 : index
    %c0_39 = arith.constant 0 : index
    %107 = vector.load %arg5[%c0_38, %c0_39] : memref<28x16xf32, #tpu.memory_space<vmem>>, vector<28x16xf32>
    tpu.vector_store %arg5[%c0_38, %c0_39], %106 {strides = array<i32>} : memref<28x16xf32, #tpu.memory_space<vmem>>, vector<28x16xf32>,
    %108 = arith.maximumf %12, %37 : vector<28x1xf32>
    %109 = arith.maximumf %108, %62 : vector<28x1xf32>
    %110 = arith.maximumf %109, %87 : vector<28x1xf32>
    %111 = arith.subf %12, %110 : vector<28x1xf32>
    %112 = math.exp %111 : vector<28x1xf32>
    %113 = arith.subf %37, %110 : vector<28x1xf32>
    %114 = math.exp %113 : vector<28x1xf32>
    %115 = arith.subf %62, %110 : vector<28x1xf32>
    %116 = math.exp %115 : vector<28x1xf32>
    %117 = arith.subf %87, %110 : vector<28x1xf32>
    %118 = math.exp %117 : vector<28x1xf32>
    %119 = arith.addf %112, %114 : vector<28x1xf32>
    %120 = arith.addf %119, %116 : vector<28x1xf32>
    %121 = arith.addf %120, %118 : vector<28x1xf32>
    %122 = tpu.reciprocal %121 : vector<28x1xf32> -> vector<28x1xf32>
    %123 = arith.mulf %112, %122 : vector<28x1xf32>
    %124 = arith.mulf %114, %122 : vector<28x1xf32>
    %125 = arith.mulf %116, %122 : vector<28x1xf32>
    %126 = arith.mulf %118, %122 : vector<28x1xf32>
    %127 = arith.maximumf %18, %43 : vector<28x1xf32>
    %128 = arith.maximumf %127, %68 : vector<28x1xf32>
    %129 = arith.maximumf %128, %93 : vector<28x1xf32>
    %130 = arith.subf %18, %129 : vector<28x1xf32>
    %131 = math.exp %130 : vector<28x1xf32>
    %132 = arith.subf %43, %129 : vector<28x1xf32>
    %133 = math.exp %132 : vector<28x1xf32>
    %134 = arith.subf %68, %129 : vector<28x1xf32>
    %135 = math.exp %134 : vector<28x1xf32>
    %136 = arith.subf %93, %129 : vector<28x1xf32>
    %137 = math.exp %136 : vector<28x1xf32>
    %138 = arith.addf %131, %133 : vector<28x1xf32>
    %139 = arith.addf %138, %135 : vector<28x1xf32>
    %140 = arith.addf %139, %137 : vector<28x1xf32>
    %141 = tpu.reciprocal %140 : vector<28x1xf32> -> vector<28x1xf32>
    %142 = arith.mulf %131, %141 : vector<28x1xf32>
    %143 = arith.mulf %133, %141 : vector<28x1xf32>
    %144 = arith.mulf %135, %141 : vector<28x1xf32>
    %145 = arith.mulf %137, %141 : vector<28x1xf32>
    %146 = arith.maximumf %24, %49 : vector<28x1xf32>
    %147 = arith.maximumf %146, %74 : vector<28x1xf32>
    %148 = arith.maximumf %147, %99 : vector<28x1xf32>
    %149 = arith.subf %24, %148 : vector<28x1xf32>
    %150 = math.exp %149 : vector<28x1xf32>
    %151 = arith.subf %49, %148 : vector<28x1xf32>
    %152 = math.exp %151 : vector<28x1xf32>
    %153 = arith.subf %74, %148 : vector<28x1xf32>
    %154 = math.exp %153 : vector<28x1xf32>
    %155 = arith.subf %99, %148 : vector<28x1xf32>
    %156 = math.exp %155 : vector<28x1xf32>
    %157 = arith.addf %150, %152 : vector<28x1xf32>
    %158 = arith.addf %157, %154 : vector<28x1xf32>
    %159 = arith.addf %158, %156 : vector<28x1xf32>
    %160 = tpu.reciprocal %159 : vector<28x1xf32> -> vector<28x1xf32>
    %161 = arith.mulf %150, %160 : vector<28x1xf32>
    %162 = arith.mulf %152, %160 : vector<28x1xf32>
    %163 = arith.mulf %154, %160 : vector<28x1xf32>
    %164 = arith.mulf %156, %160 : vector<28x1xf32>
    %165 = arith.maximumf %30, %55 : vector<28x1xf32>
    %166 = arith.maximumf %165, %80 : vector<28x1xf32>
    %167 = arith.maximumf %166, %105 : vector<28x1xf32>
    %168 = arith.subf %30, %167 : vector<28x1xf32>
    %169 = math.exp %168 : vector<28x1xf32>
    %170 = arith.subf %55, %167 : vector<28x1xf32>
    %171 = math.exp %170 : vector<28x1xf32>
    %172 = arith.subf %80, %167 : vector<28x1xf32>
    %173 = math.exp %172 : vector<28x1xf32>
    %174 = arith.subf %105, %167 : vector<28x1xf32>
    %175 = math.exp %174 : vector<28x1xf32>
    %176 = arith.addf %169, %171 : vector<28x1xf32>
    %177 = arith.addf %176, %173 : vector<28x1xf32>
    %178 = arith.addf %177, %175 : vector<28x1xf32>
    %179 = tpu.reciprocal %178 : vector<28x1xf32> -> vector<28x1xf32>
    %180 = arith.mulf %169, %179 : vector<28x1xf32>
    %181 = arith.mulf %171, %179 : vector<28x1xf32>
    %182 = arith.mulf %173, %179 : vector<28x1xf32>
    %183 = arith.mulf %175, %179 : vector<28x1xf32>
    %184 = vector.extract_strided_slice %5 {offsets = [0, 64], sizes = [28, 8], strides = [1, 1]} : vector<28x96xf32> to vector<28x8xf32>
    %185 = vector.broadcast %123 : vector<28x1xf32> to vector<28x8xf32>
    %186 = arith.mulf %185, %184 : vector<28x8xf32>
    %187 = vector.extract_strided_slice %5 {offsets = [0, 72], sizes = [28, 8], strides = [1, 1]} : vector<28x96xf32> to vector<28x8xf32>
    %188 = vector.broadcast %142 : vector<28x1xf32> to vector<28x8xf32>
    %189 = arith.mulf %188, %187 : vector<28x8xf32>
    %190 = arith.addf %186, %189 : vector<28x8xf32>
    %191 = vector.extract_strided_slice %5 {offsets = [0, 80], sizes = [28, 8], strides = [1, 1]} : vector<28x96xf32> to vector<28x8xf32>
    %192 = vector.broadcast %161 : vector<28x1xf32> to vector<28x8xf32>
    %193 = arith.mulf %192, %191 : vector<28x8xf32>
    %194 = arith.addf %190, %193 : vector<28x8xf32>
    %195 = vector.extract_strided_slice %5 {offsets = [0, 88], sizes = [28, 8], strides = [1, 1]} : vector<28x96xf32> to vector<28x8xf32>
    %196 = vector.broadcast %180 : vector<28x1xf32> to vector<28x8xf32>
    %197 = arith.mulf %196, %195 : vector<28x8xf32>
    %198 = arith.addf %194, %197 : vector<28x8xf32>
    %199 = vector.extract_strided_slice %5 {offsets = [0, 64], sizes = [28, 8], strides = [1, 1]} : vector<28x96xf32> to vector<28x8xf32>
    %200 = vector.broadcast %124 : vector<28x1xf32> to vector<28x8xf32>
    %201 = arith.mulf %200, %199 : vector<28x8xf32>
    %202 = vector.extract_strided_slice %5 {offsets = [0, 72], sizes = [28, 8], strides = [1, 1]} : vector<28x96xf32> to vector<28x8xf32>
    %203 = vector.broadcast %143 : vector<28x1xf32> to vector<28x8xf32>
    %204 = arith.mulf %203, %202 : vector<28x8xf32>
    %205 = arith.addf %201, %204 : vector<28x8xf32>
    %206 = vector.extract_strided_slice %5 {offsets = [0, 80], sizes = [28, 8], strides = [1, 1]} : vector<28x96xf32> to vector<28x8xf32>
    %207 = vector.broadcast %162 : vector<28x1xf32> to vector<28x8xf32>
    %208 = arith.mulf %207, %206 : vector<28x8xf32>
    %209 = arith.addf %205, %208 : vector<28x8xf32>
    %210 = vector.extract_strided_slice %5 {offsets = [0, 88], sizes = [28, 8], strides = [1, 1]} : vector<28x96xf32> to vector<28x8xf32>
    %211 = vector.broadcast %181 : vector<28x1xf32> to vector<28x8xf32>
    %212 = arith.mulf %211, %210 : vector<28x8xf32>
    %213 = arith.addf %209, %212 : vector<28x8xf32>
    %214 = vector.extract_strided_slice %5 {offsets = [0, 64], sizes = [28, 8], strides = [1, 1]} : vector<28x96xf32> to vector<28x8xf32>
    %215 = vector.broadcast %125 : vector<28x1xf32> to vector<28x8xf32>
    %216 = arith.mulf %215, %214 : vector<28x8xf32>
    %217 = vector.extract_strided_slice %5 {offsets = [0, 72], sizes = [28, 8], strides = [1, 1]} : vector<28x96xf32> to vector<28x8xf32>
    %218 = vector.broadcast %144 : vector<28x1xf32> to vector<28x8xf32>
    %219 = arith.mulf %218, %217 : vector<28x8xf32>
    %220 = arith.addf %216, %219 : vector<28x8xf32>
    %221 = vector.extract_strided_slice %5 {offsets = [0, 80], sizes = [28, 8], strides = [1, 1]} : vector<28x96xf32> to vector<28x8xf32>
    %222 = vector.broadcast %163 : vector<28x1xf32> to vector<28x8xf32>
    %223 = arith.mulf %222, %221 : vector<28x8xf32>
    %224 = arith.addf %220, %223 : vector<28x8xf32>
    %225 = vector.extract_strided_slice %5 {offsets = [0, 88], sizes = [28, 8], strides = [1, 1]} : vector<28x96xf32> to vector<28x8xf32>
    %226 = vector.broadcast %182 : vector<28x1xf32> to vector<28x8xf32>
    %227 = arith.mulf %226, %225 : vector<28x8xf32>
    %228 = arith.addf %224, %227 : vector<28x8xf32>
    %229 = vector.extract_strided_slice %5 {offsets = [0, 64], sizes = [28, 8], strides = [1, 1]} : vector<28x96xf32> to vector<28x8xf32>
    %230 = vector.broadcast %126 : vector<28x1xf32> to vector<28x8xf32>
    %231 = arith.mulf %230, %229 : vector<28x8xf32>
    %232 = vector.extract_strided_slice %5 {offsets = [0, 72], sizes = [28, 8], strides = [1, 1]} : vector<28x96xf32> to vector<28x8xf32>
    %233 = vector.broadcast %145 : vector<28x1xf32> to vector<28x8xf32>
    %234 = arith.mulf %233, %232 : vector<28x8xf32>
    %235 = arith.addf %231, %234 : vector<28x8xf32>
    %236 = vector.extract_strided_slice %5 {offsets = [0, 80], sizes = [28, 8], strides = [1, 1]} : vector<28x96xf32> to vector<28x8xf32>
    %237 = vector.broadcast %164 : vector<28x1xf32> to vector<28x8xf32>
    %238 = arith.mulf %237, %236 : vector<28x8xf32>
    %239 = arith.addf %235, %238 : vector<28x8xf32>
    %240 = vector.extract_strided_slice %5 {offsets = [0, 88], sizes = [28, 8], strides = [1, 1]} : vector<28x96xf32> to vector<28x8xf32>
    %241 = vector.broadcast %183 : vector<28x1xf32> to vector<28x8xf32>
    %242 = arith.mulf %241, %240 : vector<28x8xf32>
    %243 = arith.addf %239, %242 : vector<28x8xf32>
    %244 = tpu.concatenate %198, %213, %228, %243 in 1 : vector<28x8xf32>, vector<28x8xf32>, vector<28x8xf32>, vector<28x8xf32> -> vector<28x32xf32>
    %c0_40 = arith.constant 0 : index
    %c0_41 = arith.constant 0 : index
    %245 = vector.load %arg4[%c0_40, %c0_41] : memref<28x32xf32, #tpu.memory_space<vmem>>, vector<28x32xf32>
    tpu.vector_store %arg4[%c0_40, %c0_41], %244 {strides = array<i32>} : memref<28x32xf32, #tpu.memory_space<vmem>>, vector<28x32xf32>,
    return
  }
}

</mosaic_0001>

<bundles_post_ra>
// kernel: tpu_custom_call.1
= control target key start
LH: loop header
LB: loop body
LE: loop exit
PB: predicated region body
PF: predicated region fallthrough
CT: control target
= control target key end

     0   :  { %11 = vsyncpa [#allocation3], 0  ;;  %s4964_s0 = inlined_call_operand.vmem [shape: f32[28,96], index: 0, kind: input, shape index: {}]   ;;  %s4965_s1 = inlined_call_operand.hbm [shape: f32[96,96], index: 1, kind: input, shape index: {}]   ;;  %s4966_s2 = inlined_call_operand.vmem [shape: f32[1,96], index: 2, kind: input, shape index: {}]   ;;  %s4967_s3 = inlined_call_operand.vmem [shape: f32[28,16], index: 3, kind: input, shape index: {}]   ;;  %s4968_s4 = inlined_call_operand.hbm [shape: f32[28,32], index: 4, kind: output, shape index: {0}]   ;;  %s4969_s5 = inlined_call_operand.vmem [shape: f32[28,16], index: 5, kind: output, shape index: {1}]  }
   0x1   :  { %12 = vsyncpa [#allocation4], 0  ;;  %s19_s20 = sshll.u32 %s4965_s1, 4  ;;  %s3067_s21 = smov [#allocation2]   ;;  %s20_s20 = int_to_ptr.hbm [resolvable:$true] %s19_s20 }
   0x2   :  { %s21_s22 = sshll.u32 %s3067_s21, 4  ;;  %s3068_s23 = smov 128   ;;  %s22_s22 = int_to_ptr.vmem [resolvable:$true] %s21_s22 }
   0x3   :  { %s3069_s24 = smov 8  }
   0x4   :  { %27 = dma.hbm_to_vmem [thread:$0]  %s20_s20, 1536, %s22_s22, [#allocation3], %s3068_s23, %s3068_s23, %s3069_s24  }
   0x5   :  { %3063 = dma.done.wait [#allocation3], 1536  }
   0x6   :  { %3064 = vsyncadd [#allocation3], 4294965760  ;;  %v51_v0 = vld [vmem:[#allocation2 + $0x58] sm:$0xff]  ;;  %v50_v1 = vld [vmem:[#allocation2 + $0x50] sm:$0xff]  ;;  %vm56_vm0 = vcmask 785408   ;;  %s3070_s9 = smov 80  }
   0x7   :  { %73 = vmatpush.msra.mxu0 %v51_v0  ;;  %2738 = vmatpush.msra.mxu1 %v51_v0  ;;  %v49_v2 = vld [vmem:[#allocation2 + $0x48] sm:$0xff]  ;;  %v48_v3 = vld [vmem:[#allocation2 + $0x40] sm:$0xff]  ;;  %v47_v4 = vld [vmem:[#allocation2 + $0x38] sm:$0xff]  ;;  %s3071_s10 = smov 88   ;;  %s3073_s11 = smov 72   ;;  %vm118_vm1 = vcmask 64512  }
   0x8   :  { %2739 = vmatpush.msra.mxu2 %v51_v0  ;;  %2740 = vmatpush.msra.mxu3 %v51_v0  ;;  %v46_v5 = vld [vmem:[#allocation2 + $0x30] sm:$0xff]  ;;  %v45_v6 = vld [vmem:[#allocation2 + $0x28] sm:$0xff]  ;;  %v44_v7 = vld [vmem:[#allocation2 + $0x20] sm:$0xff]  ;;  %s3075_s12 = smov 120   ;;  %vm128_vm2 = vcmask 60416   ;;  %vm644_vm3 = vcmask 7168  }
   0x9   :  { %74 = vmatpush.msra.mxu0 %v50_v1  ;;  %2741 = vmatpush.msra.mxu1 %v50_v1  ;;  %v43_v8 = vld [vmem:[#allocation2 + $0x18] sm:$0xff]  ;;  %v42_v9 = vld [vmem:[#allocation2 + $0x10] sm:$0xff]  ;;  %v41_v10 = vld [vmem:[#allocation2 + $0x8] sm:$0xff]  ;;  %vm649_vm4 = vcmask 15360   ;;  %vm654_vm5 = vcmask 23552   ;;  %vm659_vm6 = vcmask 31744  }
   0xa   :  { %2742 = vmatpush.msra.mxu2 %v50_v1  ;;  %2743 = vmatpush.msra.mxu3 %v50_v1  ;;  %v40_v11 = vld [vmem:[#allocation2] sm:$0xff]  ;;  %v37_v13 = vld [vmem:[%s4964_s0 + $0x8] sm:$0xff]  ;;  %v38_v14 = vld [vmem:[%s4964_s0 + $0x10] sm:$0xff]  ;;  %vm664_vm7 = vcmask 39936   ;;  %s3076_s15 = smov 112   ;;  %vm669_vm8 = vcmask 48128  }
   0xb   :  { %75 = vmatpush.msra.mxu0 %v49_v2  ;;  %2744 = vmatpush.msra.mxu1 %v49_v2  ;;  %v36_v12 = vld [vmem:[%s4964_s0] sm:$0xff]  ;;  %v39_v15 = vld [vmem:[%s4964_s0 + $0x18] sm:$0xf]  ;;  %s3072_s0 = smov 96   ;;  %vm674_vm9 = vcmask 56320   ;;  %vm683_vm10 = vcmask 72704  }
   0xc   :  { %2745 = vmatpush.msra.mxu2 %v49_v2  ;;  %2746 = vmatpush.msra.mxu3 %v49_v2  ;;  %v2854_v16 = vld [vmem:[%s4966_s2] ss:$0 sm:$0xff]  ;;  %s3074_s2 = smov 104   ;;  %vm688_vm11 = vcmask 80896   ;;  %vm693_vm12 = vcmask 89088   ;;  %vm703_vm13 = vcmask 105472  }
   0xd   :  { %76 = vmatpush.msra.mxu0 %v48_v3  ;;  %2747 = vmatpush.msra.mxu1 %v48_v3  ;;  %vm698_vm14 = vcmask 97280   ;;  %s3077_s18 = smov 124   ;;  %s3078_s1 = smov 116   ;;  %vm713_vm15 = vcmask 121856  }
   0xe   :  { %2748 = vmatpush.msra.mxu2 %v48_v3  ;;  %2749 = vmatpush.msra.mxu3 %v48_v3  ;;  %s3079_s30 = smov 4   ;;  %s3097_s8 = smov 64  }
   0xf   :  { %77 = vmatpush.msra.mxu0 %v47_v4  ;;  %2750 = vmatpush.msra.mxu1 %v47_v4 }
  0x10   :  { %2751 = vmatpush.msra.mxu2 %v47_v4  ;;  %2752 = vmatpush.msra.mxu3 %v47_v4 }
  0x11   :  { %78 = vmatpush.msra.mxu0 %v46_v5  ;;  %2753 = vmatpush.msra.mxu1 %v46_v5 }
  0x12   :  { %2754 = vmatpush.msra.mxu2 %v46_v5  ;;  %2755 = vmatpush.msra.mxu3 %v46_v5 }
  0x13   :  { %79 = vmatpush.msra.mxu0 %v45_v6  ;;  %2756 = vmatpush.msra.mxu1 %v45_v6 }
  0x14   :  { %2757 = vmatpush.msra.mxu2 %v45_v6  ;;  %2758 = vmatpush.msra.mxu3 %v45_v6 }
  0x15   :  { %80 = vmatpush.msra.mxu0 %v44_v7  ;;  %2759 = vmatpush.msra.mxu1 %v44_v7 }
  0x16   :  { %2760 = vmatpush.msra.mxu2 %v44_v7  ;;  %2761 = vmatpush.msra.mxu3 %v44_v7 }
  0x17   :  { %81 = vmatpush.msra.mxu0 %v43_v8  ;;  %2762 = vmatpush.msra.mxu1 %v43_v8 }
  0x18   :  { %2763 = vmatpush.msra.mxu2 %v43_v8  ;;  %2764 = vmatpush.msra.mxu3 %v43_v8 }
  0x19   :  { %82 = vmatpush.msra.mxu0 %v42_v9  ;;  %2765 = vmatpush.msra.mxu1 %v42_v9 }
  0x1a   :  { %2766 = vmatpush.msra.mxu2 %v42_v9  ;;  %2767 = vmatpush.msra.mxu3 %v42_v9 }
  0x1b   :  { %83 = vmatpush.msra.mxu0 %v41_v10  ;;  %2768 = vmatpush.msra.mxu1 %v41_v10 }
  0x1c   :  { %2769 = vmatpush.msra.mxu2 %v41_v10  ;;  %2770 = vmatpush.msra.mxu3 %v41_v10 }
  0x1d   :  { %84 = vmatpush.msra.mxu0 %v40_v11  ;;  %2771 = vmatpush.msra.mxu1 %v40_v11 }
  0x1e   :  { %2734 = vmatmul.msk.f32.vlgmr.msra.gmra.mxu0 %vm56_vm0, %v36_v12  ;;  %2735 = vmatmul.msk.f32.vlgmr.msra.gmra.mxu1 %vm56_vm0, %v37_v13 }
  0x1f   :  { %2772 = vmatpush.msra.mxu2 %v40_v11  ;;  %2773 = vmatpush.msra.mxu3 %v40_v11 }
  0x20   :  { %2736 = vmatmul.msk.f32.vlgmr.msra.gmra.mxu2 %vm56_vm0, %v38_v14  ;;  %2737 = vmatmul.msk.f32.vlgmr.msra.gmra.mxu3 %vm56_vm0, %v39_v15  ;;  %vm708_vm0 = vcmask 113664  }
  0x9b   :  { %v86_v17 = vpop.f32.mrf.mxu0  ;;  %v89_v19 = vpop.f32.mrf.mxu1 }
  0x9c   :  { %v3150_v18 = vadd.f32 %v2854_v16, %v86_v17  ;;  %v3157_v20 = vadd.f32 %v2854_v16, %v89_v19 }
  0x9e   :  { %5047 = vst [vmem:[#allocation8_spill] sm:$0xff] %v3150_v18  ;;  %172 = vrot.lane.b32.xlu1 %v3150_v18, %s3070_s9  ;;  %140 = vrot.lane.b32.xlu2 %v3150_v18, %s3071_s10 }
  0x9f   :  { %102 = vrot.lane.b32.xlu0 %v3150_v18, %s3072_s0  ;;  %5048 = vst [vmem:[#allocation9_spill] sm:$0xff] %v3157_v20 }
  0xa3   :  { %v92_v21 = vpop.f32.mrf.mxu2  ;;  %v95_v23 = vpop.f32.mrf.mxu3 }
  0xa4   :  { %v3164_v22 = vadd.f32 %v2854_v16, %v92_v21  ;;  %v3171_v24 = vadd.f32 %v2854_v16, %v95_v23 }
  0xa6   :  { %206 = vrot.lane.b32.xlu1 %v3157_v20, %s3073_s11  ;;  %142 = vrot.lane.b32.xlu2 %v3157_v20, %s3071_s10  ;;  %5049 = vst [vmem:[#allocation10_spill] sm:$0xff] %v3164_v22 }
  0xa7   :  { %104 = vrot.lane.b32.xlu0 %v3157_v20, %s3072_s0  ;;  %5050 = vst [vmem:[#allocation11_spill] sm:$0xff] %v3171_v24 }
  0xae   :  { %106 = vrot.lane.b32.xlu1 %v3164_v22, %s3072_s0  ;;  %204 = vrot.lane.b32.xlu2 %v3150_v18, %s3073_s11 }
  0xaf   :  { %174 = vrot.lane.b32.xlu0 %v3157_v20, %s3070_s9 }
  0xb6   :  { %108 = vrot.lane.b32.xlu1 %v3171_v24, %s3072_s0  ;;  %236 = vrot.lane.b32.xlu2 %v3150_v18, %s3074_s2 }
  0xb7   :  { %238 = vrot.lane.b32.xlu0 %v3157_v20, %s3074_s2 }
  0xbe   :  { %176 = vrot.lane.b32.xlu1 %v3164_v22, %s3070_s9  ;;  %144 = vrot.lane.b32.xlu2 %v3164_v22, %s3071_s10 }
  0xbf   :  { %178 = vrot.lane.b32.xlu0 %v3171_v24, %s3070_s9 }
  0xc6   :  { %240 = vrot.lane.b32.xlu1 %v3164_v22, %s3074_s2  ;;  %146 = vrot.lane.b32.xlu2 %v3171_v24, %s3071_s10 }
  0xc7   :  { %208 = vrot.lane.b32.xlu0 %v3164_v22, %s3073_s11 }
  0xce   :  { %210 = vrot.lane.b32.xlu2 %v3171_v24, %s3073_s11 }
  0xcf   :  { %242 = vrot.lane.b32.xlu0 %v3171_v24, %s3074_s2 }
  0xf8   :  { %v141_v25 = vpop.permute.xlu2 %140 }
  0xf9   :  { %v3213_v36 = vmul.f32 %v141_v25, %v3150_v18 }
  0xfb   :  { %v156_v42 = vsel %vm118_vm1, %v3213_v36, 0.0 }
 0x100   :  { %v143_v26 = vpop.permute.xlu2 %142 }
 0x101   :  { %v3210_v34 = vmul.f32 %v143_v26, %v3157_v20 }
 0x103   :  { %v159_v47 = vsel %vm118_vm1, %v3210_v34, 0.0 }
 0x108   :  { %v205_v27 = vpop.permute.xlu2 %204 }
 0x109   :  { %v216_v48 = vmul.f32 %v205_v27, %v3150_v18 }
 0x10b   :  { %v220_v53 = vsel %vm118_vm1, %v216_v48, 0.0 }
 0x110   :  { %v237_v28 = vpop.permute.xlu2 %236  ;;  %v173_v39 = vpop.permute.xlu1 %172 }
 0x111   :  { %v3195_v29 = vmul.f32 %v237_v28, %v3150_v18  ;;  %v103_v30 = vpop.permute.xlu0 %102  ;;  %v3239_v49 = vmul.f32 %v173_v39, %v3150_v18 }
 0x112   :  { %v3200_v31 = vmul.f32 %v103_v30, %v3150_v18 }
 0x113   :  { %256 = vrot.lane.b32.xlu2 %v3195_v29, %s3075_s12  ;;  %v188_v55 = vsel %vm118_vm1, %v3239_v49, 0.0 }
 0x114   :  { %v119_v41 = vsel %vm118_vm1, %v3200_v31, 0.0 }
 0x118   :  { %v207_v40 = vpop.permute.xlu1 %206  ;;  %v145_v0 = vpop.permute.xlu2 %144 }
 0x119   :  { %v105_v32 = vpop.permute.xlu0 %104  ;;  %v217_v50 = vmul.f32 %v207_v40, %v3157_v20  ;;  %v3267_v1 = vmul.f32 %v145_v0, %v3164_v22 }
 0x11a   :  { %v3203_v33 = vmul.f32 %v105_v32, %v3157_v20 }
 0x11b   :  { %288 = vrot.lane.b32.xlu2 %v3200_v31, %s3075_s12  ;;  %v223_v54 = vsel %vm118_vm1, %v217_v50, 0.0  ;;  %v162_v4 = vsel %vm118_vm1, %v3267_v1, 0.0 }
 0x11c   :  { %290 = vrot.lane.b32.xlu0 %v3203_v33, %s3075_s12  ;;  %v122_v45 = vsel %vm118_vm1, %v3203_v33, 0.0 }
 0x120   :  { %v107_v43 = vpop.permute.xlu1 %106  ;;  %v147_v2 = vpop.permute.xlu2 %146 }
 0x121   :  { %v175_v35 = vpop.permute.xlu0 %174  ;;  %v3257_v62 = vmul.f32 %v107_v43, %v3164_v22  ;;  %v3281_v9 = vmul.f32 %v147_v2, %v3171_v24 }
 0x122   :  { %v3229_v44 = vmul.f32 %v175_v35, %v3157_v20 }
 0x123   :  { %322 = vrot.lane.b32.xlu2 %v3210_v34, %s3075_s12  ;;  %v125_v7 = vsel %vm118_vm1, %v3257_v62, 0.0  ;;  %v165_v12 = vsel %vm128_vm2, %v3281_v9, 0.0 }
 0x124   :  { %320 = vrot.lane.b32.xlu0 %v3213_v36, %s3075_s12  ;;  %v191_v46 = vsel %vm118_vm1, %v3229_v44, 0.0 }
 0x128   :  { %v109_v51 = vpop.permute.xlu1 %108  ;;  %v211_v3 = vpop.permute.xlu2 %210 }
 0x129   :  { %v239_v37 = vpop.permute.xlu0 %238  ;;  %v3262_v63 = vmul.f32 %v109_v51, %v3171_v24  ;;  %v219_v16 = vmul.f32 %v211_v3, %v3171_v24 }
 0x12a   :  { %v3220_v38 = vmul.f32 %v239_v37, %v3157_v20 }
 0x12b   :  { %v129_v11 = vsel %vm128_vm2, %v3262_v63, 0.0  ;;  %v229_v19 = vsel %vm128_vm2, %v219_v16, 0.0 }
 0x12c   :  { %258 = vrot.lane.b32.xlu1 %v3220_v38, %s3075_s12 }
 0x130   :  { %v177_v56 = vpop.permute.xlu1 %176 }
 0x131   :  { %v179_v52 = vpop.permute.xlu0 %178  ;;  %v3274_v5 = vmul.f32 %v177_v56, %v3164_v22 }
 0x132   :  { %v187_v10 = vmul.f32 %v179_v52, %v3171_v24 }
 0x133   :  { %v194_v8 = vsel %vm118_vm1, %v3274_v5, 0.0 }
 0x134   :  { %v197_v14 = vsel %vm128_vm2, %v187_v10, 0.0 }
 0x138   :  { %v241_v58 = vpop.permute.xlu1 %240 }
 0x139   :  { %v209_v57 = vpop.permute.xlu0 %208  ;;  %v3247_v60 = vmul.f32 %v241_v58, %v3164_v22 }
 0x13a   :  { %v218_v13 = vmul.f32 %v209_v57, %v3164_v22 }
 0x13c   :  { %v226_v17 = vsel %vm118_vm1, %v218_v13, 0.0 }
 0x141   :  { %v243_v59 = vpop.permute.xlu0 %242 }
 0x142   :  { %v3250_v61 = vmul.f32 %v243_v59, %v3171_v24 }
 0x14c   :  { %120 = vadd.xlane.f32.xlu2 %v119_v41 }
 0x14e   :  { %157 = vadd.xlane.f32.xlu0 %v156_v42 }
 0x154   :  { %123 = vadd.xlane.f32.xlu2 %v122_v45 }
 0x156   :  { %192 = vadd.xlane.f32.xlu0 %v191_v46  ;;  %160 = vadd.xlane.f32.xlu1 %v159_v47 }
 0x15c   :  { %221 = vadd.xlane.f32.xlu2 %v220_v53 }
 0x15e   :  { %224 = vadd.xlane.f32.xlu0 %v223_v54  ;;  %189 = vadd.xlane.f32.xlu1 %v188_v55 }
 0x16d   :  { %v257_v6 = vpop.permute.xlu2 %256 }
 0x16e   :  { %v268_v25 = vsel %vm118_vm1, %v257_v6, 0.0 }
 0x172   :  { %260 = vrot.lane.b32.xlu0 %v3247_v60, %s3075_s12 }
 0x174   :  { %262 = vrot.lane.b32.xlu2 %v3250_v61, %s3075_s12 }
 0x175   :  { %v289_v15 = vpop.permute.xlu2 %288 }
 0x176   :  { %v300_v26 = vsel %vm118_vm1, %v289_v15, 0.0 }
 0x177   :  { %292 = vrot.lane.b32.xlu1 %v3257_v62, %s3075_s12 }
 0x17a   :  { %294 = vrot.lane.b32.xlu0 %v3262_v63, %s3075_s12 }
 0x17d   :  { %v323_v23 = vpop.permute.xlu2 %322 }
 0x17e   :  { %v335_v58 = vsel %vm118_vm1, %v323_v23, 0.0 }
 0x17f   :  { %324 = vrot.lane.b32.xlu1 %v3267_v1, %s3075_s12 }
 0x18e   :  { %v291_v21 = vpop.permute.xlu0 %290 }
 0x18f   :  { %v303_v55 = vsel %vm118_vm1, %v291_v21, 0.0 }
 0x196   :  { %v321_v28 = vpop.permute.xlu0 %320 }
 0x197   :  { %v332_v57 = vsel %vm118_vm1, %v321_v28, 0.0 }
 0x19d   :  { %163 = vadd.xlane.f32.xlu2 %v162_v4 }
 0x19e   :  { %v259_v35 = vpop.permute.xlu1 %258 }
 0x19f   :  { %v271_v50 = vsel %vm118_vm1, %v259_v35, 0.0 }
 0x1a4   :  { %126 = vadd.xlane.f32.xlu0 %v125_v7 }
 0x1a5   :  { %195 = vadd.xlane.f32.xlu2 %v194_v8 }
 0x1a9   :  { %130 = vadd.xlane.f32.xlu1 %v129_v11 }
 0x1ac   :  { %166 = vadd.xlane.f32.xlu0 %v165_v12  ;;  %v3345_v12 = vld [vmem:[%s4967_s3 + $0x10] sm:$0xff] }
 0x1ad   :  { %198 = vadd.xlane.f32.xlu2 %v197_v14 }
 0x1b1   :  { %227 = vadd.xlane.f32.xlu1 %v226_v17 }
 0x1b5   :  { %230 = vadd.xlane.f32.xlu2 %v229_v19 }
 0x1b9   :  { %269 = vadd.xlane.f32.xlu1 %v268_v25 }
 0x1bd   :  { %301 = vadd.xlane.f32.xlu2 %v300_v26 }
 0x1bf   :  { %v3295_v27 = vpop.xlane.xlu2 %120 }
 0x1c0   :  { %326 = vrot.lane.b32.xlu0 %v3281_v9, %s3075_s12 }
 0x1c1   :  { %v3301_v32 = vpop.xlane.xlu0 %157 }
 0x1c7   :  { %v3299_v30 = vpop.xlane.xlu2 %123 }
 0x1c9   :  { %v3305_v39 = vpop.xlane.xlu0 %192  ;;  %v3307_v40 = vpop.xlane.xlu1 %160 }
 0x1cf   :  { %v3303_v37 = vpop.xlane.xlu2 %221 }
 0x1d1   :  { %v3310_v43 = vpop.xlane.xlu0 %224  ;;  %v3312_v45 = vpop.xlane.xlu1 %189 }
 0x1d7   :  { %v263_v41 = vpop.permute.xlu2 %262 }
 0x1d8   :  { %v277_v42 = vsel %vm128_vm2, %v263_v41, 0.0 }
 0x1d9   :  { %278 = vadd.xlane.f32.xlu1 %v277_v42 }
 0x1e4   :  { %v261_v46 = vpop.permute.xlu0 %260 }
 0x1e5   :  { %v274_v47 = vsel %vm118_vm1, %v261_v46, 0.0 }
 0x1e6   :  { %275 = vadd.xlane.f32.xlu2 %v274_v47 }
 0x1e9   :  { %v293_v48 = vpop.permute.xlu1 %292 }
 0x1ea   :  { %272 = vadd.xlane.f32.xlu0 %v271_v50  ;;  %v306_v51 = vsel %vm118_vm1, %v293_v48, 0.0 }
 0x1eb   :  { %307 = vadd.xlane.f32.xlu1 %v306_v51 }
 0x1ec   :  { %v295_v52 = vpop.permute.xlu0 %294 }
 0x1ed   :  { %v309_v53 = vsel %vm128_vm2, %v295_v52, 0.0 }
 0x1ee   :  { %310 = vadd.xlane.f32.xlu2 %v309_v53 }
 0x1f1   :  { %v325_v54 = vpop.permute.xlu1 %324 }
 0x1f2   :  { %304 = vadd.xlane.f32.xlu0 %v303_v55  ;;  %v338_v56 = vsel %vm118_vm1, %v325_v54, 0.0 }
 0x1f3   :  { %339 = vadd.xlane.f32.xlu1 %v338_v56 }
 0x1f6   :  { %333 = vadd.xlane.f32.xlu2 %v332_v57 }
 0x1fa   :  { %336 = vadd.xlane.f32.xlu0 %v335_v58 }
 0x20c   :  { %354 = vrot.lane.b32.xlu1 %v3229_v44, %s3075_s12 }
 0x20e   :  { %352 = vrot.lane.b32.xlu0 %v3239_v49, %s3075_s12 }
 0x210   :  { %v164_v0 = vpop.xlane.xlu2 %163 }
 0x211   :  { %v3353_v15 = vadd.f32 %v164_v0, %v3345_v12 }
 0x213   :  { %5052 = vst [vmem:[#allocation13_spill] sm:$0xff] %v3353_v15 }
 0x216   :  { %358 = vrot.lane.b32.xlu0 %v187_v10, %s3075_s12 }
 0x217   :  { %v127_v59 = vpop.xlane.xlu0 %126 }
 0x218   :  { %v196_v4 = vpop.xlane.xlu2 %195  ;;  %v3350_v14 = vadd.f32 %v3345_v12, %v127_v59 }
 0x21a   :  { %5051 = vst [vmem:[#allocation12_spill] sm:$0xff] %v3350_v14  ;;  %v647_v17 = vsel %vm644_vm3, %v3350_v14, %v3353_v15 }
 0x21c   :  { %v3330_v7 = vpop.xlane.xlu1 %130 }
 0x21f   :  { %v3327_v2 = vpop.xlane.xlu0 %166 }
 0x220   :  { %v3332_v8 = vpop.xlane.xlu2 %198 }
 0x224   :  { %v228_v11 = vpop.xlane.xlu1 %227 }
 0x225   :  { %v3362_v19 = vadd.f32 %v228_v11, %v3345_v12 }
 0x227   :  { %5054 = vst [vmem:[#allocation15_spill] sm:$0xff] %v3362_v19 }
 0x228   :  { %v3334_v44 = vpop.xlane.xlu2 %230 }
 0x22c   :  { %v3338_v49 = vpop.xlane.xlu1 %269 }
 0x230   :  { %v3340_v10 = vpop.xlane.xlu2 %301 }
 0x232   :  { %v327_v3 = vpop.permute.xlu0 %326 }
 0x233   :  { %v341_v6 = vsel %vm128_vm2, %v327_v3, 0.0 }
 0x234   :  { %342 = vadd.xlane.f32.xlu2 %v341_v6 }
 0x24c   :  { %356 = vrot.lane.b32.xlu2 %v3274_v5, %s3075_s12  ;;  %v3347_v13 = vpop.xlane.xlu1 %278  ;;  %v3356_v5 = vadd.f32 %v196_v4, %v3345_v12 }
 0x24e   :  { %5053 = vst [vmem:[#allocation14_spill] sm:$0xff] %v3356_v5  ;;  %v652_v23 = vsel %vm649_vm4, %v647_v17, %v3356_v5 }
 0x24f   :  { %v657_v26 = vsel %vm654_vm5, %v652_v23, %v3362_v19 }
 0x259   :  { %v276_v16 = vpop.xlane.xlu2 %275 }
 0x25a   :  { %v3365_v21 = vadd.f32 %v276_v16, %v3345_v12 }
 0x25c   :  { %v662_v35 = vsel %vm659_vm6, %v657_v26, %v3365_v21 }
 0x25d   :  { %v3378_v42 = vpop.xlane.xlu0 %272 }
 0x25e   :  { %v308_v25 = vpop.xlane.xlu1 %307 }
 0x25f   :  { %v3372_v28 = vadd.f32 %v308_v25, %v3345_v12 }
 0x261   :  { %5055 = vst [vmem:[#allocation16_spill] sm:$0xff] %v3372_v28  ;;  %v667_v41 = vsel %vm664_vm7, %v662_v35, %v3372_v28  ;;  %v3389_v56 = vpop.xlane.xlu2 %310 }
 0x265   :  { %v3380_v46 = vpop.xlane.xlu0 %304 }
 0x266   :  { %v340_v47 = vpop.xlane.xlu1 %339 }
 0x267   :  { %v3424_v35 = vadd.f32 %v340_v47, %v3345_v12 }
 0x269   :  { %v3393_v57 = vpop.xlane.xlu2 %333  ;;  %5056 = vst [vmem:[#allocation17_spill] sm:$0xff] %v3424_v35 }
 0x26d   :  { %v3382_v48 = vpop.xlane.xlu0 %336 }
 0x27e   :  { %v355_v50 = vpop.permute.xlu1 %354 }
 0x27f   :  { %v367_v51 = vsel %vm118_vm1, %v355_v50, 0.0 }
 0x280   :  { %368 = vadd.xlane.f32.xlu0 %v367_v51  ;;  %v353_v52 = vpop.permute.xlu0 %352 }
 0x281   :  { %v364_v53 = vsel %vm118_vm1, %v353_v52, 0.0  ;;  %v672_v52 = vsel %vm669_vm8, %v667_v41, %v3424_v35 }
 0x282   :  { %365 = vadd.xlane.f32.xlu1 %v364_v53 }
 0x288   :  { %v359_v54 = vpop.permute.xlu0 %358 }
 0x289   :  { %v373_v55 = vsel %vm128_vm2, %v359_v54, 0.0 }
 0x28a   :  { %374 = vadd.xlane.f32.xlu1 %v373_v55 }
 0x294   :  { %380 = vrot.lane.b32.xlu0 %v3150_v18, %s3076_s15 }
 0x29c   :  { %386 = vrot.lane.b32.xlu0 %v3171_v24, %s3076_s15 }
 0x2a3   :  { %384 = vrot.lane.b32.xlu1 %v3164_v22, %s3076_s15 }
 0x2a7   :  { %v3397_v58 = vpop.xlane.xlu2 %342 }
 0x2af   :  { %v357_v59 = vpop.permute.xlu2 %356 }
 0x2b0   :  { %v370_v0 = vsel %vm118_vm1, %v357_v59, 0.0 }
 0x2b1   :  { %371 = vadd.xlane.f32.xlu2 %v370_v0 }
 0x2c9   :  { %382 = vrot.lane.b32.xlu2 %v3157_v20, %s3076_s15 }
 0x2f3   :  { %v3402_v3 = vpop.xlane.xlu0 %368 }
 0x2f5   :  { %v3404_v4 = vpop.xlane.xlu1 %365 }
 0x2fd   :  { %v3411_v16 = vpop.xlane.xlu1 %374 }
 0x306   :  { %v381_v6 = vpop.permute.xlu0 %380 }
 0x307   :  { %v3407_v11 = vmul.f32 %v381_v6, %v3150_v18 }
 0x309   :  { %400 = vrot.lane.b32.xlu2 %v3407_v11, %s3076_s15 }
 0x30e   :  { %v387_v17 = vpop.permute.xlu0 %386 }
 0x30f   :  { %v3414_v23 = vmul.f32 %v387_v17, %v3171_v24 }
 0x311   :  { %406 = vrot.lane.b32.xlu2 %v3414_v23, %s3076_s15 }
 0x315   :  { %v385_v25 = vpop.permute.xlu1 %384 }
 0x316   :  { %v3419_v26 = vmul.f32 %v385_v25, %v3164_v22 }
 0x318   :  { %404 = vrot.lane.b32.xlu1 %v3419_v26, %s3076_s15 }
 0x324   :  { %v372_v50 = vpop.xlane.xlu2 %371 }
 0x325   :  { %v3427_v51 = vadd.f32 %v372_v50, %v3345_v12 }
 0x327   :  { %5057 = vst [vmem:[#allocation18_spill] sm:$0xff] %v3427_v51  ;;  %v3433_v53 = vsel %vm674_vm9, %v672_v52, %v3427_v51 }
 0x32c   :  { %v383_v54 = vpop.permute.xlu2 %382 }
 0x32d   :  { %v3436_v55 = vmul.f32 %v383_v54, %v3157_v20 }
 0x32f   :  { %402 = vrot.lane.b32.xlu0 %v3436_v55, %s3076_s15 }
 0x363   :  { %v401_v47 = vpop.permute.xlu2 %400 }
 0x364   :  { %v412_v59 = vsel %vm118_vm1, %v401_v47, 0.0 }
 0x365   :  { %413 = vadd.xlane.f32.xlu0 %v412_v59 }
 0x36b   :  { %v407_v0 = vpop.permute.xlu2 %406 }
 0x36c   :  { %v421_v6 = vsel %vm128_vm2, %v407_v0, 0.0 }
 0x36d   :  { %422 = vadd.xlane.f32.xlu0 %v421_v6 }
 0x381   :  { %432 = vrot.lane.b32.xlu0 %v3247_v60, %s3076_s15 }
 0x38a   :  { %v405_v41 = vpop.permute.xlu1 %404 }
 0x38b   :  { %v418_v17 = vsel %vm118_vm1, %v405_v41, 0.0 }
 0x38c   :  { %419 = vadd.xlane.f32.xlu2 %v418_v17 }
 0x3a1   :  { %v403_v25 = vpop.permute.xlu0 %402 }
 0x3a2   :  { %v415_v50 = vsel %vm118_vm1, %v403_v25, 0.0 }
 0x3a3   :  { %416 = vadd.xlane.f32.xlu1 %v415_v50 }
 0x3a4   :  { %430 = vrot.lane.b32.xlu2 %v3220_v38, %s3076_s15 }
 0x3ac   :  { %434 = vrot.lane.b32.xlu2 %v3250_v61, %s3076_s15 }
 0x3bc   :  { %428 = vrot.lane.b32.xlu1 %v3195_v29, %s3076_s15 }
 0x3d8   :  { %v3452_v52 = vpop.xlane.xlu0 %413 }
 0x3e0   :  { %v3454_v54 = vpop.xlane.xlu0 %422 }
 0x3f3   :  { %v433_v47 = vpop.permute.xlu0 %432 }
 0x3f4   :  { %v446_v59 = vsel %vm118_vm1, %v433_v47, 0.0 }
 0x3f5   :  { %447 = vadd.xlane.f32.xlu2 %v446_v59 }
 0x3ff   :  { %v3457_v0 = vpop.xlane.xlu2 %419 }
 0x407   :  { %v431_v6 = vpop.permute.xlu2 %430 }
 0x408   :  { %v443_v41 = vsel %vm118_vm1, %v431_v6, 0.0 }
 0x409   :  { %444 = vadd.xlane.f32.xlu1 %v443_v41 }
 0x40d   :  { %458 = vrot.lane.b32.xlu2 %v3203_v33, %s3076_s15 }
 0x40f   :  { %v435_v47 = vpop.permute.xlu2 %434 }
 0x410   :  { %v449_v59 = vsel %vm128_vm2, %v435_v47, 0.0 }
 0x416   :  { %v3464_v17 = vpop.xlane.xlu1 %416 }
 0x422   :  { %456 = vrot.lane.b32.xlu1 %v3200_v31, %s3076_s15 }
 0x42a   :  { %462 = vrot.lane.b32.xlu1 %v3262_v63, %s3076_s15 }
 0x42e   :  { %v429_v25 = vpop.permute.xlu1 %428 }
 0x42f   :  { %v440_v50 = vsel %vm118_vm1, %v429_v25, 0.0 }
 0x430   :  { %441 = vadd.xlane.f32.xlu0 %v440_v50 }
 0x438   :  { %450 = vadd.xlane.f32.xlu0 %v449_v59 }
 0x44c   :  { %460 = vrot.lane.b32.xlu0 %v3257_v62, %s3076_s15 }
 0x468   :  { %v3472_v6 = vpop.xlane.xlu2 %447 }
 0x470   :  { %v459_v41 = vpop.permute.xlu2 %458 }
 0x471   :  { %v471_v19 = vsel %vm118_vm1, %v459_v41, 0.0 }
 0x472   :  { %472 = vadd.xlane.f32.xlu2 %v471_v19 }
 0x47c   :  { %v3477_v51 = vpop.xlane.xlu1 %444 }
 0x48a   :  { %484 = vrot.lane.b32.xlu2 %v3213_v36, %s3076_s15 }
 0x492   :  { %490 = vrot.lane.b32.xlu2 %v3281_v9, %s3076_s15 }
 0x494   :  { %v457_v25 = vpop.permute.xlu1 %456 }
 0x495   :  { %v468_v50 = vsel %vm118_vm1, %v457_v25, 0.0 }
 0x496   :  { %469 = vadd.xlane.f32.xlu0 %v468_v50 }
 0x49c   :  { %v463_v47 = vpop.permute.xlu1 %462 }
 0x49d   :  { %v477_v59 = vsel %vm128_vm2, %v463_v47, 0.0 }
 0x49e   :  { %478 = vadd.xlane.f32.xlu0 %v477_v59 }
 0x4a3   :  { %v3483_v5 = vpop.xlane.xlu0 %441 }
 0x4ab   :  { %v3487_v19 = vpop.xlane.xlu0 %450 }
 0x4b2   :  { %488 = vrot.lane.b32.xlu0 %v3267_v1, %s3076_s15 }
 0x4be   :  { %v461_v36 = vpop.permute.xlu0 %460 }
 0x4bf   :  { %v474_v41 = vsel %vm118_vm1, %v461_v36, 0.0 }
 0x4c0   :  { %475 = vadd.xlane.f32.xlu1 %v474_v41 }
 0x4d9   :  { %486 = vrot.lane.b32.xlu1 %v3210_v34, %s3076_s15 }
 0x4e5   :  { %v3492_v9 = vpop.xlane.xlu2 %472 }
 0x4e6   :  { %5058 = vst [vmem:[#allocation19_spill] sm:$0xff] %v3492_v9 }
 0x4ed   :  { %v485_v25 = vpop.permute.xlu2 %484 }
 0x4ee   :  { %v496_v50 = vsel %vm118_vm1, %v485_v25, 0.0 }
 0x4ef   :  { %497 = vadd.xlane.f32.xlu0 %v496_v50 }
 0x4f5   :  { %v491_v47 = vpop.permute.xlu2 %490 }
 0x4f6   :  { %v505_v59 = vsel %vm128_vm2, %v491_v47, 0.0 }
 0x4f7   :  { %506 = vadd.xlane.f32.xlu0 %v505_v59 }
 0x509   :  { %v3498_v1 = vpop.xlane.xlu0 %469 }
 0x50b   :  { %516 = vrot.lane.b32.xlu0 %v3164_v22, %s3075_s12 }
 0x511   :  { %v3500_v36 = vpop.xlane.xlu0 %478 }
 0x512   :  { %5059 = vst [vmem:[#allocation20_spill] sm:$0xff] %v3500_v36 }
 0x524   :  { %v489_v41 = vpop.permute.xlu0 %488 }
 0x525   :  { %v502_v34 = vsel %vm118_vm1, %v489_v41, 0.0 }
 0x526   :  { %503 = vadd.xlane.f32.xlu2 %v502_v34 }
 0x533   :  { %v476_v25 = vpop.xlane.xlu1 %475 }
 0x53e   :  { %514 = vrot.lane.b32.xlu2 %v3157_v20, %s3075_s12 }
 0x54b   :  { %v487_v50 = vpop.permute.xlu1 %486 }
 0x54c   :  { %v499_v35 = vsel %vm118_vm1, %v487_v50, 0.0 }
 0x54d   :  { %500 = vadd.xlane.f32.xlu1 %v499_v35 }
 0x562   :  { %v3508_v47 = vpop.xlane.xlu0 %497 }
 0x566   :  { %512 = vrot.lane.b32.xlu1 %v3150_v18, %s3075_s12 }
 0x56a   :  { %v3512_v59 = vpop.xlane.xlu0 %506 }
 0x56b   :  { %5060 = vst [vmem:[#allocation21_spill] sm:$0xff] %v3512_v59 }
 0x56e   :  { %518 = vrot.lane.b32.xlu1 %v3171_v24, %s3075_s12 }
 0x57d   :  { %v517_v41 = vpop.permute.xlu0 %516 }
 0x57e   :  { %v526_v34 = vmul.f32 %v517_v41, %v3164_v22 }
 0x580   :  { %536 = vrot.lane.b32.xlu1 %v526_v34, %s3074_s2 }
 0x599   :  { %v504_v15 = vpop.xlane.xlu2 %503 }
 0x5a1   :  { %v515_v28 = vpop.permute.xlu2 %514 }
 0x5a2   :  { %v525_v50 = vmul.f32 %v515_v28, %v3157_v20 }
 0x5a4   :  { %534 = vrot.lane.b32.xlu2 %v525_v50, %s3074_s2 }
 0x5c0   :  { %v3518_v35 = vpop.xlane.xlu1 %500 }
 0x5d8   :  { %v513_v14 = vpop.permute.xlu1 %512 }
 0x5d9   :  { %v524_v36 = vmul.f32 %v513_v14, %v3150_v18  ;;  %v5066_v18 = vld [vmem:[#allocation19_spill] sm:$0xff] }
 0x5db   :  { %532 = vrot.lane.b32.xlu0 %v524_v36, %s3074_s2 }
 0x5e0   :  { %v519_v9 = vpop.permute.xlu1 %518 }
 0x5e1   :  { %v527_v59 = vmul.f32 %v519_v9, %v3171_v24 }
 0x5e3   :  { %538 = vrot.lane.b32.xlu0 %v527_v59, %s3074_s2 }
 0x5f2   :  { %v537_v22 = vpop.permute.xlu1 %536 }
 0x5f3   :  { %v550_v28 = vsel %vm118_vm1, %v537_v22, 0.0 }
 0x5fe   :  { %v535_v41 = vpop.permute.xlu2 %534 }
 0x5ff   :  { %v547_v34 = vsel %vm118_vm1, %v535_v41, 0.0 }
 0x600   :  { %548 = vadd.xlane.f32.xlu1 %v547_v34 }
 0x60d   :  { %551 = vadd.xlane.f32.xlu0 %v550_v28 }
 0x619   :  { %560 = vrot.lane.b32.xlu1 %v3407_v11, %s3074_s2 }
 0x621   :  { %564 = vrot.lane.b32.xlu0 %v3419_v26, %s3074_s2 }
 0x629   :  { %566 = vrot.lane.b32.xlu0 %v3414_v23, %s3074_s2 }
 0x64d   :  { %v533_v14 = vpop.permute.xlu0 %532 }
 0x64e   :  { %v544_v9 = vsel %vm118_vm1, %v533_v14, 0.0 }
 0x64f   :  { %545 = vadd.xlane.f32.xlu2 %v544_v9 }
 0x655   :  { %v539_v36 = vpop.permute.xlu0 %538 }
 0x656   :  { %v553_v59 = vsel %vm128_vm2, %v539_v36, 0.0 }
 0x657   :  { %554 = vadd.xlane.f32.xlu2 %v553_v59  ;;  %v3566_v59 = vadd.f32 %v504_v15, %v3345_v12 }
 0x659   :  { %5061 = vst [vmem:[#allocation22_spill] sm:$0xff] %v3566_v59 }
 0x66f   :  { %562 = vrot.lane.b32.xlu2 %v3436_v55, %s3074_s2 }
 0x673   :  { %v3536_v50 = vpop.xlane.xlu1 %548 }
 0x680   :  { %v552_v22 = vpop.xlane.xlu0 %551 }
 0x68b   :  { %v561_v41 = vpop.permute.xlu1 %560 }
 0x68c   :  { %v572_v23 = vsel %vm118_vm1, %v561_v41, 0.0 }
 0x693   :  { %v565_v11 = vpop.permute.xlu0 %564 }
 0x694   :  { %v578_v26 = vsel %vm118_vm1, %v565_v11, 0.0 }
 0x695   :  { %579 = vadd.xlane.f32.xlu0 %v578_v26 }
 0x698   :  { %573 = vadd.xlane.f32.xlu2 %v572_v23 }
 0x69b   :  { %v567_v34 = vpop.permute.xlu0 %566 }
 0x69c   :  { %v581_v28 = vsel %vm128_vm2, %v567_v34, 0.0 }
 0x6a0   :  { %582 = vadd.xlane.f32.xlu2 %v581_v28 }
 0x6a9   :  { %590 = vrot.lane.b32.xlu0 %v3220_v38, %s3074_s2  ;;  %v3556_v38 = vadd.f32 %v3457_v0, %v3345_v12 }
 0x6ab   :  { %v681_v11 = vsel %vm118_vm1, %v3433_v53, %v3556_v38 }
 0x6b1   :  { %594 = vrot.lane.b32.xlu0 %v3250_v61, %s3074_s2  ;;  %v3560_v61 = vadd.f32 %v3472_v6, %v3345_v12 }
 0x6b3   :  { %v686_v0 = vsel %vm683_vm10, %v681_v11, %v3560_v61 }
 0x6b8   :  { %592 = vrot.lane.b32.xlu2 %v3247_v60, %s3074_s2  ;;  %v3563_v60 = vadd.f32 %v476_v25, %v3345_v12 }
 0x6ba   :  { %v691_v6 = vsel %vm688_vm11, %v686_v0, %v3563_v60 }
 0x6bb   :  { %v696_v15 = vsel %vm693_vm12, %v691_v6, %v3566_v59 }
 0x6c2   :  { %v3547_v55 = vpop.xlane.xlu2 %545 }
 0x6ca   :  { %v3549_v14 = vpop.xlane.xlu2 %554 }
 0x6d2   :  { %v563_v9 = vpop.permute.xlu2 %562 }
 0x6d3   :  { %v575_v36 = vsel %vm118_vm1, %v563_v9, 0.0 }
 0x6d4   :  { %576 = vadd.xlane.f32.xlu1 %v575_v36 }
 0x6ed   :  { %588 = vrot.lane.b32.xlu1 %v3195_v29, %s3074_s2  ;;  %v3572_v29 = vadd.f32 %v552_v22, %v3345_v12 }
 0x6ef   :  { %v701_v53 = vsel %vm698_vm14, %v696_v15, %v3572_v29 }
 0x708   :  { %v580_v25 = vpop.xlane.xlu0 %579 }
 0x709   :  { %v3581_v41 = vadd.f32 %v580_v25, %v3345_v12 }
 0x70b   :  { %v3587_v22 = vsel %vm703_vm13, %v701_v53, %v3581_v41  ;;  %v3589_v26 = vpop.xlane.xlu2 %573 }
 0x713   :  { %v3591_v23 = vpop.xlane.xlu2 %582 }
 0x71b   :  { %v593_v34 = vpop.permute.xlu2 %592  ;;  %v591_v28 = vpop.permute.xlu0 %590 }
 0x71c   :  { %v606_v9 = vsel %vm118_vm1, %v593_v34, 0.0  ;;  %v603_v36 = vsel %vm118_vm1, %v591_v28, 0.0 }
 0x71d   :  { %607 = vadd.xlane.f32.xlu0 %v606_v9  ;;  %604 = vadd.xlane.f32.xlu2 %v603_v36 }
 0x723   :  { %v595_v25 = vpop.permute.xlu0 %594 }
 0x724   :  { %v609_v15 = vsel %vm128_vm2, %v595_v25, 0.0 }
 0x731   :  { %618 = vrot.lane.b32.xlu0 %v3203_v33, %s3074_s2 }
 0x735   :  { %616 = vrot.lane.b32.xlu2 %v3200_v31, %s3074_s2 }
 0x739   :  { %622 = vrot.lane.b32.xlu0 %v3262_v63, %s3074_s2 }
 0x747   :  { %v3601_v11 = vpop.xlane.xlu1 %576 }
 0x75f   :  { %v589_v0 = vpop.permute.xlu1 %588 }
 0x760   :  { %v600_v6 = vsel %vm118_vm1, %v589_v0, 0.0 }
 0x761   :  { %601 = vadd.xlane.f32.xlu1 %v600_v6  ;;  %v3627_v6 = vld [vmem:[%s4967_s3 + $0x8] sm:$0xff] }
 0x769   :  { %610 = vadd.xlane.f32.xlu1 %v609_v15  ;;  %v3634_v15 = vadd.f32 %v3464_v17, %v3627_v6 }
 0x782   :  { %620 = vrot.lane.b32.xlu1 %v3257_v62, %s3074_s2  ;;  %v132_v62 = vld [vmem:[%s4967_s3] sm:$0xff] }
 0x783   :  { %v3618_v0 = vadd.f32 %v3338_v49, %v132_v62  ;;  %v3630_v25 = vadd.f32 %v3452_v52, %v132_v62  ;;  %v3643_v49 = vld [vmem:[%s4967_s3 + $0x18] sm:$0xf]  ;;  %v3650_v52 = vadd.f32 %v3547_v55, %v132_v62  ;;  %v3682_v24 = vadd.f32 %v3303_v37, %v132_v62 }
 0x784   :  { %v3658_v17 = vadd.f32 %v3549_v14, %v3643_v49  ;;  %v3674_v14 = vadd.f32 %v3312_v45, %v132_v62  ;;  %v3693_v45 = vadd.f32 %v3404_v4, %v132_v62  ;;  %v3700_v37 = vadd.f32 %v3483_v5, %v132_v62 }
 0x785   :  { %5062 = vst [vmem:[#allocation23_spill] sm:$0xff] %v3682_v24 }
 0x790   :  { %v3607_v33 = vpop.xlane.xlu2 %604  ;;  %v3610_v63 = vpop.xlane.xlu0 %607 }
 0x798   :  { %v617_v53 = vpop.permute.xlu2 %616 }
 0x799   :  { %v628_v31 = vsel %vm118_vm1, %v617_v53, 0.0  ;;  %v3647_v53 = vadd.f32 %v3454_v54, %v3643_v49 }
 0x79a   :  { %629 = vadd.xlane.f32.xlu2 %v628_v31 }
 0x7a3   :  { %v619_v34 = vpop.permute.xlu0 %618 }
 0x7a4   :  { %v631_v9 = vsel %vm118_vm1, %v619_v34, 0.0 }
 0x7ab   :  { %v623_v28 = vpop.permute.xlu0 %622 }
 0x7ac   :  { %632 = vadd.xlane.f32.xlu1 %v631_v9  ;;  %v637_v36 = vsel %vm128_vm2, %v623_v28, 0.0  ;;  %v3668_v28 = vadd.f32 %v132_v62, %v3295_v27  ;;  %v3671_v9 = vadd.f32 %v3301_v32, %v132_v62  ;;  %v3688_v27 = vadd.f32 %v3393_v57, %v132_v62 }
 0x7ad   :  { %638 = vadd.xlane.f32.xlu2 %v637_v36  ;;  %v3705_v57 = vadd.f32 %v3498_v1, %v132_v62  ;;  %vm718_vm2 = vcmask 130048  }
 0x7ae   :  { %v645_v36 = vsel %vm644_vm3, %v3668_v28, %v3671_v9 }
 0x7af   :  { %v650_v20 = vsel %vm649_vm4, %v645_v36, %v3674_v14 }
 0x7b0   :  { %v655_v32 = vsel %vm654_vm5, %v650_v20, %v3682_v24  ;;  %v3709_v20 = vadd.f32 %v3378_v42, %v3627_v6 }
 0x7c5   :  { %728 = vrot.lane.b32.xlu1 %v3618_v0, %s3077_s18  ;;  %732 = vrot.lane.b32.xlu2 %v3365_v21, %s3077_s18 }
 0x7cd   :  { %748 = vrot.lane.b32.xlu1 %v3630_v25, %s3075_s12  ;;  %750 = vrot.lane.b32.xlu2 %v3634_v15, %s3075_s12 }
 0x7d4   :  { %v602_v54 = vpop.xlane.xlu1 %601 }
 0x7d5   :  { %754 = vrot.lane.b32.xlu1 %v3647_v53, %s3075_s12  ;;  %768 = vrot.lane.b32.xlu2 %v3650_v52, %s3078_s1  ;;  %v3727_v1 = vadd.f32 %v602_v54, %v132_v62 }
 0x7dc   :  { %v3664_v55 = vpop.xlane.xlu1 %610 }
 0x7dd   :  { %772 = vrot.lane.b32.xlu1 %v3572_v29, %s3078_s1  ;;  %774 = vrot.lane.b32.xlu2 %v3658_v17, %s3078_s1 }
 0x7f4   :  { %v621_v31 = vpop.permute.xlu1 %620 }
 0x7f5   :  { %v634_v34 = vsel %vm118_vm1, %v621_v31, 0.0  ;;  %v3685_v31 = vadd.f32 %v3340_v10, %v132_v62 }
 0x7f6   :  { %635 = vadd.xlane.f32.xlu0 %v634_v34  ;;  %v660_v34 = vsel %vm659_vm6, %v655_v32, %v3618_v0  ;;  %v3714_v32 = vadd.f32 %v3508_v47, %v132_v62 }
 0x7f7   :  { %v665_v36 = vsel %vm664_vm7, %v660_v34, %v3685_v31 }
 0x7f8   :  { %v670_v10 = vsel %vm669_vm8, %v665_v36, %v3688_v27  ;;  %v3721_v36 = vadd.f32 %v3589_v26, %v132_v62 }
 0x7f9   :  { %v675_v4 = vsel %vm674_vm9, %v670_v10, %v3693_v45  ;;  %v3733_v10 = vadd.f32 %v3627_v6, %v3299_v30  ;;  %v3747_v30 = vadd.f32 %v3327_v2, %v3643_v49 }
 0x7fa   :  { %v679_v5 = vsel %vm118_vm1, %v675_v4, %v3630_v25  ;;  %v3737_v4 = vadd.f32 %v3307_v40, %v3627_v6 }
 0x7fb   :  { %v684_v34 = vsel %vm683_vm10, %v679_v5, %v3700_v37 }
 0x7fc   :  { %v689_v42 = vsel %vm688_vm11, %v684_v34, %v3705_v57  ;;  %v646_v2 = vsel %vm644_vm3, %v3733_v10, %v3737_v4 }
 0x7fd   :  { %v694_v47 = vsel %vm693_vm12, %v689_v42, %v3714_v32  ;;  %v3753_v42 = vadd.f32 %v3347_v13, %v3643_v49  ;;  %v3774_v13 = vadd.f32 %v3310_v43, %v3627_v6 }
 0x7fe   :  { %v699_v26 = vsel %vm698_vm14, %v694_v47, %v3650_v52 }
 0x7ff   :  { %v704_v54 = vsel %vm703_vm13, %v699_v26, %v3721_v36  ;;  %v3759_v26 = vadd.f32 %v3305_v39, %v3627_v6  ;;  %5064 = vst [vmem:[#allocation25_spill] sm:$0xff] %v3774_v13  ;;  %v3778_v39 = vadd.f32 %v3332_v8, %v3643_v49  ;;  %v3797_v8 = vadd.f32 %v3389_v56, %v3643_v49 }
 0x800   :  { %v709_v40 = vsel %vm708_vm0, %v704_v54, %v3727_v1  ;;  %v3791_v54 = vadd.f32 %v3380_v46, %v3627_v6  ;;  %v3809_v46 = vadd.f32 %v3397_v58, %v3643_v49 }
 0x801   :  { %v651_v43 = vsel %vm649_vm4, %v646_v2, %v3759_v26  ;;  %v3813_v2 = vadd.f32 %v3402_v3, %v3627_v6  ;;  %v3829_v3 = vadd.f32 %v3477_v51, %v3627_v6 }
 0x80a   :  { %730 = vrot.lane.b32.xlu0 %v3709_v20, %s3077_s18 }
 0x80d   :  { %v630_v5 = vpop.xlane.xlu2 %629 }
 0x80e   :  { %v3743_v34 = vadd.f32 %v630_v5, %v132_v62  ;;  %v3763_v62 = vadd.f32 %v3643_v49, %v3330_v7  ;;  %v3787_v5 = vadd.f32 %v3334_v44, %v3643_v49 }
 0x810   :  { %5063 = vst [vmem:[#allocation24_spill] sm:$0xff] %v3743_v34  ;;  %v714_v47 = vsel %vm713_vm15, %v709_v40, %v3743_v34  ;;  %v648_v7 = vsel %vm644_vm3, %v3763_v62, %v3747_v30  ;;  %v3801_v40 = vadd.f32 %v3382_v48, %v3627_v6  ;;  %vm722_vm3 = vcmask 125952  }
 0x811   :  { %719 = vst.msk [vmem:[%s4969_s5] sm:$0xff] %vm718_vm2, %v714_v47  ;;  %v656_v47 = vsel %vm654_vm5, %v651_v43, %v3774_v13  ;;  %v653_v44 = vsel %vm649_vm4, %v648_v7, %v3778_v39  ;;  %v3821_v43 = vadd.f32 %v3411_v16, %v3643_v49  ;;  %v3837_v16 = vadd.f32 %v3487_v19, %v3643_v49  ;;  %v5067_v13 = vld [vmem:[#allocation20_spill] sm:$0xff] }
 0x812   :  { %734 = vrot.lane.b32.xlu0 %v3753_v42, %s3077_s18  ;;  %5065 = vst [vmem:[#allocation26_spill] sm:$0xff] %v3787_v5  ;;  %v658_v56 = vsel %vm654_vm5, %v653_v44, %v3787_v5  ;;  %v661_v48 = vsel %vm659_vm6, %v656_v47, %v3709_v20 }
 0x813   :  { %v663_v7 = vsel %vm659_vm6, %v658_v56, %v3753_v42  ;;  %v666_v58 = vsel %vm664_vm7, %v661_v48, %v3791_v54  ;;  %v3841_v56 = vadd.f32 %v5066_v18, %v3627_v6 }
 0x814   :  { %v668_v44 = vsel %vm664_vm7, %v663_v7, %v3797_v8  ;;  %v671_v47 = vsel %vm669_vm8, %v666_v58, %v3801_v40  ;;  %v3849_v7 = vadd.f32 %v5067_v13, %v3643_v49  ;;  %v3853_v58 = vadd.f32 %v3518_v35, %v3627_v6 }
 0x815   :  { %v673_v48 = vsel %vm669_vm8, %v668_v44, %v3809_v46  ;;  %v676_v51 = vsel %vm674_vm9, %v671_v47, %v3813_v2  ;;  %v5069_v44 = vld [vmem:[#allocation21_spill] sm:$0xff]  ;;  %v3867_v13 = vadd.f32 %v3536_v50, %v3627_v6  ;;  %v3883_v50 = vadd.f32 %v3591_v23, %v3643_v49 }
 0x816   :  { %5068 = vst [vmem:[#allocation19_spill] sm:$0xff] %v3853_v58  ;;  %v678_v18 = vsel %vm674_vm9, %v673_v48, %v3821_v43  ;;  %v680_v19 = vsel %vm118_vm1, %v676_v51, %v3634_v15  ;;  %v3863_v47 = vadd.f32 %v5069_v44, %v3643_v49  ;;  %v3875_v48 = vadd.f32 %v3601_v11, %v3627_v6 }
 0x817   :  { %v682_v35 = vsel %vm118_vm1, %v678_v18, %v3647_v53  ;;  %v685_v5 = vsel %vm683_vm10, %v680_v19, %v3829_v3  ;;  %v3887_v18 = vadd.f32 %v3607_v33, %v3627_v6 }
 0x818   :  { %5070 = vst [vmem:[#allocation20_spill] sm:$0xff] %v3863_v47  ;;  %v687_v51 = vsel %vm683_vm10, %v682_v35, %v3837_v16  ;;  %v690_v44 = vsel %vm688_vm11, %v685_v5, %v3841_v56  ;;  %v3895_v35 = vadd.f32 %v3664_v55, %v3643_v49 }
 0x819   :  { %v692_v19 = vsel %vm688_vm11, %v687_v51, %v3849_v7  ;;  %v695_v11 = vsel %vm693_vm12, %v690_v44, %v3853_v58  ;;  %v5074_v58 = vld [vmem:[#allocation12_spill] sm:$0xff] }
 0x81a   :  { %752 = vrot.lane.b32.xlu0 %v3556_v38, %s3075_s12  ;;  %v697_v5 = vsel %vm693_vm12, %v692_v19, %v3863_v47  ;;  %v700_v23 = vsel %vm698_vm14, %v695_v11, %v3867_v13 }
 0x81b   :  { %v702_v33 = vsel %vm698_vm14, %v697_v5, %v3658_v17  ;;  %v705_v51 = vsel %vm703_vm13, %v700_v23, %v3875_v48 }
 0x81c   :  { %v707_v55 = vsel %vm703_vm13, %v702_v33, %v3883_v50  ;;  %v710_v19 = vsel %vm708_vm0, %v705_v51, %v3887_v18 }
 0x81d   :  { %v712_v5 = vsel %vm708_vm0, %v707_v55, %v3895_v35 }
 0x81f   :  { %v633_v24 = vpop.xlane.xlu1 %632 }
 0x820   :  { %v3906_v34 = vadd.f32 %v633_v24, %v3627_v6  ;;  %v639_v44 = vpop.xlane.xlu2 %638 }
 0x821   :  { %v3913_v11 = vadd.f32 %v639_v44, %v3643_v49 }
 0x822   :  { %5071 = vst [vmem:[#allocation21_spill] sm:$0xff] %v3906_v34  ;;  %v715_v23 = vsel %vm713_vm15, %v710_v19, %v3906_v34  ;;  %770 = vrot.lane.b32.xlu0 %v3867_v13, %s3078_s1 }
 0x823   :  { %5072 = vst [vmem:[#allocation27_spill] sm:$0xff] %v3913_v11  ;;  %v717_v24 = vsel %vm713_vm15, %v712_v5, %v3913_v11  ;;  %v3937_v5 = vadd.f32 %v3610_v63, %v3345_v12 }
 0x824   :  { %720 = vst.msk [vmem:[%s4969_s5 + $0x8] sm:$0xff] %vm718_vm2, %v715_v23 }
 0x825   :  { %723 = vst.msk [vmem:[%s4969_s5 + $0x18] sm:$0xf] %vm722_vm3, %v717_v24 }
 0x828   :  { %v733_v6 = vpop.permute.xlu2 %732 }
 0x829   :  { %v742_v59 = vmax.f32 %v5074_v58, %v733_v6 }
 0x830   :  { %v751_v49 = vpop.permute.xlu2 %750 }
 0x837   :  { %v729_v33 = vpop.permute.xlu1 %728 }
 0x838   :  { %v740_v51 = vmax.f32 %v3668_v28, %v729_v33  ;;  %v769_v19 = vpop.permute.xlu2 %768  ;;  %v711_v33 = vsel %vm708_vm0, %v3587_v22, %v3937_v5 }
 0x83f   :  { %v749_v44 = vpop.permute.xlu1 %748 }
 0x840   :  { %v760_v55 = vmax.f32 %v740_v51, %v749_v44 }
 0x842   :  { %v3931_v34 = vmax.f32 %v760_v55, %v769_v19 }
 0x844   :  { %800 = vrot.lane.b32.xlu0 %v3931_v34, %s3079_s30 }
 0x847   :  { %v755_v55 = vpop.permute.xlu1 %754 }
 0x869   :  { %v636_v23 = vpop.xlane.xlu0 %635 }
 0x86a   :  { %v3940_v24 = vadd.f32 %v636_v23, %v3345_v12  ;;  %v775_v12 = vpop.permute.xlu2 %774 }
 0x86c   :  { %5073 = vst [vmem:[#allocation28_spill] sm:$0xff] %v3940_v24  ;;  %v716_v51 = vsel %vm713_vm15, %v711_v33, %v3940_v24  ;;  %v773_v24 = vpop.permute.xlu1 %772 }
 0x86d   :  { %721 = vst.msk [vmem:[%s4969_s5 + $0x10] sm:$0xff] %vm718_vm2, %v716_v51  ;;  %s3080_s5 = smov 12  }
 0x87c   :  { %v731_v44 = vpop.permute.xlu0 %730 }
 0x87d   :  { %v741_v47 = vmax.f32 %v3733_v10, %v731_v44 }
 0x884   :  { %v735_v63 = vpop.permute.xlu0 %734 }
 0x885   :  { %v743_v19 = vmax.f32 %v3763_v62, %v735_v63 }
 0x887   :  { %v763_v11 = vmax.f32 %v743_v19, %v755_v55 }
 0x889   :  { %v3952_v23 = vmax.f32 %v763_v11, %v775_v12  ;;  %v761_v11 = vmax.f32 %v741_v47, %v751_v49 }
 0x88b   :  { %806 = vrot.lane.b32.xlu0 %v3952_v23, %s3079_s30 }
 0x88c   :  { %v753_v22 = vpop.permute.xlu0 %752 }
 0x88d   :  { %v762_v33 = vmax.f32 %v742_v59, %v753_v22 }
 0x88f   :  { %v3958_v51 = vmax.f32 %v762_v33, %v773_v24 }
 0x891   :  { %804 = vrot.lane.b32.xlu2 %v3958_v51, %s3079_s30 }
 0x893   :  { %828 = vrot.lane.b32.xlu0 %v3958_v51, %s3069_s24 }
 0x894   :  { %v771_v55 = vpop.permute.xlu0 %770 }
 0x895   :  { %v3964_v63 = vmax.f32 %v761_v11, %v771_v55 }
 0x897   :  { %802 = vrot.lane.b32.xlu1 %v3964_v63, %s3079_s30 }
 0x899   :  { %826 = vrot.lane.b32.xlu2 %v3964_v63, %s3069_s24 }
 0x89b   :  { %850 = vrot.lane.b32.xlu0 %v3964_v63, %s3080_s5 }
 0x89f   :  { %824 = vrot.lane.b32.xlu1 %v3931_v34, %s3069_s24 }
 0x8a1   :  { %848 = vrot.lane.b32.xlu2 %v3931_v34, %s3080_s5 }
 0x8a7   :  { %830 = vrot.lane.b32.xlu1 %v3952_v23, %s3069_s24 }
 0x8a9   :  { %854 = vrot.lane.b32.xlu2 %v3952_v23, %s3080_s5 }
 0x8af   :  { %852 = vrot.lane.b32.xlu1 %v3958_v51, %s3080_s5 }
 0x8b6   :  { %v801_v59 = vpop.permute.xlu0 %800 }
 0x8b7   :  { %v812_v47 = vsub.f32 %v3618_v0, %v801_v59 }
 0x8b9   :  { %v816_v6 = vmul.f32 1.442695, %v812_v47 }
 0x8bb   :  { %2855 = vpow2.f32 %v816_v6 }
 0x8c1   :  { %v3983_v49 = vpop.eup %2855 }
 0x8c2   :  { %876 = vrot.lane.b32.xlu0 %v3983_v49, %s3077_s18 }
 0x8eb   :  { %v805_v24 = vpop.permute.xlu2 %804 }
 0x8ec   :  { %v814_v44 = vsub.f32 %v3365_v21, %v805_v24 }
 0x8ee   :  { %v820_v19 = vmul.f32 1.442695, %v814_v44 }
 0x8f0   :  { %2857 = vpow2.f32 %v820_v19 }
 0x8f3   :  { %v827_v12 = vpop.permute.xlu2 %826 }
 0x8f4   :  { %v837_v22 = vsub.f32 %v3634_v15, %v827_v12 }
 0x8f6   :  { %v3989_v33 = vpop.eup %2857  ;;  %v842_v11 = vmul.f32 1.442695, %v837_v22 }
 0x8f7   :  { %880 = vrot.lane.b32.xlu2 %v3989_v33, %s3077_s18 }
 0x8f8   :  { %2859 = vpow2.f32 %v842_v11 }
 0x8fb   :  { %v849_v0 = vpop.permute.xlu2 %848 }
 0x8fc   :  { %v860_v55 = vsub.f32 %v3650_v52, %v849_v0 }
 0x8fd   :  { %v807_v59 = vpop.permute.xlu0 %806 }
 0x8fe   :  { %v3994_v47 = vpop.eup %2859  ;;  %v864_v6 = vmul.f32 1.442695, %v860_v55  ;;  %v815_v21 = vsub.f32 %v3753_v42, %v807_v59 }
 0x8ff   :  { %5075 = vst [vmem:[#allocation12_spill] sm:$0xff] %v3994_v47  ;;  %898 = vrot.lane.b32.xlu2 %v3994_v47, %s3075_s12 }
 0x900   :  { %2861 = vpow2.f32 %v864_v6  ;;  %v822_v15 = vmul.f32 1.442695, %v815_v21 }
 0x902   :  { %2863 = vpow2.f32 %v822_v15 }
 0x903   :  { %v855_v24 = vpop.permute.xlu2 %854 }
 0x904   :  { %v863_v44 = vsub.f32 %v3658_v17, %v855_v24 }
 0x905   :  { %v829_v19 = vpop.permute.xlu0 %828 }
 0x906   :  { %v4000_v12 = vpop.eup %2861  ;;  %v870_v22 = vmul.f32 1.442695, %v863_v44  ;;  %v838_v52 = vsub.f32 %v3556_v38, %v829_v19 }
 0x907   :  { %5076 = vst [vmem:[#allocation29_spill] sm:$0xff] %v4000_v12  ;;  %916 = vrot.lane.b32.xlu2 %v4000_v12, %s3078_s1 }
 0x908   :  { %v4005_v11 = vpop.eup %2863  ;;  %2865 = vpow2.f32 %v870_v22  ;;  %v844_v42 = vmul.f32 1.442695, %v838_v52 }
 0x909   :  { %5077 = vst [vmem:[#allocation30_spill] sm:$0xff] %v4005_v11  ;;  %v803_v0 = vpop.permute.xlu1 %802  ;;  %882 = vrot.lane.b32.xlu0 %v4005_v11, %s3077_s18 }
 0x90a   :  { %2867 = vpow2.f32 %v844_v42  ;;  %v813_v17 = vsub.f32 %v3709_v20, %v803_v0 }
 0x90c   :  { %v818_v55 = vmul.f32 1.442695, %v813_v17 }
 0x90d   :  { %v851_v59 = vpop.permute.xlu0 %850 }
 0x90e   :  { %v4010_v6 = vpop.eup %2865  ;;  %2869 = vpow2.f32 %v818_v55  ;;  %v861_v38 = vsub.f32 %v3867_v13, %v851_v59 }
 0x90f   :  { %5078 = vst [vmem:[#allocation31_spill] sm:$0xff] %v4010_v6  ;;  %922 = vrot.lane.b32.xlu2 %v4010_v6, %s3078_s1 }
 0x910   :  { %v4015_v21 = vpop.eup %2867  ;;  %v866_v15 = vmul.f32 1.442695, %v861_v38 }
 0x911   :  { %5079 = vst [vmem:[#allocation32_spill] sm:$0xff] %v4015_v21  ;;  %v825_v24 = vpop.permute.xlu1 %824  ;;  %900 = vrot.lane.b32.xlu0 %v4015_v21, %s3075_s12 }
 0x912   :  { %2871 = vpow2.f32 %v866_v15  ;;  %v836_v20 = vsub.f32 %v3630_v25, %v825_v24  ;;  %v785_v15 = vsub.f32 %v3733_v10, %v3964_v63 }
 0x914   :  { %v4020_v44 = vpop.eup %2869  ;;  %v840_v19 = vmul.f32 1.442695, %v836_v20 }
 0x915   :  { %878 = vrot.lane.b32.xlu1 %v4020_v44, %s3077_s18 }
 0x916   :  { %2873 = vpow2.f32 %v840_v19  ;;  %v790_v19 = vmul.f32 1.442695, %v785_v15 }
 0x918   :  { %v4024_v13 = vpop.eup %2871 }
 0x919   :  { %5080 = vst [vmem:[#allocation33_spill] sm:$0xff] %v4024_v13  ;;  %v831_v22 = vpop.permute.xlu1 %830  ;;  %918 = vrot.lane.b32.xlu0 %v4024_v13, %s3078_s1 }
 0x91a   :  { %v839_v52 = vsub.f32 %v3647_v53, %v831_v22 }
 0x91c   :  { %v4029_v42 = vpop.eup %2873  ;;  %v846_v0 = vmul.f32 1.442695, %v839_v52 }
 0x91d   :  { %5081 = vst [vmem:[#allocation34_spill] sm:$0xff] %v4029_v42  ;;  %896 = vrot.lane.b32.xlu1 %v4029_v42, %s3075_s12 }
 0x91e   :  { %2875 = vpow2.f32 %v846_v0 }
 0x921   :  { %v853_v25 = vpop.permute.xlu1 %852 }
 0x922   :  { %v862_v17 = vsub.f32 %v3572_v29, %v853_v25  ;;  %v784_v29 = vsub.f32 %v3668_v28, %v3931_v34  ;;  %v786_v28 = vsub.f32 %v5074_v58, %v3958_v51 }
 0x924   :  { %v4034_v55 = vpop.eup %2875  ;;  %v868_v59 = vmul.f32 1.442695, %v862_v17  ;;  %v788_v22 = vmul.f32 1.442695, %v784_v29  ;;  %v787_v17 = vsub.f32 %v3763_v62, %v3952_v23 }
 0x925   :  { %5082 = vst [vmem:[#allocation35_spill] sm:$0xff] %v4034_v55  ;;  %902 = vrot.lane.b32.xlu1 %v4034_v55, %s3075_s12 }
 0x926   :  { %2877 = vpow2.f32 %v868_v59  ;;  %v794_v12 = vmul.f32 1.442695, %v787_v17 }
 0x927   :  { %2879 = vpow2.f32 %v790_v19 }
 0x928   :  { %2881 = vpow2.f32 %v788_v22  ;;  %v792_v22 = vmul.f32 1.442695, %v786_v28 }
 0x92c   :  { %v4038_v38 = vpop.eup %2877 }
 0x92d   :  { %5083 = vst [vmem:[#allocation36_spill] sm:$0xff] %v4038_v38  ;;  %920 = vrot.lane.b32.xlu1 %v4038_v38, %s3078_s1  ;;  %v2880_v25 = vpop.eup %2879 }
 0x92e   :  { %v4048_v13 = vpop.eup %2881 }
 0x934   :  { %v877_v53 = vpop.permute.xlu0 %876 }
 0x935   :  { %v888_v34 = vadd.f32 %v4048_v13, %v877_v53 }
 0x951   :  { %v881_v24 = vpop.permute.xlu2 %880 }
 0x959   :  { %v899_v0 = vpop.permute.xlu2 %898 }
 0x961   :  { %v917_v15 = vpop.permute.xlu2 %916 }
 0x969   :  { %v923_v53 = vpop.permute.xlu2 %922 }
 0x97b   :  { %v883_v20 = vpop.permute.xlu0 %882 }
 0x983   :  { %v901_v52 = vpop.permute.xlu0 %900 }
 0x987   :  { %v879_v59 = vpop.permute.xlu1 %878 }
 0x988   :  { %v889_v38 = vadd.f32 %v2880_v25, %v879_v59 }
 0x98a   :  { %v909_v6 = vadd.f32 %v899_v0, %v889_v38 }
 0x98b   :  { %v919_v10 = vpop.permute.xlu0 %918 }
 0x98c   :  { %v929_v63 = vadd.f32 %v919_v10, %v909_v6 }
 0x98e   :  { %2883 = vrcp.f32 %v929_v63  ;;  %v957_v51 = vand.u32 2147483648, %v929_v63  ;;  %vm951_vm5 = vweird.f32 %v929_v63 }
 0x98f   :  { %2885 = vpow2.f32 %v794_v12  ;;  %v897_v19 = vpop.permute.xlu1 %896  ;;  %v955_v12 = vand.u32 2147483647, %v929_v63 }
 0x990   :  { %v908_v29 = vadd.f32 %v897_v19, %v888_v34 }
 0x991   :  { %vm956_vm7 = vcmp.eq.f32.partialorder %v955_v12, 8.507059e+37 }
 0x992   :  { %v928_v62 = vadd.f32 %v917_v15, %v908_v29 }
 0x994   :  { %v2884_v23 = vpop.eup %2883  ;;  %2887 = vrcp.f32 %v928_v62  ;;  %vm937_vm9 = vweird.f32 %v928_v62 }
 0x995   :  { %v4053_v38 = vpop.eup %2885  ;;  %2889 = vpow2.f32 %v792_v22  ;;  %v947_v6 = vmul.f32 %v2884_v23, %v929_v63  ;;  %vm952_vm4 = vweird.f32 %v2884_v23 }
 0x996   :  { %v891_v0 = vadd.f32 %v4053_v38, %v883_v20  ;;  %vm953_vm6 = vmor %vm951_vm5, %vm952_vm4  ;;  %v958_v20 = vor.u32 1.1754944e-38, %v957_v51 }
 0x997   :  { %v903_v17 = vpop.permute.xlu1 %902  ;;  %v948_v59 = vsub.f32 1.0, %v947_v6 }
 0x998   :  { %v911_v58 = vadd.f32 %v903_v17, %v891_v0 }
 0x999   :  { %v949_v10 = vmul.f32 %v2884_v23, %v948_v59  ;;  %v943_v59 = vand.u32 2147483648, %v928_v62 }
 0x99a   :  { %v2888_v47 = vpop.eup %2887  ;;  %v931_v34 = vadd.f32 %v923_v53, %v911_v58  ;;  %v941_v53 = vand.u32 2147483647, %v928_v62 }
 0x99b   :  { %v4056_v28 = vpop.eup %2889  ;;  %v950_v15 = vadd.f32 %v2884_v23, %v949_v10  ;;  %v933_v19 = vmul.f32 %v2888_v47, %v928_v62  ;;  %vm938_vm8 = vweird.f32 %v2888_v47 }
 0x99c   :  { %v890_v29 = vadd.f32 %v4056_v28, %v881_v24  ;;  %2891 = vrcp.f32 %v931_v34  ;;  %vm939_vm10 = vmor %vm937_vm9, %vm938_vm8  ;;  %vm942_vm11 = vcmp.eq.f32.partialorder %v941_v53, 8.507059e+37  ;;  %vm979_vm13 = vweird.f32 %v931_v34 }
 0x99d   :  { %v954_v22 = vsel %vm953_vm6, %v2884_v23, %v950_v15  ;;  %v934_v6 = vsub.f32 1.0, %v933_v19  ;;  %v944_v23 = vor.u32 1.1754944e-38, %v943_v59  ;;  %v985_v19 = vand.u32 2147483648, %v931_v34 }
 0x99e   :  { %v910_v0 = vadd.f32 %v901_v52, %v890_v29  ;;  %v959_v17 = vsel %vm956_vm7, %v958_v20, %v954_v22 }
 0x99f   :  { %v921_v21 = vpop.permute.xlu1 %920  ;;  %998 = vrot.lane.b32.xlu1 %v959_v17, %s3079_s30  ;;  %v935_v58 = vmul.f32 %v2888_v47, %v934_v6  ;;  %v4060_v10 = vmul.f32 %v2880_v25, %v959_v17  ;;  %v983_v25 = vand.u32 2147483647, %v931_v34 }
 0x9a0   :  { %v930_v63 = vadd.f32 %v921_v21, %v910_v0 }
 0x9a1   :  { %v936_v55 = vadd.f32 %v2888_v47, %v935_v58  ;;  %vm984_vm15 = vcmp.eq.f32.partialorder %v983_v25, 8.507059e+37 }
 0x9a2   :  { %v2892_v24 = vpop.eup %2891  ;;  %2893 = vrcp.f32 %v930_v63  ;;  %v971_v0 = vand.u32 2147483648, %v930_v63  ;;  %v969_v58 = vand.u32 2147483647, %v930_v63  ;;  %vm965_vm3 = vweird.f32 %v930_v63 }
 0x9a3   :  { %v940_v51 = vsel %vm939_vm10, %v2888_v47, %v936_v55  ;;  %v975_v52 = vmul.f32 %v2892_v24, %v931_v34  ;;  %vm980_vm12 = vweird.f32 %v2892_v24  ;;  %v986_v47 = vor.u32 1.1754944e-38, %v985_v19 }
 0x9a4   :  { %v4062_v12 = vsel %vm942_vm11, %v944_v23, %v940_v51  ;;  %vm981_vm14 = vmor %vm979_vm13, %vm980_vm12  ;;  %v972_v34 = vor.u32 1.1754944e-38, %v971_v0  ;;  %vm970_vm5 = vcmp.eq.f32.partialorder %v969_v58, 8.507059e+37 }
 0x9a5   :  { %996 = vrot.lane.b32.xlu0 %v4062_v12, %s3079_s30  ;;  %v976_v15 = vsub.f32 1.0, %v975_v52 }
 0x9a7   :  { %1012 = vrot.lane.b32.xlu1 %v4062_v12, %s3069_s24  ;;  %v977_v21 = vmul.f32 %v2892_v24, %v976_v15 }
 0x9a8   :  { %v2894_v62 = vpop.eup %2893 }
 0x9a9   :  { %v961_v29 = vmul.f32 %v2894_v62, %v930_v63  ;;  %v978_v20 = vadd.f32 %v2892_v24, %v977_v21  ;;  %vm966_vm0 = vweird.f32 %v2894_v62 }
 0x9aa   :  { %vm967_vm4 = vmor %vm965_vm3, %vm966_vm0 }
 0x9ab   :  { %v982_v55 = vsel %vm981_vm14, %v2892_v24, %v978_v20  ;;  %v962_v22 = vsub.f32 1.0, %v961_v29 }
 0x9ac   :  { %v987_v6 = vsel %vm984_vm15, %v986_v47, %v982_v55 }
 0x9ad   :  { %1002 = vrot.lane.b32.xlu0 %v987_v6, %s3079_s30  ;;  %v963_v59 = vmul.f32 %v2894_v62, %v962_v22  ;;  %v4070_v53 = vmul.f32 %v4053_v38, %v987_v6  ;;  %v5084_v38 = vld [vmem:[#allocation16_spill] sm:$0xff] }
 0x9af   :  { %1018 = vrot.lane.b32.xlu1 %v987_v6, %s3069_s24  ;;  %v964_v23 = vadd.f32 %v2894_v62, %v963_v59 }
 0x9b1   :  { %v968_v51 = vsel %vm967_vm4, %v2894_v62, %v964_v23 }
 0x9b2   :  { %v4073_v24 = vsel %vm970_vm5, %v972_v34, %v968_v51 }
 0x9b3   :  { %1000 = vrot.lane.b32.xlu2 %v4073_v24, %s3079_s30 }
 0x9b5   :  { %1016 = vrot.lane.b32.xlu0 %v4073_v24, %s3069_s24 }
 0x9b7   :  { %1032 = vrot.lane.b32.xlu1 %v4073_v24, %s3080_s5 }
 0x9bb   :  { %1014 = vrot.lane.b32.xlu2 %v959_v17, %s3069_s24 }
 0x9bd   :  { %1030 = vrot.lane.b32.xlu0 %v959_v17, %s3080_s5 }
 0x9bf   :  { %1050 = vrot.lane.b32.xlu1 %v3791_v54, %s3077_s18 }
 0x9c3   :  { %1028 = vrot.lane.b32.xlu2 %v4062_v12, %s3080_s5 }
 0x9c5   :  { %1048 = vrot.lane.b32.xlu0 %v3685_v31, %s3077_s18 }
 0x9c7   :  { %1068 = vrot.lane.b32.xlu1 %v3700_v37, %s3075_s12 }
 0x9cb   :  { %1034 = vrot.lane.b32.xlu2 %v987_v6, %s3080_s5 }
 0x9cd   :  { %1054 = vrot.lane.b32.xlu0 %v3797_v8, %s3077_s18 }
 0x9cf   :  { %1074 = vrot.lane.b32.xlu1 %v3837_v16, %s3075_s12 }
 0x9d3   :  { %1052 = vrot.lane.b32.xlu2 %v5084_v38, %s3077_s18 }
 0x9d5   :  { %1072 = vrot.lane.b32.xlu0 %v3560_v61, %s3075_s12 }
 0x9d7   :  { %1092 = vrot.lane.b32.xlu1 %v3581_v41, %s3078_s1 }
 0x9db   :  { %1070 = vrot.lane.b32.xlu2 %v3829_v3, %s3075_s12 }
 0x9dd   :  { %1090 = vrot.lane.b32.xlu0 %v3875_v48, %s3078_s1 }
 0x9e3   :  { %1088 = vrot.lane.b32.xlu2 %v3721_v36, %s3078_s1 }
 0x9eb   :  { %1094 = vrot.lane.b32.xlu2 %v3883_v50, %s3078_s1 }
 0xa0d   :  { %v4110_v17 = vpop.permute.xlu2 %1000 }
 0xa11   :  { %v4112_v63 = vpop.permute.xlu1 %998 }
 0xa15   :  { %v4114_v52 = vpop.permute.xlu2 %1014 }
 0xa16   :  { %5085 = vst [vmem:[#allocation16_spill] sm:$0xff] %v4114_v52 }
 0xa17   :  { %v4116_v15 = vpop.permute.xlu0 %996 }
 0xa19   :  { %v4118_v19 = vpop.permute.xlu1 %1012 }
 0xa1a   :  { %5086 = vst [vmem:[#allocation37_spill] sm:$0xff] %v4118_v19 }
 0xa1d   :  { %v4120_v21 = vpop.permute.xlu2 %1028 }
 0xa1e   :  { %5087 = vst [vmem:[#allocation38_spill] sm:$0xff] %v4120_v21 }
 0xa1f   :  { %v4122_v25 = vpop.permute.xlu0 %1002 }
 0xa21   :  { %v4124_v62 = vpop.permute.xlu1 %1018 }
 0xa22   :  { %5088 = vst [vmem:[#allocation39_spill] sm:$0xff] %v4124_v62 }
 0xa25   :  { %v4126_v29 = vpop.permute.xlu2 %1034 }
 0xa26   :  { %5089 = vst [vmem:[#allocation40_spill] sm:$0xff] %v4126_v29 }
 0xa27   :  { %v4128_v20 = vpop.permute.xlu0 %1016 }
 0xa28   :  { %5090 = vst [vmem:[#allocation41_spill] sm:$0xff] %v4128_v20 }
 0xa29   :  { %v4130_v47 = vpop.permute.xlu1 %1032 }
 0xa2a   :  { %5091 = vst [vmem:[#allocation42_spill] sm:$0xff] %v4130_v47 }
 0xa2d   :  { %v1053_v55 = vpop.permute.xlu2 %1052 }
 0xa2f   :  { %v4132_v22 = vpop.permute.xlu0 %1030 }
 0xa30   :  { %5092 = vst [vmem:[#allocation43_spill] sm:$0xff] %v4132_v22  ;;  %v5093_v22 = vld [vmem:[#allocation13_spill] sm:$0xff] }
 0xa31   :  { %v1051_v6 = vpop.permute.xlu1 %1050  ;;  %v1062_v42 = vmax.f32 %v5093_v22, %v1053_v55 }
 0xa35   :  { %v1071_v0 = vpop.permute.xlu2 %1070 }
 0xa37   :  { %v1049_v59 = vpop.permute.xlu0 %1048 }
 0xa38   :  { %v1060_v58 = vmax.f32 %v3671_v9, %v1049_v59 }
 0xa39   :  { %v1069_v23 = vpop.permute.xlu1 %1068 }
 0xa3a   :  { %v1080_v34 = vmax.f32 %v1060_v58, %v1069_v23 }
 0xa3d   :  { %v1089_v51 = vpop.permute.xlu2 %1088 }
 0xa3e   :  { %v4135_v21 = vmax.f32 %v1080_v34, %v1089_v51 }
 0xa3f   :  { %v1055_v52 = vpop.permute.xlu0 %1054 }
 0xa40   :  { %v1063_v29 = vmax.f32 %v3747_v30, %v1055_v52  ;;  %1120 = vrot.lane.b32.xlu0 %v4135_v21, %s3079_s30  ;;  %v1061_v52 = vmax.f32 %v3737_v4, %v1051_v6 }
 0xa41   :  { %v1075_v47 = vpop.permute.xlu1 %1074 }
 0xa42   :  { %v1083_v20 = vmax.f32 %v1063_v29, %v1075_v47  ;;  %v1081_v34 = vmax.f32 %v1061_v52, %v1071_v0 }
 0xa45   :  { %v1095_v62 = vpop.permute.xlu2 %1094 }
 0xa46   :  { %v4141_v19 = vmax.f32 %v1083_v20, %v1095_v62 }
 0xa47   :  { %v1073_v11 = vpop.permute.xlu0 %1072 }
 0xa48   :  { %v1082_v59 = vmax.f32 %v1062_v42, %v1073_v11  ;;  %1126 = vrot.lane.b32.xlu0 %v4141_v19, %s3079_s30 }
 0xa49   :  { %v1093_v58 = vpop.permute.xlu1 %1092 }
 0xa4a   :  { %v4145_v23 = vmax.f32 %v1082_v59, %v1093_v58 }
 0xa4c   :  { %1124 = vrot.lane.b32.xlu2 %v4145_v23, %s3079_s30 }
 0xa4f   :  { %v1091_v29 = vpop.permute.xlu0 %1090 }
 0xa50   :  { %v4150_v47 = vmax.f32 %v1081_v34, %v1091_v29  ;;  %1148 = vrot.lane.b32.xlu0 %v4145_v23, %s3069_s24 }
 0xa52   :  { %1122 = vrot.lane.b32.xlu1 %v4150_v47, %s3079_s30 }
 0xa54   :  { %1146 = vrot.lane.b32.xlu2 %v4150_v47, %s3069_s24 }
 0xa58   :  { %1170 = vrot.lane.b32.xlu0 %v4150_v47, %s3080_s5 }
 0xa5a   :  { %1144 = vrot.lane.b32.xlu1 %v4135_v21, %s3069_s24 }
 0xa5c   :  { %1168 = vrot.lane.b32.xlu2 %v4135_v21, %s3080_s5 }
 0xa62   :  { %1150 = vrot.lane.b32.xlu1 %v4141_v19, %s3069_s24 }
 0xa64   :  { %1174 = vrot.lane.b32.xlu2 %v4141_v19, %s3080_s5 }
 0xa6a   :  { %1172 = vrot.lane.b32.xlu1 %v4145_v23, %s3080_s5 }
 0xaa6   :  { %v1125_v11 = vpop.permute.xlu2 %1124 }
 0xaa7   :  { %v1134_v42 = vsub.f32 %v5084_v38, %v1125_v11 }
 0xaa9   :  { %v1140_v62 = vmul.f32 1.442695, %v1134_v42 }
 0xaab   :  { %2895 = vpow2.f32 %v1140_v62 }
 0xaae   :  { %v1147_v20 = vpop.permute.xlu2 %1146 }
 0xaaf   :  { %v1157_v55 = vsub.f32 %v3829_v3, %v1147_v20 }
 0xab1   :  { %v4172_v6 = vpop.eup %2895  ;;  %v1162_v0 = vmul.f32 1.442695, %v1157_v55 }
 0xab2   :  { %1200 = vrot.lane.b32.xlu2 %v4172_v6, %s3077_s18  ;;  %v1121_v51 = vpop.permute.xlu0 %1120 }
 0xab3   :  { %2897 = vpow2.f32 %v1162_v0  ;;  %v1132_v59 = vsub.f32 %v3685_v31, %v1121_v51 }
 0xab5   :  { %v1136_v58 = vmul.f32 1.442695, %v1132_v59 }
 0xab6   :  { %v1169_v52 = vpop.permute.xlu2 %1168 }
 0xab7   :  { %2899 = vpow2.f32 %v1136_v58  ;;  %v1180_v38 = vsub.f32 %v3721_v36, %v1169_v52 }
 0xab9   :  { %v4178_v34 = vpop.eup %2897  ;;  %v1184_v29 = vmul.f32 1.442695, %v1180_v38 }
 0xaba   :  { %5094 = vst [vmem:[#allocation13_spill] sm:$0xff] %v4178_v34  ;;  %1218 = vrot.lane.b32.xlu2 %v4178_v34, %s3075_s12  ;;  %v1127_v3 = vpop.permute.xlu0 %1126 }
 0xabb   :  { %2901 = vpow2.f32 %v1184_v29  ;;  %v1135_v11 = vsub.f32 %v3797_v8, %v1127_v3 }
 0xabd   :  { %v4183_v42 = vpop.eup %2899  ;;  %v1142_v62 = vmul.f32 1.442695, %v1135_v11 }
 0xabe   :  { %v1175_v20 = vpop.permute.xlu2 %1174  ;;  %1196 = vrot.lane.b32.xlu0 %v4183_v42, %s3077_s18 }
 0xabf   :  { %2903 = vpow2.f32 %v1142_v62  ;;  %v1183_v31 = vsub.f32 %v3883_v50, %v1175_v20 }
 0xac1   :  { %v4188_v36 = vpop.eup %2901  ;;  %v1190_v55 = vmul.f32 1.442695, %v1183_v31 }
 0xac2   :  { %5095 = vst [vmem:[#allocation44_spill] sm:$0xff] %v4188_v36  ;;  %1236 = vrot.lane.b32.xlu2 %v4188_v36, %s3078_s1  ;;  %v1149_v0 = vpop.permute.xlu0 %1148 }
 0xac3   :  { %2905 = vpow2.f32 %v1190_v55  ;;  %v1158_v8 = vsub.f32 %v3560_v61, %v1149_v0 }
 0xac4   :  { %v1123_v51 = vpop.permute.xlu1 %1122 }
 0xac5   :  { %v4193_v59 = vpop.eup %2903  ;;  %v1164_v58 = vmul.f32 1.442695, %v1158_v8  ;;  %v1133_v52 = vsub.f32 %v3791_v54, %v1123_v51 }
 0xac6   :  { %1202 = vrot.lane.b32.xlu0 %v4193_v59, %s3077_s18 }
 0xac7   :  { %2907 = vpow2.f32 %v1164_v58  ;;  %v1138_v50 = vmul.f32 1.442695, %v1133_v52 }
 0xac9   :  { %v4198_v38 = vpop.eup %2905  ;;  %2909 = vpow2.f32 %v1138_v50 }
 0xaca   :  { %5096 = vst [vmem:[#allocation45_spill] sm:$0xff] %v4198_v38  ;;  %1242 = vrot.lane.b32.xlu2 %v4198_v38, %s3078_s1  ;;  %v1171_v29 = vpop.permute.xlu0 %1170 }
 0xacb   :  { %v1181_v61 = vsub.f32 %v3875_v48, %v1171_v29 }
 0xacc   :  { %v1145_v3 = vpop.permute.xlu1 %1144 }
 0xacd   :  { %v4203_v11 = vpop.eup %2907  ;;  %v1186_v62 = vmul.f32 1.442695, %v1181_v61  ;;  %v1156_v54 = vsub.f32 %v3700_v37, %v1145_v3  ;;  %v1105_v61 = vsub.f32 %v3737_v4, %v4150_v47  ;;  %v1106_v47 = vsub.f32 %v5093_v22, %v4145_v23 }
 0xace   :  { %5097 = vst [vmem:[#allocation46_spill] sm:$0xff] %v4203_v11  ;;  %1220 = vrot.lane.b32.xlu0 %v4203_v11, %s3075_s12 }
 0xacf   :  { %v4208_v20 = vpop.eup %2909  ;;  %2911 = vpow2.f32 %v1186_v62  ;;  %v1160_v31 = vmul.f32 1.442695, %v1156_v54  ;;  %v1110_v54 = vmul.f32 1.442695, %v1105_v61 }
 0xad0   :  { %1198 = vrot.lane.b32.xlu1 %v4208_v20, %s3077_s18 }
 0xad1   :  { %2913 = vpow2.f32 %v1160_v31 }
 0xad4   :  { %v1151_v55 = vpop.permute.xlu1 %1150 }
 0xad5   :  { %v4212_v0 = vpop.eup %2911  ;;  %v1159_v48 = vsub.f32 %v3837_v16, %v1151_v55 }
 0xad6   :  { %5098 = vst [vmem:[#allocation47_spill] sm:$0xff] %v4212_v0  ;;  %1238 = vrot.lane.b32.xlu0 %v4212_v0, %s3078_s1 }
 0xad7   :  { %v4217_v37 = vpop.eup %2913  ;;  %v1166_v8 = vmul.f32 1.442695, %v1159_v48 }
 0xad8   :  { %5099 = vst [vmem:[#allocation48_spill] sm:$0xff] %v4217_v37  ;;  %1216 = vrot.lane.b32.xlu1 %v4217_v37, %s3075_s12 }
 0xad9   :  { %2915 = vpow2.f32 %v1166_v8 }
 0xadc   :  { %v1173_v51 = vpop.permute.xlu1 %1172 }
 0xadd   :  { %v1182_v58 = vsub.f32 %v3581_v41, %v1173_v51  ;;  %v1104_v41 = vsub.f32 %v3671_v9, %v4135_v21  ;;  %v1107_v51 = vsub.f32 %v3747_v30, %v4141_v19 }
 0xadf   :  { %v4222_v52 = vpop.eup %2915  ;;  %v1188_v50 = vmul.f32 1.442695, %v1182_v58  ;;  %v1108_v31 = vmul.f32 1.442695, %v1104_v41  ;;  %v1114_v38 = vmul.f32 1.442695, %v1107_v51 }
 0xae0   :  { %5100 = vst [vmem:[#allocation49_spill] sm:$0xff] %v4222_v52  ;;  %1222 = vrot.lane.b32.xlu1 %v4222_v52, %s3075_s12 }
 0xae1   :  { %2917 = vpow2.f32 %v1188_v50 }
 0xae2   :  { %2919 = vpow2.f32 %v1110_v54 }
 0xae3   :  { %2921 = vpow2.f32 %v1108_v31  ;;  %v1112_v31 = vmul.f32 1.442695, %v1106_v47 }
 0xae4   :  { %2923 = vpow2.f32 %v1114_v38 }
 0xae7   :  { %v4226_v16 = vpop.eup %2917 }
 0xae8   :  { %5101 = vst [vmem:[#allocation50_spill] sm:$0xff] %v4226_v16  ;;  %1240 = vrot.lane.b32.xlu1 %v4226_v16, %s3078_s1  ;;  %v2920_v8 = vpop.eup %2919 }
 0xae9   :  { %v2922_v4 = vpop.eup %2921 }
 0xaea   :  { %v4238_v30 = vpop.eup %2923 }
 0xb0c   :  { %v1201_v3 = vpop.permute.xlu2 %1200 }
 0xb14   :  { %v1219_v55 = vpop.permute.xlu2 %1218 }
 0xb1c   :  { %v1237_v21 = vpop.permute.xlu2 %1236 }
 0xb24   :  { %v1243_v23 = vpop.permute.xlu2 %1242 }
 0xb30   :  { %v1197_v29 = vpop.permute.xlu0 %1196 }
 0xb31   :  { %v1208_v16 = vadd.f32 %v2922_v4, %v1197_v29 }
 0xb38   :  { %v1203_v62 = vpop.permute.xlu0 %1202 }
 0xb40   :  { %v1221_v48 = vpop.permute.xlu0 %1220 }
 0xb42   :  { %v1199_v58 = vpop.permute.xlu1 %1198 }
 0xb43   :  { %v1209_v50 = vadd.f32 %v2920_v8, %v1199_v58 }
 0xb45   :  { %v1229_v36 = vadd.f32 %v1219_v55, %v1209_v50  ;;  %v1211_v55 = vadd.f32 %v4238_v30, %v1203_v62 }
 0xb48   :  { %v1239_v61 = vpop.permute.xlu0 %1238 }
 0xb49   :  { %v1249_v9 = vadd.f32 %v1239_v61, %v1229_v36 }
 0xb4a   :  { %v1217_v54 = vpop.permute.xlu1 %1216 }
 0xb4b   :  { %2925 = vrcp.f32 %v1249_v9  ;;  %v1228_v41 = vadd.f32 %v1217_v54, %v1208_v16  ;;  %v1275_v38 = vand.u32 2147483647, %v1249_v9  ;;  %v1277_v61 = vand.u32 2147483648, %v1249_v9 }
 0xb4c   :  { %vm1271_vm7 = vweird.f32 %v1249_v9 }
 0xb4d   :  { %v1248_v0 = vadd.f32 %v1237_v21, %v1228_v41  ;;  %vm1276_vm9 = vcmp.eq.f32.partialorder %v1275_v38, 8.507059e+37 }
 0xb4f   :  { %2927 = vrcp.f32 %v1248_v0  ;;  %vm1257_vm11 = vweird.f32 %v1248_v0 }
 0xb50   :  { %2929 = vpow2.f32 %v1112_v31  ;;  %v1278_v31 = vor.u32 1.1754944e-38, %v1277_v61 }
 0xb51   :  { %v2926_v19 = vpop.eup %2925 }
 0xb52   :  { %v1267_v51 = vmul.f32 %v2926_v19, %v1249_v9  ;;  %v1223_v58 = vpop.permute.xlu1 %1222  ;;  %vm1272_vm6 = vweird.f32 %v2926_v19 }
 0xb53   :  { %v1231_v22 = vadd.f32 %v1223_v58, %v1211_v55  ;;  %vm1273_vm8 = vmor %vm1271_vm7, %vm1272_vm6  ;;  %v1263_v55 = vand.u32 2147483648, %v1248_v0 }
 0xb54   :  { %v1268_v29 = vsub.f32 1.0, %v1267_v51 }
 0xb55   :  { %v2928_v36 = vpop.eup %2927  ;;  %v1251_v50 = vadd.f32 %v1243_v23, %v1231_v22  ;;  %v1261_v23 = vand.u32 2147483647, %v1248_v0 }
 0xb56   :  { %v4241_v11 = vpop.eup %2929  ;;  %v1269_v16 = vmul.f32 %v2926_v19, %v1268_v29  ;;  %v1253_v47 = vmul.f32 %v2928_v36, %v1248_v0  ;;  %vm1258_vm10 = vweird.f32 %v2928_v36 }
 0xb57   :  { %v1210_v21 = vadd.f32 %v4241_v11, %v1201_v3  ;;  %2931 = vrcp.f32 %v1251_v50  ;;  %vm1259_vm12 = vmor %vm1257_vm11, %vm1258_vm10  ;;  %vm1262_vm13 = vcmp.eq.f32.partialorder %v1261_v23, 8.507059e+37  ;;  %vm1299_vm15 = vweird.f32 %v1251_v50 }
 0xb58   :  { %v1270_v54 = vadd.f32 %v2926_v19, %v1269_v16  ;;  %v1254_v62 = vsub.f32 1.0, %v1253_v47 }
 0xb59   :  { %v1230_v41 = vadd.f32 %v1221_v48, %v1210_v21  ;;  %v1264_v48 = vor.u32 1.1754944e-38, %v1263_v55  ;;  %v1305_v21 = vand.u32 2147483648, %v1251_v50 }
 0xb5a   :  { %v1241_v51 = vpop.permute.xlu1 %1240  ;;  %v1274_v58 = vsel %vm1273_vm8, %v2926_v19, %v1270_v54  ;;  %v1255_v22 = vmul.f32 %v2928_v36, %v1254_v62  ;;  %v1303_v62 = vand.u32 2147483647, %v1251_v50 }
 0xb5b   :  { %v1250_v37 = vadd.f32 %v1241_v51, %v1230_v41  ;;  %v1279_v29 = vsel %vm1276_vm9, %v1278_v31, %v1274_v58 }
 0xb5c   :  { %1318 = vrot.lane.b32.xlu1 %v1279_v29, %s3079_s30  ;;  %v1256_v52 = vadd.f32 %v2928_v36, %v1255_v22  ;;  %v4245_v3 = vmul.f32 %v2920_v8, %v1279_v29  ;;  %vm1304_vm3 = vcmp.eq.f32.partialorder %v1303_v62, 8.507059e+37 }
 0xb5d   :  { %v2932_v9 = vpop.eup %2931  ;;  %2933 = vrcp.f32 %v1250_v37  ;;  %v1291_v51 = vand.u32 2147483648, %v1250_v37  ;;  %v1289_v58 = vand.u32 2147483647, %v1250_v37  ;;  %vm1285_vm5 = vweird.f32 %v1250_v37 }
 0xb5e   :  { %v1260_v38 = vsel %vm1259_vm12, %v2928_v36, %v1256_v52  ;;  %v1295_v61 = vmul.f32 %v2932_v9, %v1251_v50  ;;  %vm1300_vm14 = vweird.f32 %v2932_v9  ;;  %v1306_v52 = vor.u32 1.1754944e-38, %v1305_v21 }
 0xb5f   :  { %v1265_v16 = vsel %vm1262_vm13, %v1264_v48, %v1260_v38  ;;  %vm1301_vm0 = vmor %vm1299_vm15, %vm1300_vm14  ;;  %v1292_v48 = vor.u32 1.1754944e-38, %v1291_v51  ;;  %vm1290_vm7 = vcmp.eq.f32.partialorder %v1289_v58, 8.507059e+37 }
 0xb60   :  { %1316 = vrot.lane.b32.xlu0 %v1265_v16, %s3079_s30  ;;  %v1296_v19 = vsub.f32 1.0, %v1295_v61  ;;  %v4248_v47 = vmul.f32 %v2922_v4, %v1265_v16 }
 0xb62   :  { %v1297_v54 = vmul.f32 %v2932_v9, %v1296_v19 }
 0xb63   :  { %v2934_v0 = vpop.eup %2933 }
 0xb64   :  { %v1281_v8 = vmul.f32 %v2934_v0, %v1250_v37  ;;  %1332 = vrot.lane.b32.xlu1 %v1265_v16, %s3069_s24  ;;  %v1298_v41 = vadd.f32 %v2932_v9, %v1297_v54  ;;  %vm1286_vm4 = vweird.f32 %v2934_v0  ;;  %v5102_v37 = vld [vmem:[#allocation17_spill] sm:$0xff] }
 0xb65   :  { %vm1287_vm6 = vmor %vm1285_vm5, %vm1286_vm4 }
 0xb66   :  { %v1302_v36 = vsel %vm1301_vm0, %v2932_v9, %v1298_v41  ;;  %v1282_v31 = vsub.f32 1.0, %v1281_v8 }
 0xb67   :  { %v1307_v55 = vsel %vm1304_vm3, %v1306_v52, %v1302_v36 }
 0xb68   :  { %1322 = vrot.lane.b32.xlu0 %v1307_v55, %s3079_s30  ;;  %v1283_v4 = vmul.f32 %v2934_v0, %v1282_v31  ;;  %v4253_v22 = vmul.f32 %v4238_v30, %v1307_v55 }
 0xb6a   :  { %v1284_v23 = vadd.f32 %v2934_v0, %v1283_v4 }
 0xb6c   :  { %1338 = vrot.lane.b32.xlu1 %v1307_v55, %s3069_s24  ;;  %v1288_v50 = vsel %vm1287_vm6, %v2934_v0, %v1284_v23 }
 0xb6d   :  { %v4256_v9 = vsel %vm1290_vm7, %v1292_v48, %v1288_v50 }
 0xb6e   :  { %1320 = vrot.lane.b32.xlu2 %v4256_v9, %s3079_s30 }
 0xb70   :  { %1336 = vrot.lane.b32.xlu0 %v4256_v9, %s3069_s24 }
 0xb74   :  { %1352 = vrot.lane.b32.xlu1 %v4256_v9, %s3080_s5 }
 0xb76   :  { %1334 = vrot.lane.b32.xlu2 %v1279_v29, %s3069_s24 }
 0xb78   :  { %1350 = vrot.lane.b32.xlu0 %v1279_v29, %s3080_s5 }
 0xb7c   :  { %1370 = vrot.lane.b32.xlu1 %v3801_v40, %s3077_s18 }
 0xb7e   :  { %1348 = vrot.lane.b32.xlu2 %v1265_v16, %s3080_s5 }
 0xb80   :  { %1368 = vrot.lane.b32.xlu0 %v3688_v27, %s3077_s18 }
 0xb84   :  { %1388 = vrot.lane.b32.xlu1 %v3705_v57, %s3075_s12 }
 0xb86   :  { %1354 = vrot.lane.b32.xlu2 %v1307_v55, %s3080_s5 }
 0xb88   :  { %1374 = vrot.lane.b32.xlu0 %v3809_v46, %s3077_s18 }
 0xb8c   :  { %1394 = vrot.lane.b32.xlu1 %v3849_v7, %s3075_s12 }
 0xb8e   :  { %1372 = vrot.lane.b32.xlu2 %v5102_v37, %s3077_s18 }
 0xb90   :  { %1392 = vrot.lane.b32.xlu0 %v3563_v60, %s3075_s12 }
 0xb94   :  { %1412 = vrot.lane.b32.xlu1 %v3937_v5, %s3078_s1 }
 0xb96   :  { %1390 = vrot.lane.b32.xlu2 %v3841_v56, %s3075_s12 }
 0xb98   :  { %1410 = vrot.lane.b32.xlu0 %v3887_v18, %s3078_s1 }
 0xb9e   :  { %1408 = vrot.lane.b32.xlu2 %v3727_v1, %s3078_s1 }
 0xba6   :  { %1414 = vrot.lane.b32.xlu2 %v3895_v35, %s3078_s1 }
 0xbc8   :  { %v4292_v30 = vpop.permute.xlu2 %1320 }
 0xbce   :  { %v4294_v29 = vpop.permute.xlu1 %1318 }
 0xbd0   :  { %v4296_v38 = vpop.permute.xlu2 %1334 }
 0xbd1   :  { %5103 = vst [vmem:[#allocation17_spill] sm:$0xff] %v4296_v38 }
 0xbd2   :  { %v4298_v61 = vpop.permute.xlu0 %1316 }
 0xbd6   :  { %v4300_v16 = vpop.permute.xlu1 %1332 }
 0xbd7   :  { %5104 = vst [vmem:[#allocation51_spill] sm:$0xff] %v4300_v16 }
 0xbd8   :  { %v4302_v19 = vpop.permute.xlu2 %1348 }
 0xbd9   :  { %5105 = vst [vmem:[#allocation52_spill] sm:$0xff] %v4302_v19 }
 0xbda   :  { %v4304_v21 = vpop.permute.xlu0 %1322 }
 0xbde   :  { %v4306_v54 = vpop.permute.xlu1 %1338 }
 0xbdf   :  { %5106 = vst [vmem:[#allocation53_spill] sm:$0xff] %v4306_v54  ;;  %v5111_v54 = vld [vmem:[#allocation14_spill] sm:$0xff] }
 0xbe0   :  { %v4308_v62 = vpop.permute.xlu2 %1354 }
 0xbe1   :  { %5107 = vst [vmem:[#allocation54_spill] sm:$0xff] %v4308_v62 }
 0xbe2   :  { %v4310_v0 = vpop.permute.xlu0 %1336 }
 0xbe3   :  { %5108 = vst [vmem:[#allocation55_spill] sm:$0xff] %v4310_v0 }
 0xbe6   :  { %v4312_v8 = vpop.permute.xlu1 %1352 }
 0xbe7   :  { %5109 = vst [vmem:[#allocation56_spill] sm:$0xff] %v4312_v8 }
 0xbe8   :  { %v1373_v41 = vpop.permute.xlu2 %1372 }
 0xbe9   :  { %v1382_v34 = vmax.f32 %v5111_v54, %v1373_v41 }
 0xbea   :  { %v4314_v52 = vpop.permute.xlu0 %1350 }
 0xbeb   :  { %5110 = vst [vmem:[#allocation57_spill] sm:$0xff] %v4314_v52 }
 0xbee   :  { %v1371_v36 = vpop.permute.xlu1 %1370 }
 0xbf0   :  { %v1391_v31 = vpop.permute.xlu2 %1390 }
 0xbf2   :  { %v1369_v55 = vpop.permute.xlu0 %1368 }
 0xbf3   :  { %v1380_v51 = vmax.f32 %v3674_v14, %v1369_v55  ;;  %v1381_v55 = vmax.f32 %v3759_v26, %v1371_v36 }
 0xbf6   :  { %v1389_v4 = vpop.permute.xlu1 %1388 }
 0xbf7   :  { %v1400_v58 = vmax.f32 %v1380_v51, %v1389_v4 }
 0xbf8   :  { %v1409_v23 = vpop.permute.xlu2 %1408 }
 0xbf9   :  { %v4317_v48 = vmax.f32 %v1400_v58, %v1409_v23  ;;  %v1401_v23 = vmax.f32 %v1381_v55, %v1391_v31 }
 0xbfa   :  { %v1375_v50 = vpop.permute.xlu0 %1374 }
 0xbfb   :  { %1440 = vrot.lane.b32.xlu0 %v4317_v48, %s3079_s30  ;;  %v1383_v62 = vmax.f32 %v3778_v39, %v1375_v50 }
 0xbfe   :  { %v1395_v19 = vpop.permute.xlu1 %1394 }
 0xbff   :  { %v1403_v8 = vmax.f32 %v1383_v62, %v1395_v19 }
 0xc00   :  { %v1415_v0 = vpop.permute.xlu2 %1414 }
 0xc01   :  { %v4322_v52 = vmax.f32 %v1403_v8, %v1415_v0 }
 0xc02   :  { %v1393_v16 = vpop.permute.xlu0 %1392 }
 0xc03   :  { %1446 = vrot.lane.b32.xlu0 %v4322_v52, %s3079_s30  ;;  %v1402_v51 = vmax.f32 %v1382_v34, %v1393_v16 }
 0xc06   :  { %v1413_v4 = vpop.permute.xlu1 %1412 }
 0xc07   :  { %v4328_v58 = vmax.f32 %v1402_v51, %v1413_v4 }
 0xc09   :  { %1444 = vrot.lane.b32.xlu2 %v4328_v58, %s3079_s30 }
 0xc0a   :  { %v1411_v19 = vpop.permute.xlu0 %1410 }
 0xc0b   :  { %v4332_v62 = vmax.f32 %v1401_v23, %v1411_v19  ;;  %1468 = vrot.lane.b32.xlu0 %v4328_v58, %s3069_s24 }
 0xc0d   :  { %1442 = vrot.lane.b32.xlu1 %v4332_v62, %s3079_s30 }
 0xc11   :  { %1466 = vrot.lane.b32.xlu2 %v4332_v62, %s3069_s24 }
 0xc13   :  { %1490 = vrot.lane.b32.xlu0 %v4332_v62, %s3080_s5 }
 0xc15   :  { %1464 = vrot.lane.b32.xlu1 %v4317_v48, %s3069_s24 }
 0xc19   :  { %1488 = vrot.lane.b32.xlu2 %v4317_v48, %s3080_s5 }
 0xc1d   :  { %1470 = vrot.lane.b32.xlu1 %v4322_v52, %s3069_s24 }
 0xc21   :  { %1494 = vrot.lane.b32.xlu2 %v4322_v52, %s3080_s5 }
 0xc25   :  { %1492 = vrot.lane.b32.xlu1 %v4328_v58, %s3080_s5 }
 0xc63   :  { %v1445_v34 = vpop.permute.xlu2 %1444 }
 0xc64   :  { %v1454_v16 = vsub.f32 %v5102_v37, %v1445_v34 }
 0xc66   :  { %v1460_v0 = vmul.f32 1.442695, %v1454_v16 }
 0xc68   :  { %2935 = vpow2.f32 %v1460_v0 }
 0xc6b   :  { %v1467_v8 = vpop.permute.xlu2 %1466 }
 0xc6c   :  { %v1477_v41 = vsub.f32 %v3841_v56, %v1467_v8 }
 0xc6d   :  { %v1441_v36 = vpop.permute.xlu0 %1440 }
 0xc6e   :  { %v4354_v31 = vpop.eup %2935  ;;  %v1482_v50 = vmul.f32 1.442695, %v1477_v41  ;;  %v1452_v55 = vsub.f32 %v3688_v27, %v1441_v36 }
 0xc6f   :  { %5112 = vst [vmem:[#allocation14_spill] sm:$0xff] %v4354_v31  ;;  %1520 = vrot.lane.b32.xlu2 %v4354_v31, %s3077_s18 }
 0xc70   :  { %2937 = vpow2.f32 %v1482_v50  ;;  %v1456_v51 = vmul.f32 1.442695, %v1452_v55 }
 0xc72   :  { %2939 = vpow2.f32 %v1456_v51 }
 0xc73   :  { %v1489_v4 = vpop.permute.xlu2 %1488 }
 0xc74   :  { %v1500_v37 = vsub.f32 %v3727_v1, %v1489_v4 }
 0xc75   :  { %v1447_v23 = vpop.permute.xlu0 %1446 }
 0xc76   :  { %v4360_v19 = vpop.eup %2937  ;;  %v1504_v34 = vmul.f32 1.442695, %v1500_v37  ;;  %v1455_v56 = vsub.f32 %v3809_v46, %v1447_v23 }
 0xc77   :  { %5113 = vst [vmem:[#allocation58_spill] sm:$0xff] %v4360_v19  ;;  %1538 = vrot.lane.b32.xlu2 %v4360_v19, %s3075_s12 }
 0xc78   :  { %v4365_v16 = vpop.eup %2939  ;;  %2941 = vpow2.f32 %v1504_v34  ;;  %v1462_v27 = vmul.f32 1.442695, %v1455_v56 }
 0xc79   :  { %5114 = vst [vmem:[#allocation59_spill] sm:$0xff] %v4365_v16  ;;  %1516 = vrot.lane.b32.xlu0 %v4365_v16, %s3077_s18 }
 0xc7a   :  { %2943 = vpow2.f32 %v1462_v27 }
 0xc7b   :  { %v1495_v0 = vpop.permute.xlu2 %1494 }
 0xc7c   :  { %v1503_v1 = vsub.f32 %v3895_v35, %v1495_v0 }
 0xc7d   :  { %v1469_v8 = vpop.permute.xlu0 %1468 }
 0xc7e   :  { %v4370_v41 = vpop.eup %2941  ;;  %v1510_v36 = vmul.f32 1.442695, %v1503_v1  ;;  %v1478_v46 = vsub.f32 %v3563_v60, %v1469_v8 }
 0xc7f   :  { %5115 = vst [vmem:[#allocation60_spill] sm:$0xff] %v4370_v41  ;;  %1556 = vrot.lane.b32.xlu2 %v4370_v41, %s3078_s1  ;;  %v1443_v50 = vpop.permute.xlu1 %1442 }
 0xc80   :  { %v4375_v55 = vpop.eup %2943  ;;  %2945 = vpow2.f32 %v1510_v36  ;;  %v1484_v51 = vmul.f32 1.442695, %v1478_v46  ;;  %v1453_v4 = vsub.f32 %v3801_v40, %v1443_v50 }
 0xc81   :  { %5116 = vst [vmem:[#allocation61_spill] sm:$0xff] %v4375_v55  ;;  %1522 = vrot.lane.b32.xlu0 %v4375_v55, %s3077_s18 }
 0xc82   :  { %2947 = vpow2.f32 %v1484_v51  ;;  %v1458_v35 = vmul.f32 1.442695, %v1453_v4 }
 0xc84   :  { %2949 = vpow2.f32 %v1458_v35 }
 0xc85   :  { %v1491_v37 = vpop.permute.xlu0 %1490 }
 0xc86   :  { %v4380_v23 = vpop.eup %2945  ;;  %v1501_v60 = vsub.f32 %v3887_v18, %v1491_v37 }
 0xc87   :  { %5117 = vst [vmem:[#allocation62_spill] sm:$0xff] %v4380_v23  ;;  %1562 = vrot.lane.b32.xlu2 %v4380_v23, %s3078_s1  ;;  %v1465_v34 = vpop.permute.xlu1 %1464 }
 0xc88   :  { %v4385_v56 = vpop.eup %2947  ;;  %v1506_v27 = vmul.f32 1.442695, %v1501_v60  ;;  %v1476_v40 = vsub.f32 %v3705_v57, %v1465_v34  ;;  %v1425_v60 = vsub.f32 %v3759_v26, %v4332_v62  ;;  %v1426_v62 = vsub.f32 %v5111_v54, %v4328_v58 }
 0xc89   :  { %5118 = vst [vmem:[#allocation63_spill] sm:$0xff] %v4385_v56  ;;  %1540 = vrot.lane.b32.xlu0 %v4385_v56, %s3075_s12 }
 0xc8a   :  { %v4390_v0 = vpop.eup %2949  ;;  %2951 = vpow2.f32 %v1506_v27  ;;  %v1480_v1 = vmul.f32 1.442695, %v1476_v40  ;;  %v1430_v40 = vmul.f32 1.442695, %v1425_v60 }
 0xc8b   :  { %5119 = vst [vmem:[#allocation64_spill] sm:$0xff] %v4390_v0  ;;  %1518 = vrot.lane.b32.xlu1 %v4390_v0, %s3077_s18 }
 0xc8c   :  { %2953 = vpow2.f32 %v1480_v1 }
 0xc8f   :  { %v1471_v18 = vpop.permute.xlu1 %1470 }
 0xc90   :  { %v4394_v8 = vpop.eup %2951  ;;  %v1479_v36 = vsub.f32 %v3849_v7, %v1471_v18 }
 0xc91   :  { %5120 = vst [vmem:[#allocation65_spill] sm:$0xff] %v4394_v8  ;;  %1558 = vrot.lane.b32.xlu0 %v4394_v8, %s3078_s1 }
 0xc92   :  { %v4399_v57 = vpop.eup %2953  ;;  %v1486_v46 = vmul.f32 1.442695, %v1479_v36 }
 0xc93   :  { %5121 = vst [vmem:[#allocation66_spill] sm:$0xff] %v4399_v57  ;;  %1536 = vrot.lane.b32.xlu1 %v4399_v57, %s3075_s12  ;;  %v5144_v57 = vld [vmem:[#allocation23_spill] sm:$0xff] }
 0xc94   :  { %2955 = vpow2.f32 %v1486_v46 }
 0xc97   :  { %v1493_v50 = vpop.permute.xlu1 %1492 }
 0xc98   :  { %v1502_v51 = vsub.f32 %v3937_v5, %v1493_v50  ;;  %v1424_v5 = vsub.f32 %v3674_v14, %v4317_v48  ;;  %v1427_v50 = vsub.f32 %v3778_v39, %v4322_v52 }
 0xc9a   :  { %v4404_v4 = vpop.eup %2955  ;;  %v1508_v35 = vmul.f32 1.442695, %v1502_v51  ;;  %v1428_v1 = vmul.f32 1.442695, %v1424_v5 }
 0xc9b   :  { %5122 = vst [vmem:[#allocation67_spill] sm:$0xff] %v4404_v4  ;;  %1542 = vrot.lane.b32.xlu1 %v4404_v4, %s3075_s12 }
 0xc9c   :  { %2957 = vpow2.f32 %v1508_v35 }
 0xc9d   :  { %2959 = vpow2.f32 %v1430_v40 }
 0xc9e   :  { %2961 = vpow2.f32 %v1428_v1  ;;  %v1432_v1 = vmul.f32 1.442695, %v1426_v62 }
 0xca2   :  { %v4408_v7 = vpop.eup %2957 }
 0xca3   :  { %5123 = vst [vmem:[#allocation68_spill] sm:$0xff] %v4408_v7  ;;  %1560 = vrot.lane.b32.xlu1 %v4408_v7, %s3078_s1  ;;  %v2960_v46 = vpop.eup %2959  ;;  %v1434_v7 = vmul.f32 1.442695, %v1427_v50 }
 0xca4   :  { %v2962_v26 = vpop.eup %2961 }
 0xca5   :  { %2963 = vpow2.f32 %v1434_v7 }
 0xcab   :  { %v4420_v39 = vpop.eup %2963 }
 0xcc9   :  { %v1521_v34 = vpop.permute.xlu2 %1520 }
 0xcd1   :  { %v1539_v18 = vpop.permute.xlu2 %1538 }
 0xcd9   :  { %v1557_v48 = vpop.permute.xlu2 %1556 }
 0xce1   :  { %v1563_v58 = vpop.permute.xlu2 %1562 }
 0xceb   :  { %v1517_v37 = vpop.permute.xlu0 %1516 }
 0xcec   :  { %v1528_v8 = vadd.f32 %v2962_v26, %v1517_v37 }
 0xcf3   :  { %v1523_v27 = vpop.permute.xlu0 %1522 }
 0xcfb   :  { %v1541_v36 = vpop.permute.xlu0 %1540 }
 0xcfd   :  { %v1519_v51 = vpop.permute.xlu1 %1518 }
 0xcfe   :  { %v1529_v35 = vadd.f32 %v2960_v46, %v1519_v51 }
 0xd00   :  { %v1549_v23 = vadd.f32 %v1539_v18, %v1529_v35  ;;  %v1531_v18 = vadd.f32 %v4420_v39, %v1523_v27 }
 0xd03   :  { %v1559_v60 = vpop.permute.xlu0 %1558 }
 0xd04   :  { %v1569_v14 = vadd.f32 %v1559_v60, %v1549_v23 }
 0xd05   :  { %v1537_v40 = vpop.permute.xlu1 %1536 }
 0xd06   :  { %2965 = vrcp.f32 %v1569_v14  ;;  %v1548_v5 = vadd.f32 %v1537_v40, %v1528_v8  ;;  %v1595_v7 = vand.u32 2147483647, %v1569_v14  ;;  %v1597_v60 = vand.u32 2147483648, %v1569_v14 }
 0xd07   :  { %vm1591_vm9 = vweird.f32 %v1569_v14 }
 0xd08   :  { %v1568_v41 = vadd.f32 %v1557_v48, %v1548_v5  ;;  %vm1596_vm11 = vcmp.eq.f32.partialorder %v1595_v7, 8.507059e+37 }
 0xd0a   :  { %2967 = vrcp.f32 %v1568_v41  ;;  %vm1577_vm13 = vweird.f32 %v1568_v41 }
 0xd0b   :  { %2969 = vpow2.f32 %v1432_v1  ;;  %v1598_v1 = vor.u32 1.1754944e-38, %v1597_v60 }
 0xd0c   :  { %v2966_v52 = vpop.eup %2965 }
 0xd0d   :  { %v1587_v50 = vmul.f32 %v2966_v52, %v1569_v14  ;;  %v1543_v51 = vpop.permute.xlu1 %1542  ;;  %vm1592_vm8 = vweird.f32 %v2966_v52 }
 0xd0e   :  { %v1551_v54 = vadd.f32 %v1543_v51, %v1531_v18  ;;  %vm1593_vm10 = vmor %vm1591_vm9, %vm1592_vm8  ;;  %v1583_v18 = vand.u32 2147483648, %v1568_v41 }
 0xd0f   :  { %v1588_v37 = vsub.f32 1.0, %v1587_v50 }
 0xd10   :  { %v2968_v23 = vpop.eup %2967  ;;  %v1571_v35 = vadd.f32 %v1563_v58, %v1551_v54  ;;  %v1581_v58 = vand.u32 2147483647, %v1568_v41 }
 0xd11   :  { %v4423_v56 = vpop.eup %2969  ;;  %v1589_v8 = vmul.f32 %v2966_v52, %v1588_v37  ;;  %v1573_v62 = vmul.f32 %v2968_v23, %v1568_v41  ;;  %vm1578_vm12 = vweird.f32 %v2968_v23 }
 0xd12   :  { %v1530_v48 = vadd.f32 %v4423_v56, %v1521_v34  ;;  %2971 = vrcp.f32 %v1571_v35  ;;  %vm1579_vm14 = vmor %vm1577_vm13, %vm1578_vm12  ;;  %vm1582_vm15 = vcmp.eq.f32.partialorder %v1581_v58, 8.507059e+37  ;;  %vm1619_vm3 = vweird.f32 %v1571_v35 }
 0xd13   :  { %v1590_v40 = vadd.f32 %v2966_v52, %v1589_v8  ;;  %v1574_v27 = vsub.f32 1.0, %v1573_v62 }
 0xd14   :  { %v1550_v5 = vadd.f32 %v1541_v36, %v1530_v48  ;;  %v1584_v36 = vor.u32 1.1754944e-38, %v1583_v18  ;;  %v1625_v48 = vand.u32 2147483648, %v1571_v35 }
 0xd15   :  { %v1561_v50 = vpop.permute.xlu1 %1560  ;;  %v1594_v51 = vsel %vm1593_vm10, %v2966_v52, %v1590_v40  ;;  %v1575_v54 = vmul.f32 %v2968_v23, %v1574_v27  ;;  %v1623_v27 = vand.u32 2147483647, %v1571_v35 }
 0xd16   :  { %v1570_v4 = vadd.f32 %v1561_v50, %v1550_v5  ;;  %v1599_v37 = vsel %vm1596_vm11, %v1598_v1, %v1594_v51 }
 0xd17   :  { %1638 = vrot.lane.b32.xlu1 %v1599_v37, %s3079_s30  ;;  %v1576_v19 = vadd.f32 %v2968_v23, %v1575_v54  ;;  %v4427_v34 = vmul.f32 %v2960_v46, %v1599_v37  ;;  %vm1624_vm5 = vcmp.eq.f32.partialorder %v1623_v27, 8.507059e+37 }
 0xd18   :  { %v2972_v14 = vpop.eup %2971  ;;  %2973 = vrcp.f32 %v1570_v4  ;;  %v1611_v50 = vand.u32 2147483648, %v1570_v4  ;;  %v1609_v51 = vand.u32 2147483647, %v1570_v4  ;;  %vm1605_vm7 = vweird.f32 %v1570_v4 }
 0xd19   :  { %v1580_v7 = vsel %vm1579_vm14, %v2968_v23, %v1576_v19  ;;  %v1615_v60 = vmul.f32 %v2972_v14, %v1571_v35  ;;  %vm1620_vm0 = vweird.f32 %v2972_v14  ;;  %v1626_v19 = vor.u32 1.1754944e-38, %v1625_v48  ;;  %v5131_v48 = vld [vmem:[#allocation27_spill] sm:$0xff] }
 0xd1a   :  { %v1585_v8 = vsel %vm1582_vm15, %v1584_v36, %v1580_v7  ;;  %vm1621_vm4 = vmor %vm1619_vm3, %vm1620_vm0  ;;  %v1612_v36 = vor.u32 1.1754944e-38, %v1611_v50  ;;  %vm1610_vm9 = vcmp.eq.f32.partialorder %v1609_v51, 8.507059e+37  ;;  %v5127_v7 = vld [vmem:[#allocation28_spill] sm:$0xff] }
 0xd1b   :  { %1636 = vrot.lane.b32.xlu0 %v1585_v8, %s3079_s30  ;;  %v1616_v52 = vsub.f32 1.0, %v1615_v60  ;;  %v4430_v62 = vmul.f32 %v2962_v26, %v1585_v8  ;;  %v5128_v60 = vld [vmem:[#allocation19_spill] sm:$0xff] }
 0xd1d   :  { %v1617_v40 = vmul.f32 %v2972_v14, %v1616_v52  ;;  %v5130_v52 = vld [vmem:[#allocation24_spill] sm:$0xff] }
 0xd1e   :  { %v2974_v41 = vpop.eup %2973 }
 0xd1f   :  { %v1601_v46 = vmul.f32 %v2974_v41, %v1570_v4  ;;  %1652 = vrot.lane.b32.xlu1 %v1585_v8, %s3069_s24  ;;  %v1618_v5 = vadd.f32 %v2972_v14, %v1617_v40  ;;  %vm1606_vm6 = vweird.f32 %v2974_v41  ;;  %v5124_v4 = vld [vmem:[#allocation20_spill] sm:$0xff] }
 0xd20   :  { %vm1607_vm8 = vmor %vm1605_vm7, %vm1606_vm6 }
 0xd21   :  { %v1622_v23 = vsel %vm1621_vm4, %v2972_v14, %v1618_v5  ;;  %v1602_v1 = vsub.f32 1.0, %v1601_v46 }
 0xd22   :  { %v1627_v18 = vsel %vm1624_vm5, %v1626_v19, %v1622_v23 }
 0xd23   :  { %1642 = vrot.lane.b32.xlu0 %v1627_v18, %s3079_s30  ;;  %v1603_v26 = vmul.f32 %v2974_v41, %v1602_v1  ;;  %v4435_v54 = vmul.f32 %v4420_v39, %v1627_v18  ;;  %v5125_v39 = vld [vmem:[#allocation18_spill] sm:$0xff] }
 0xd25   :  { %v1604_v58 = vadd.f32 %v2974_v41, %v1603_v26 }
 0xd27   :  { %1658 = vrot.lane.b32.xlu1 %v1627_v18, %s3069_s24  ;;  %v1608_v35 = vsel %vm1607_vm8, %v2974_v41, %v1604_v58 }
 0xd28   :  { %v4438_v14 = vsel %vm1610_vm9, %v1612_v36, %v1608_v35 }
 0xd29   :  { %1640 = vrot.lane.b32.xlu2 %v4438_v14, %s3079_s30 }
 0xd2b   :  { %1656 = vrot.lane.b32.xlu0 %v4438_v14, %s3069_s24 }
 0xd2f   :  { %1672 = vrot.lane.b32.xlu1 %v4438_v14, %s3080_s5 }
 0xd31   :  { %1654 = vrot.lane.b32.xlu2 %v1599_v37, %s3069_s24 }
 0xd33   :  { %1670 = vrot.lane.b32.xlu0 %v1599_v37, %s3080_s5  ;;  %v5126_v37 = vld [vmem:[#allocation22_spill] sm:$0xff] }
 0xd37   :  { %1690 = vrot.lane.b32.xlu1 %v3813_v2, %s3077_s18 }
 0xd39   :  { %1668 = vrot.lane.b32.xlu2 %v1585_v8, %s3080_s5  ;;  %v5129_v8 = vld [vmem:[#allocation21_spill] sm:$0xff] }
 0xd3b   :  { %1688 = vrot.lane.b32.xlu0 %v3693_v45, %s3077_s18 }
 0xd3f   :  { %1708 = vrot.lane.b32.xlu1 %v3714_v32, %s3075_s12 }
 0xd41   :  { %1674 = vrot.lane.b32.xlu2 %v1627_v18, %s3080_s5 }
 0xd43   :  { %1694 = vrot.lane.b32.xlu0 %v3821_v43, %s3077_s18 }
 0xd47   :  { %1714 = vrot.lane.b32.xlu1 %v5124_v4, %s3075_s12 }
 0xd49   :  { %1692 = vrot.lane.b32.xlu2 %v5125_v39, %s3077_s18 }
 0xd4b   :  { %1712 = vrot.lane.b32.xlu0 %v5126_v37, %s3075_s12 }
 0xd4f   :  { %1732 = vrot.lane.b32.xlu1 %v5127_v7, %s3078_s1 }
 0xd51   :  { %1710 = vrot.lane.b32.xlu2 %v5128_v60, %s3075_s12 }
 0xd53   :  { %1730 = vrot.lane.b32.xlu0 %v5129_v8, %s3078_s1 }
 0xd59   :  { %1728 = vrot.lane.b32.xlu2 %v5130_v52, %s3078_s1 }
 0xd61   :  { %1734 = vrot.lane.b32.xlu2 %v5131_v48, %s3078_s1 }
 0xd83   :  { %v4474_v40 = vpop.permute.xlu2 %1640 }
 0xd84   :  { %5132 = vst [vmem:[#allocation20_spill] sm:$0xff] %v4474_v40 }
 0xd89   :  { %v4476_v27 = vpop.permute.xlu1 %1638 }
 0xd8a   :  { %5133 = vst [vmem:[#allocation18_spill] sm:$0xff] %v4476_v27 }
 0xd8b   :  { %v4478_v41 = vpop.permute.xlu2 %1654 }
 0xd8c   :  { %5134 = vst [vmem:[#allocation22_spill] sm:$0xff] %v4478_v41 }
 0xd8d   :  { %v4480_v46 = vpop.permute.xlu0 %1636 }
 0xd8e   :  { %5135 = vst [vmem:[#allocation28_spill] sm:$0xff] %v4480_v46 }
 0xd91   :  { %v4482_v5 = vpop.permute.xlu1 %1652 }
 0xd92   :  { %5136 = vst [vmem:[#allocation19_spill] sm:$0xff] %v4482_v5 }
 0xd93   :  { %v4484_v19 = vpop.permute.xlu2 %1668 }
 0xd94   :  { %5137 = vst [vmem:[#allocation21_spill] sm:$0xff] %v4484_v19 }
 0xd95   :  { %v4486_v23 = vpop.permute.xlu0 %1642 }
 0xd96   :  { %5138 = vst [vmem:[#allocation24_spill] sm:$0xff] %v4486_v23  ;;  %v5146_v23 = vld [vmem:[#allocation15_spill] sm:$0xff] }
 0xd99   :  { %v4488_v1 = vpop.permute.xlu1 %1658 }
 0xd9a   :  { %5139 = vst [vmem:[#allocation27_spill] sm:$0xff] %v4488_v1 }
 0xd9b   :  { %v4490_v18 = vpop.permute.xlu2 %1674 }
 0xd9c   :  { %5140 = vst [vmem:[#allocation69_spill] sm:$0xff] %v4490_v18  ;;  %v5145_v18 = vld [vmem:[#allocation26_spill] sm:$0xff] }
 0xd9d   :  { %v4492_v50 = vpop.permute.xlu0 %1656 }
 0xd9e   :  { %5141 = vst [vmem:[#allocation70_spill] sm:$0xff] %v4492_v50 }
 0xda1   :  { %v4494_v26 = vpop.permute.xlu1 %1672 }
 0xda2   :  { %5142 = vst [vmem:[#allocation71_spill] sm:$0xff] %v4494_v26 }
 0xda3   :  { %v1693_v51 = vpop.permute.xlu2 %1692 }
 0xda4   :  { %v1702_v16 = vmax.f32 %v5146_v23, %v1693_v51 }
 0xda5   :  { %v4496_v58 = vpop.permute.xlu0 %1670 }
 0xda6   :  { %5143 = vst [vmem:[#allocation72_spill] sm:$0xff] %v4496_v58 }
 0xda9   :  { %v1691_v36 = vpop.permute.xlu1 %1690 }
 0xdab   :  { %v1711_v35 = vpop.permute.xlu2 %1710 }
 0xdad   :  { %v1689_v41 = vpop.permute.xlu0 %1688 }
 0xdae   :  { %v1700_v5 = vmax.f32 %v5144_v57, %v1689_v41 }
 0xdb1   :  { %v1709_v38 = vpop.permute.xlu1 %1708 }
 0xdb2   :  { %v1720_v19 = vmax.f32 %v1700_v5, %v1709_v38  ;;  %v5147_v38 = vld [vmem:[#allocation25_spill] sm:$0xff] }
 0xdb3   :  { %v1729_v0 = vpop.permute.xlu2 %1728 }
 0xdb4   :  { %v4499_v27 = vmax.f32 %v1720_v19, %v1729_v0  ;;  %v1701_v0 = vmax.f32 %v5147_v38, %v1691_v36 }
 0xdb5   :  { %v1695_v1 = vpop.permute.xlu0 %1694 }
 0xdb6   :  { %1760 = vrot.lane.b32.xlu0 %v4499_v27, %s3079_s30  ;;  %v1703_v50 = vmax.f32 %v5145_v18, %v1695_v1  ;;  %v1721_v46 = vmax.f32 %v1701_v0, %v1711_v35 }
 0xdb9   :  { %v1715_v26 = vpop.permute.xlu1 %1714 }
 0xdba   :  { %v1723_v31 = vmax.f32 %v1703_v50, %v1715_v26 }
 0xdbb   :  { %v1735_v40 = vpop.permute.xlu2 %1734 }
 0xdbc   :  { %v4504_v58 = vmax.f32 %v1723_v31, %v1735_v40 }
 0xdbd   :  { %v1713_v55 = vpop.permute.xlu0 %1712 }
 0xdbe   :  { %1766 = vrot.lane.b32.xlu0 %v4504_v58, %s3079_s30  ;;  %v1722_v41 = vmax.f32 %v1702_v16, %v1713_v55 }
 0xdc1   :  { %v1733_v5 = vpop.permute.xlu1 %1732 }
 0xdc2   :  { %v4510_v19 = vmax.f32 %v1722_v41, %v1733_v5 }
 0xdc4   :  { %1764 = vrot.lane.b32.xlu2 %v4510_v19, %s3079_s30 }
 0xdc5   :  { %v1731_v1 = vpop.permute.xlu0 %1730 }
 0xdc6   :  { %v4514_v50 = vmax.f32 %v1721_v46, %v1731_v1  ;;  %1788 = vrot.lane.b32.xlu0 %v4510_v19, %s3069_s24 }
 0xdc8   :  { %1762 = vrot.lane.b32.xlu1 %v4514_v50, %s3079_s30 }
 0xdcc   :  { %1786 = vrot.lane.b32.xlu2 %v4514_v50, %s3069_s24 }
 0xdce   :  { %1810 = vrot.lane.b32.xlu0 %v4514_v50, %s3080_s5 }
 0xdd0   :  { %1784 = vrot.lane.b32.xlu1 %v4499_v27, %s3069_s24 }
 0xdd4   :  { %1808 = vrot.lane.b32.xlu2 %v4499_v27, %s3080_s5 }
 0xdd8   :  { %1790 = vrot.lane.b32.xlu1 %v4504_v58, %s3069_s24 }
 0xddc   :  { %1814 = vrot.lane.b32.xlu2 %v4504_v58, %s3080_s5 }
 0xde0   :  { %1812 = vrot.lane.b32.xlu1 %v4510_v19, %s3080_s5 }
 0xe1e   :  { %v1765_v31 = vpop.permute.xlu2 %1764 }
 0xe1f   :  { %v1774_v16 = vsub.f32 %v5125_v39, %v1765_v31 }
 0xe21   :  { %v1780_v55 = vmul.f32 1.442695, %v1774_v16 }
 0xe23   :  { %2975 = vpow2.f32 %v1780_v55 }
 0xe26   :  { %v1787_v40 = vpop.permute.xlu2 %1786 }
 0xe27   :  { %v1797_v46 = vsub.f32 %v5128_v60, %v1787_v40 }
 0xe28   :  { %v1761_v26 = vpop.permute.xlu0 %1760 }
 0xe29   :  { %v4536_v51 = vpop.eup %2975  ;;  %v1802_v36 = vmul.f32 1.442695, %v1797_v46  ;;  %v1772_v35 = vsub.f32 %v3693_v45, %v1761_v26 }
 0xe2a   :  { %1840 = vrot.lane.b32.xlu2 %v4536_v51, %s3077_s18 }
 0xe2b   :  { %2977 = vpow2.f32 %v1802_v36  ;;  %v1776_v0 = vmul.f32 1.442695, %v1772_v35 }
 0xe2d   :  { %2979 = vpow2.f32 %v1776_v0 }
 0xe2e   :  { %v1809_v41 = vpop.permute.xlu2 %1808 }
 0xe2f   :  { %v1820_v39 = vsub.f32 %v5130_v52, %v1809_v41 }
 0xe30   :  { %v1767_v5 = vpop.permute.xlu0 %1766 }
 0xe31   :  { %v4542_v1 = vpop.eup %2977  ;;  %v1824_v31 = vmul.f32 1.442695, %v1820_v39  ;;  %v1775_v60 = vsub.f32 %v3821_v43, %v1767_v5 }
 0xe32   :  { %1858 = vrot.lane.b32.xlu2 %v4542_v1, %s3075_s12 }
 0xe33   :  { %v4547_v16 = vpop.eup %2979  ;;  %2981 = vpow2.f32 %v1824_v31  ;;  %v1782_v45 = vmul.f32 1.442695, %v1775_v60 }
 0xe34   :  { %1836 = vrot.lane.b32.xlu0 %v4547_v16, %s3077_s18 }
 0xe35   :  { %2983 = vpow2.f32 %v1782_v45 }
 0xe36   :  { %v1815_v55 = vpop.permute.xlu2 %1814 }
 0xe37   :  { %v1823_v52 = vsub.f32 %v5131_v48, %v1815_v55 }
 0xe38   :  { %v1789_v40 = vpop.permute.xlu0 %1788 }
 0xe39   :  { %v4552_v46 = vpop.eup %2981  ;;  %v1830_v26 = vmul.f32 1.442695, %v1823_v52  ;;  %v1798_v43 = vsub.f32 %v5126_v37, %v1789_v40 }
 0xe3a   :  { %5148 = vst [vmem:[#allocation23_spill] sm:$0xff] %v4552_v46  ;;  %1876 = vrot.lane.b32.xlu2 %v4552_v46, %s3078_s1  ;;  %v1763_v36 = vpop.permute.xlu1 %1762 }
 0xe3b   :  { %v4557_v35 = vpop.eup %2983  ;;  %2985 = vpow2.f32 %v1830_v26  ;;  %v1804_v0 = vmul.f32 1.442695, %v1798_v43  ;;  %v1773_v41 = vsub.f32 %v3813_v2, %v1763_v36 }
 0xe3c   :  { %1842 = vrot.lane.b32.xlu0 %v4557_v35, %s3077_s18 }
 0xe3d   :  { %2987 = vpow2.f32 %v1804_v0  ;;  %v1778_v48 = vmul.f32 1.442695, %v1773_v41 }
 0xe3f   :  { %2989 = vpow2.f32 %v1778_v48 }
 0xe40   :  { %v1811_v39 = vpop.permute.xlu0 %1810 }
 0xe41   :  { %v4562_v5 = vpop.eup %2985  ;;  %v1821_v37 = vsub.f32 %v5129_v8, %v1811_v39 }
 0xe42   :  { %5149 = vst [vmem:[#allocation26_spill] sm:$0xff] %v4562_v5  ;;  %1882 = vrot.lane.b32.xlu2 %v4562_v5, %s3078_s1  ;;  %v1785_v31 = vpop.permute.xlu1 %1784 }
 0xe43   :  { %v4567_v60 = vpop.eup %2987  ;;  %v1826_v45 = vmul.f32 1.442695, %v1821_v37  ;;  %v1796_v2 = vsub.f32 %v3714_v32, %v1785_v31  ;;  %v1745_v37 = vsub.f32 %v5147_v38, %v4514_v50  ;;  %v1746_v50 = vsub.f32 %v5146_v23, %v4510_v19 }
 0xe44   :  { %5150 = vst [vmem:[#allocation15_spill] sm:$0xff] %v4567_v60  ;;  %1860 = vrot.lane.b32.xlu0 %v4567_v60, %s3075_s12 }
 0xe45   :  { %v4572_v55 = vpop.eup %2989  ;;  %2991 = vpow2.f32 %v1826_v45  ;;  %v1800_v52 = vmul.f32 1.442695, %v1796_v2  ;;  %v1750_v45 = vmul.f32 1.442695, %v1745_v37  ;;  %v1752_v5 = vmul.f32 1.442695, %v1746_v50 }
 0xe46   :  { %1838 = vrot.lane.b32.xlu1 %v4572_v55, %s3077_s18 }
 0xe47   :  { %2993 = vpow2.f32 %v1800_v52 }
 0xe4a   :  { %v1791_v8 = vpop.permute.xlu1 %1790 }
 0xe4b   :  { %v4576_v40 = vpop.eup %2991  ;;  %v1799_v26 = vsub.f32 %v5124_v4, %v1791_v8 }
 0xe4c   :  { %5151 = vst [vmem:[#allocation25_spill] sm:$0xff] %v4576_v40  ;;  %1878 = vrot.lane.b32.xlu0 %v4576_v40, %s3078_s1 }
 0xe4d   :  { %v4581_v32 = vpop.eup %2993  ;;  %v1806_v43 = vmul.f32 1.442695, %v1799_v26 }
 0xe4e   :  { %5152 = vst [vmem:[#allocation73_spill] sm:$0xff] %v4581_v32  ;;  %1856 = vrot.lane.b32.xlu1 %v4581_v32, %s3075_s12 }
 0xe4f   :  { %2995 = vpow2.f32 %v1806_v43 }
 0xe52   :  { %v1813_v36 = vpop.permute.xlu1 %1812 }
 0xe53   :  { %v1822_v0 = vsub.f32 %v5127_v7, %v1813_v36  ;;  %v1744_v7 = vsub.f32 %v5144_v57, %v4499_v27  ;;  %v1747_v36 = vsub.f32 %v5145_v18, %v4504_v58 }
 0xe55   :  { %v4586_v41 = vpop.eup %2995  ;;  %v1828_v48 = vmul.f32 1.442695, %v1822_v0  ;;  %v1748_v52 = vmul.f32 1.442695, %v1744_v7 }
 0xe56   :  { %1862 = vrot.lane.b32.xlu1 %v4586_v41, %s3075_s12 }
 0xe57   :  { %2997 = vpow2.f32 %v1828_v48 }
 0xe58   :  { %2999 = vpow2.f32 %v1750_v45 }
 0xe59   :  { %3001 = vpow2.f32 %v1748_v52 }
 0xe5d   :  { %v4590_v4 = vpop.eup %2997 }
 0xe5e   :  { %5153 = vst [vmem:[#allocation74_spill] sm:$0xff] %v4590_v4  ;;  %1880 = vrot.lane.b32.xlu1 %v4590_v4, %s3078_s1  ;;  %v3000_v43 = vpop.eup %2999  ;;  %v1754_v4 = vmul.f32 1.442695, %v1747_v36 }
 0xe5f   :  { %v4600_v38 = vpop.eup %3001 }
 0xe60   :  { %3003 = vpow2.f32 %v1754_v4 }
 0xe66   :  { %v4605_v58 = vpop.eup %3003 }
 0xe84   :  { %v1841_v31 = vpop.permute.xlu2 %1840 }
 0xe8c   :  { %v1859_v8 = vpop.permute.xlu2 %1858 }
 0xe94   :  { %v1877_v45 = vpop.permute.xlu2 %1876 }
 0xea6   :  { %v1837_v39 = vpop.permute.xlu0 %1836 }
 0xea7   :  { %v1848_v57 = vadd.f32 %v4600_v38, %v1837_v39 }
 0xeae   :  { %v1843_v2 = vpop.permute.xlu0 %1842 }
 0xeaf   :  { %v1851_v36 = vadd.f32 %v4605_v58, %v1843_v2 }
 0xeb6   :  { %v1861_v26 = vpop.permute.xlu0 %1860 }
 0xeb8   :  { %v1839_v0 = vpop.permute.xlu1 %1838 }
 0xeb9   :  { %v1849_v48 = vadd.f32 %v3000_v43, %v1839_v0 }
 0xebb   :  { %v1869_v40 = vadd.f32 %v1859_v8, %v1849_v48  ;;  %v1883_v48 = vpop.permute.xlu2 %1882 }
 0xebe   :  { %v1879_v37 = vpop.permute.xlu0 %1878 }
 0xebf   :  { %v1889_v27 = vadd.f32 %v1879_v37, %v1869_v40 }
 0xec0   :  { %v1857_v7 = vpop.permute.xlu1 %1856 }
 0xec1   :  { %3005 = vrcp.f32 %v1889_v27  ;;  %v1868_v52 = vadd.f32 %v1857_v7, %v1848_v57  ;;  %v1915_v4 = vand.u32 2147483647, %v1889_v27  ;;  %v1917_v46 = vand.u32 2147483648, %v1889_v27 }
 0xec2   :  { %vm1911_vm11 = vweird.f32 %v1889_v27 }
 0xec3   :  { %v1888_v18 = vadd.f32 %v1877_v45, %v1868_v52  ;;  %vm1916_vm13 = vcmp.eq.f32.partialorder %v1915_v4, 8.507059e+37  ;;  %v1918_v52 = vor.u32 1.1754944e-38, %v1917_v46 }
 0xec5   :  { %3007 = vrcp.f32 %v1888_v18  ;;  %vm1897_vm15 = vweird.f32 %v1888_v18 }
 0xec6   :  { %3009 = vpow2.f32 %v1752_v5 }
 0xec7   :  { %v3006_v8 = vpop.eup %3005 }
 0xec8   :  { %v1907_v0 = vmul.f32 %v3006_v8, %v1889_v27  ;;  %v1863_v23 = vpop.permute.xlu1 %1862  ;;  %vm1912_vm10 = vweird.f32 %v3006_v8 }
 0xec9   :  { %v1871_v19 = vadd.f32 %v1863_v23, %v1851_v36  ;;  %vm1913_vm12 = vmor %vm1911_vm11, %vm1912_vm10  ;;  %v1903_v36 = vand.u32 2147483648, %v1888_v18 }
 0xeca   :  { %v1908_v39 = vsub.f32 1.0, %v1907_v0  ;;  %v3081_v0 = vmov 0  }
 0xecb   :  { %v3008_v40 = vpop.eup %3007  ;;  %v1891_v37 = vadd.f32 %v1883_v48, %v1871_v19  ;;  %2807 = vset.pattern.permute.xlu1 %v3081_v0  ;;  %2806 = vset.pattern.permute.xlu0 %v3081_v0  ;;  %v1904_v46 = vor.u32 1.1754944e-38, %v1903_v36 }
 0xecc   :  { %v4608_v60 = vpop.eup %3009  ;;  %v1909_v50 = vmul.f32 %v3006_v8, %v1908_v39  ;;  %v1893_v57 = vmul.f32 %v3008_v40, %v1888_v18  ;;  %vm1898_vm14 = vweird.f32 %v3008_v40  ;;  %v1901_v39 = vand.u32 2147483647, %v1888_v18  ;;  %2808 = vset.pattern.permute.xlu2 %v3081_v0 }
 0xecd   :  { %v1850_v45 = vadd.f32 %v4608_v60, %v1841_v31  ;;  %3011 = vrcp.f32 %v1891_v37  ;;  %vm1899_vm0 = vmor %vm1897_vm15, %vm1898_vm14  ;;  %v1943_v18 = vand.u32 2147483647, %v1891_v37  ;;  %vm1939_vm5 = vweird.f32 %v1891_v37 }
 0xece   :  { %v1910_v5 = vadd.f32 %v3006_v8, %v1909_v50  ;;  %v1894_v2 = vsub.f32 1.0, %v1893_v57  ;;  %vm1902_vm3 = vcmp.eq.f32.partialorder %v1901_v39, 8.507059e+37  ;;  %vm2709_vm14 = vcmask 257024  }
 0xecf   :  { %v1870_v7 = vadd.f32 %v1861_v26, %v1850_v45  ;;  %vm1944_vm7 = vcmp.eq.f32.partialorder %v1943_v18, 8.507059e+37 }
 0xed0   :  { %v1881_v23 = vpop.permute.xlu1 %1880  ;;  %v1914_v19 = vsel %vm1913_vm12, %v3006_v8, %v1910_v5  ;;  %v1895_v48 = vmul.f32 %v3008_v40, %v1894_v2  ;;  %v1945_v2 = vand.u32 2147483648, %v1891_v37  ;;  %vm2700_vm12 = vcmask 195584  }
 0xed1   :  { %v1890_v32 = vadd.f32 %v1881_v23, %v1870_v7  ;;  %v1919_v31 = vsel %vm1916_vm13, %v1918_v52, %v1914_v19  ;;  %vm2705_vm13 = vcmask 261120  }
 0xed2   :  { %1958 = vrot.lane.b32.xlu1 %v1919_v31, %s3079_s30  ;;  %v1896_v27 = vadd.f32 %v3008_v40, %v1895_v48  ;;  %v4612_v26 = vmul.f32 %v3000_v43, %v1919_v31 }
 0xed3   :  { %v3012_v4 = vpop.eup %3011  ;;  %3013 = vrcp.f32 %v1890_v32  ;;  %v1931_v48 = vand.u32 2147483648, %v1890_v32  ;;  %v1929_v39 = vand.u32 2147483647, %v1890_v32  ;;  %vm1925_vm9 = vweird.f32 %v1890_v32 }
 0xed4   :  { %v1900_v50 = vsel %vm1899_vm0, %v3008_v40, %v1896_v27  ;;  %v1935_v57 = vmul.f32 %v3012_v4, %v1891_v37  ;;  %vm1940_vm4 = vweird.f32 %v3012_v4  ;;  %v1946_v40 = vor.u32 1.1754944e-38, %v1945_v2 }
 0xed5   :  { %v1905_v8 = vsel %vm1902_vm3, %v1904_v46, %v1900_v50  ;;  %vm1941_vm6 = vmor %vm1939_vm5, %vm1940_vm4  ;;  %v1932_v50 = vor.u32 1.1754944e-38, %v1931_v48  ;;  %vm1930_vm11 = vcmp.eq.f32.partialorder %v1929_v39, 8.507059e+37 }
 0xed6   :  { %1956 = vrot.lane.b32.xlu0 %v1905_v8, %s3079_s30  ;;  %v1936_v45 = vsub.f32 1.0, %v1935_v57  ;;  %v4616_v5 = vmul.f32 %v4600_v38, %v1905_v8  ;;  %v1310_v57 = vmul.f32 %v4241_v11, %v4256_v9 }
 0xed8   :  { %v1937_v7 = vmul.f32 %v3012_v4, %v1936_v45 }
 0xed9   :  { %v3014_v43 = vpop.eup %3013 }
 0xeda   :  { %v1921_v52 = vmul.f32 %v3014_v43, %v1890_v32  ;;  %1972 = vrot.lane.b32.xlu1 %v1905_v8, %s3069_s24  ;;  %v1938_v0 = vadd.f32 %v3012_v4, %v1937_v7  ;;  %vm1926_vm8 = vweird.f32 %v3014_v43  ;;  %v988_v32 = vmul.f32 %v4048_v13, %v4062_v12 }
 0xedb   :  { %vm1927_vm10 = vmor %vm1925_vm9, %vm1926_vm8 }
 0xedc   :  { %v1942_v36 = vsel %vm1941_vm6, %v3012_v4, %v1938_v0  ;;  %v1922_v23 = vsub.f32 1.0, %v1921_v52 }
 0xedd   :  { %v1947_v19 = vsel %vm1944_vm7, %v1946_v40, %v1942_v36 }
 0xede   :  { %1962 = vrot.lane.b32.xlu0 %v1947_v19, %s3079_s30  ;;  %v1923_v38 = vmul.f32 %v3014_v43, %v1922_v23  ;;  %v4621_v27 = vmul.f32 %v4605_v58, %v1947_v19  ;;  %v3082_v58 = vmov 1   ;;  %v5155_v23 = vld [vmem:[#allocation11_spill] sm:$0xff] }
 0xee0   :  { %v1924_v46 = vadd.f32 %v3014_v43, %v1923_v38  ;;  %v5156_v38 = vld [vmem:[#allocation9_spill] sm:$0xff] }
 0xee2   :  { %1978 = vrot.lane.b32.xlu1 %v1947_v19, %s3069_s24  ;;  %v1928_v37 = vsel %vm1927_vm10, %v3014_v43, %v1924_v46  ;;  %v5154_v43 = vld [vmem:[#allocation8_spill] sm:$0xff] }
 0xee3   :  { %v4624_v4 = vsel %vm1930_vm11, %v1932_v50, %v1928_v37  ;;  %v5157_v50 = vld [vmem:[#allocation10_spill] sm:$0xff] }
 0xee4   :  { %1960 = vrot.lane.b32.xlu2 %v4624_v4, %s3079_s30 }
 0xee6   :  { %1976 = vrot.lane.b32.xlu0 %v4624_v4, %s3069_s24 }
 0xeea   :  { %1992 = vrot.lane.b32.xlu1 %v4624_v4, %s3080_s5 }
 0xeec   :  { %1974 = vrot.lane.b32.xlu2 %v1919_v31, %s3069_s24 }
 0xeee   :  { %1990 = vrot.lane.b32.xlu0 %v1919_v31, %s3080_s5 }
 0xef2   :  { %2011 = vperm.xlu1 %2807, %v4060_v10   ;;  %v990_v10 = vmul.f32 %v4056_v28, %v4073_v24 }
 0xef4   :  { %1988 = vrot.lane.b32.xlu2 %v1905_v8, %s3080_s5 }
 0xef6   :  { %2006 = vperm.xlu0 %2806, %v988_v32   ;;  %v1630_v32 = vmul.f32 %v4423_v56, %v4438_v14 }
 0xefa   :  { %2021 = vperm.xlu1 %2807, %v4070_v53  }
 0xefc   :  { %1994 = vrot.lane.b32.xlu2 %v1947_v19, %s3080_s5 }
 0xefe   :  { %2810 = vset.pattern.permute.xlu0 %v3082_v58 }
 0xeff   :  { %2035 = vperm.xlu0 %2810, %v4245_v3  }
 0xf02   :  { %2811 = vset.pattern.permute.xlu1 %v3082_v58 }
 0xf03   :  { %2040 = vperm.xlu1 %2811, %v1310_v57  }
 0xf04   :  { %2016 = vperm.xlu2 %2808, %v990_v10  }
 0xf0c   :  { %2809 = vset.pattern.permute.xlu2 %v3082_v58  ;;  %v3084_v58 = vmov 3  }
 0xf0d   :  { %2030 = vperm.xlu2 %2809, %v4248_v47  }
 0xf15   :  { %2045 = vperm.xlu2 %2809, %v4253_v22   ;;  %v3083_v22 = vmov 2  }
 0xf16   :  { %2814 = vset.pattern.permute.xlu1 %v3083_v22  ;;  %2813 = vset.pattern.permute.xlu0 %v3083_v22 }
 0xf1d   :  { %2812 = vset.pattern.permute.xlu2 %v3083_v22 }
 0xf3e   :  { %v4647_v13 = vpop.permute.xlu2 %1960 }
 0xf44   :  { %v4649_v12 = vpop.permute.xlu1 %1958 }
 0xf46   :  { %v4651_v53 = vpop.permute.xlu2 %1974 }
 0xf48   :  { %v4653_v3 = vpop.permute.xlu0 %1956 }
 0xf4c   :  { %v4655_v11 = vpop.permute.xlu1 %1972 }
 0xf4e   :  { %v4657_v9 = vpop.permute.xlu2 %1988 }
 0xf50   :  { %v4659_v28 = vpop.permute.xlu0 %1962 }
 0xf54   :  { %v4661_v24 = vpop.permute.xlu1 %1978 }
 0xf56   :  { %v4663_v31 = vpop.permute.xlu2 %1994 }
 0xf58   :  { %v4665_v47 = vpop.permute.xlu0 %1976 }
 0xf5c   :  { %v4667_v8 = vpop.permute.xlu1 %1992 }
 0xf5e   :  { %v2017_v45 = vpop.permute.xlu2 %2016 }
 0xf60   :  { %v4669_v2 = vpop.permute.xlu0 %1990 }
 0xf64   :  { %v2012_v7 = vpop.permute.xlu1 %2011 }
 0xf65   :  { %v2025_v57 = vmul.f32 %v2012_v7, %v5156_v38 }
 0xf67   :  { %v2031_v18 = vpop.permute.xlu2 %2030 }
 0xf68   :  { %v2048_v52 = vmul.f32 %v2031_v18, %v5154_v43  ;;  %v2007_v0 = vpop.permute.xlu0 %2006 }
 0xf69   :  { %v2024_v56 = vmul.f32 %v2007_v0, %v5154_v43 }
 0xf6a   :  { %2056 = vrot.lane.b32.xlu1 %v2048_v52, %s3075_s12 }
 0xf6c   :  { %v2022_v40 = vpop.permute.xlu1 %2021 }
 0xf6f   :  { %v2046_v36 = vpop.permute.xlu2 %2045 }
 0xf70   :  { %v2051_v19 = vmul.f32 %v2046_v36, %v5155_v23  ;;  %v2027_v36 = vmul.f32 %v2022_v40, %v5155_v23 }
 0xf71   :  { %v2036_v48 = vpop.permute.xlu0 %2035 }
 0xf72   :  { %v2049_v39 = vmul.f32 %v2036_v48, %v5156_v38  ;;  %2062 = vrot.lane.b32.xlu1 %v2051_v19, %s3075_s12  ;;  %v1950_v48 = vmul.f32 %v4608_v60, %v4624_v4  ;;  %v3085_v60 = vmov 4  }
 0xf74   :  { %2058 = vrot.lane.b32.xlu2 %v2049_v39, %s3075_s12  ;;  %v2026_v39 = vmul.f32 %v2017_v45, %v5157_v50 }
 0xf75   :  { %v2041_v46 = vpop.permute.xlu1 %2040 }
 0xf76   :  { %v2050_v37 = vmul.f32 %v2041_v46, %v5157_v50 }
 0xf78   :  { %2060 = vrot.lane.b32.xlu0 %v2050_v37, %s3075_s12 }
 0xf7a   :  { %2084 = vperm.xlu1 %2814, %v1630_v32  }
 0xf7c   :  { %2074 = vperm.xlu2 %2812, %v4430_v62  }
 0xf80   :  { %2079 = vperm.xlu0 %2813, %v4427_v34  }
 0xf82   :  { %2817 = vset.pattern.permute.xlu1 %v3084_v58 }
 0xf84   :  { %2089 = vperm.xlu2 %2812, %v4435_v54  }
 0xf88   :  { %2816 = vset.pattern.permute.xlu0 %v3084_v58 }
 0xf8c   :  { %2815 = vset.pattern.permute.xlu2 %v3084_v58 }
 0xfce   :  { %v2059_v10 = vpop.permute.xlu2 %2058 }
 0xfcf   :  { %v2069_v22 = vadd.f32 %v2059_v10, %v2025_v57 }
 0xfd6   :  { %v2075_v18 = vpop.permute.xlu2 %2074 }
 0xfd7   :  { %v2092_v52 = vmul.f32 %v2075_v18, %v5154_v43 }
 0xfd9   :  { %2100 = vrot.lane.b32.xlu1 %v2092_v52, %s3076_s15 }
 0xfdc   :  { %v2057_v62 = vpop.permute.xlu1 %2056 }
 0xfdd   :  { %v2068_v14 = vadd.f32 %v2057_v62, %v2024_v56 }
 0xfde   :  { %v2090_v34 = vpop.permute.xlu2 %2089 }
 0xfdf   :  { %v2095_v54 = vmul.f32 %v2090_v34, %v5155_v23 }
 0xfe1   :  { %2106 = vrot.lane.b32.xlu1 %v2095_v54, %s3076_s15 }
 0xfe4   :  { %v2063_v19 = vpop.permute.xlu1 %2062 }
 0xfe5   :  { %v2071_v7 = vadd.f32 %v2063_v19, %v2027_v36 }
 0xfe9   :  { %2128 = vperm.xlu1 %2817, %v1950_v48   ;;  %v1330_v48 = vmul.f32 %v4172_v6, %v4292_v30  ;;  %v1329_v6 = vmul.f32 %v4208_v20, %v4294_v29 }
 0xfea   :  { %v2061_v46 = vpop.permute.xlu0 %2060 }
 0xfeb   :  { %v2070_v37 = vadd.f32 %v2061_v46, %v2026_v39  ;;  %v3086_v39 = vmov 5   ;;  %v1328_v46 = vmul.f32 %v4183_v42, %v4298_v61 }
 0xfec   :  { %v2085_v0 = vpop.permute.xlu1 %2084 }
 0xfed   :  { %v2094_v32 = vmul.f32 %v2085_v0, %v5157_v50 }
 0xfef   :  { %2104 = vrot.lane.b32.xlu0 %v2094_v32, %s3076_s15 }
 0xff1   :  { %2820 = vset.pattern.permute.xlu1 %v3085_v60 }
 0xff2   :  { %v2080_v58 = vpop.permute.xlu0 %2079 }
 0xff3   :  { %v2093_v57 = vmul.f32 %v2080_v58, %v5156_v38 }
 0xff5   :  { %2102 = vrot.lane.b32.xlu2 %v2093_v57, %s3076_s15 }
 0xff7   :  { %2123 = vperm.xlu0 %2816, %v4612_v26  }
 0xffd   :  { %2118 = vperm.xlu2 %2815, %v4616_v5  }
 0xfff   :  { %2819 = vset.pattern.permute.xlu0 %v3085_v60 }
0x1005   :  { %2133 = vperm.xlu2 %2815, %v4621_v27  }
0x100d   :  { %2818 = vset.pattern.permute.xlu2 %v3085_v60 }
0x104b   :  { %v2101_v4 = vpop.permute.xlu1 %2100 }
0x104c   :  { %v2112_v45 = vadd.f32 %v2101_v4, %v2068_v14  ;;  %v1010_v14 = vmul.f32 %v3989_v33, %v4110_v17  ;;  %v1331_v33 = vmul.f32 %v4193_v59, %v4304_v21  ;;  %v5158_v17 = vld [vmem:[#allocation30_spill] sm:$0xff] }
0x104f   :  { %v2103_v40 = vpop.permute.xlu2 %2102 }
0x1050   :  { %v2113_v10 = vadd.f32 %v2103_v40, %v2069_v22  ;;  %v1009_v22 = vmul.f32 %v4020_v44, %v4112_v63  ;;  %v1008_v44 = vmul.f32 %v3983_v49, %v4116_v15  ;;  %v1011_v63 = vmul.f32 %v5158_v17, %v4122_v25  ;;  %v5160_v40 = vld [vmem:[#allocation59_spill] sm:$0xff] }
0x1051   :  { %v3087_v49 = vmov 6  }
0x1053   :  { %v2107_v18 = vpop.permute.xlu1 %2106 }
0x1054   :  { %v2115_v52 = vadd.f32 %v2107_v18, %v2071_v7 }
0x1057   :  { %v2119_v56 = vpop.permute.xlu2 %2118 }
0x1058   :  { %v2136_v62 = vmul.f32 %v2119_v56, %v5154_v43 }
0x105a   :  { %2144 = vrot.lane.b32.xlu1 %v2136_v62, %s3074_s2 }
0x105b   :  { %v2129_v26 = vpop.permute.xlu1 %2128 }
0x105c   :  { %v2138_v5 = vmul.f32 %v2129_v26, %v5157_v50  ;;  %v5161_v26 = vld [vmem:[#allocation24_spill] sm:$0xff] }
0x105e   :  { %2148 = vrot.lane.b32.xlu0 %v2138_v5, %s3074_s2  ;;  %v5162_v5 = vld [vmem:[#allocation61_spill] sm:$0xff] }
0x105f   :  { %v2134_v27 = vpop.permute.xlu2 %2133 }
0x1060   :  { %v2139_v34 = vmul.f32 %v2134_v27, %v5155_v23  ;;  %v1651_v27 = vmul.f32 %v5162_v5, %v5161_v26  ;;  %v5168_v5 = vld [vmem:[#allocation34_spill] sm:$0xff] }
0x1061   :  { %v2105_v54 = vpop.permute.xlu0 %2104 }
0x1062   :  { %v2114_v36 = vadd.f32 %v2105_v54, %v2070_v37  ;;  %2150 = vrot.lane.b32.xlu1 %v2139_v34, %s3074_s2  ;;  %v5163_v34 = vld [vmem:[#allocation20_spill] sm:$0xff]  ;;  %v5164_v54 = vld [vmem:[#allocation14_spill] sm:$0xff] }
0x1066   :  { %2167 = vperm.xlu0 %2819, %v1009_v22   ;;  %v5165_v22 = vld [vmem:[#allocation18_spill] sm:$0xff] }
0x1069   :  { %v2124_v19 = vpop.permute.xlu0 %2123 }
0x106a   :  { %v2137_v7 = vmul.f32 %v2124_v19, %v5156_v38  ;;  %2172 = vperm.xlu1 %2820, %v1010_v14   ;;  %v5166_v14 = vld [vmem:[#allocation64_spill] sm:$0xff] }
0x106b   :  { %v1649_v19 = vmul.f32 %v5166_v14, %v5165_v22  ;;  %v5169_v22 = vld [vmem:[#allocation39_spill] sm:$0xff] }
0x106c   :  { %2146 = vrot.lane.b32.xlu2 %v2137_v7, %s3074_s2  ;;  %v3088_v7 = vmov 7   ;;  %v5170_v14 = vld [vmem:[#allocation35_spill] sm:$0xff] }
0x106e   :  { %2823 = vset.pattern.permute.xlu0 %v3086_v39 }
0x106f   :  { %2196 = vperm.xlu0 %2823, %v1330_v48  }
0x1072   :  { %2821 = vset.pattern.permute.xlu1 %v3086_v39 }
0x1073   :  { %2186 = vperm.xlu1 %2821, %v1328_v46  }
0x1074   :  { %2162 = vperm.xlu2 %2818, %v1008_v44  }
0x1077   :  { %2826 = vset.pattern.permute.xlu0 %v3087_v49 }
0x107b   :  { %2201 = vperm.xlu1 %2821, %v1331_v33  }
0x107c   :  { %2177 = vperm.xlu2 %2818, %v1011_v63  }
0x1083   :  { %2824 = vset.pattern.permute.xlu1 %v3087_v49 }
0x1084   :  { %2822 = vset.pattern.permute.xlu2 %v3086_v39 }
0x1085   :  { %2191 = vperm.xlu2 %2822, %v1329_v6  }
0x108d   :  { %2825 = vset.pattern.permute.xlu2 %v3087_v49 }
0x10c6   :  { %v2147_v42 = vpop.permute.xlu2 %2146 }
0x10c7   :  { %v4725_v30 = vadd.f32 %v2147_v42, %v2113_v10 }
0x10cc   :  { %v2145_v15 = vpop.permute.xlu1 %2144 }
0x10cd   :  { %v4727_v61 = vadd.f32 %v2145_v15, %v2112_v45  ;;  %v5159_v45 = vld [vmem:[#allocation28_spill] sm:$0xff] }
0x10ce   :  { %v2163_v59 = vpop.permute.xlu2 %2162  ;;  %v1648_v10 = vmul.f32 %v5160_v40, %v5159_v45  ;;  %v1970_v45 = vmul.f32 %v4536_v51, %v4647_v13 }
0x10cf   :  { %v2180_v48 = vmul.f32 %v2163_v59, %v5154_v43 }
0x10d0   :  { %v2149_v21 = vpop.permute.xlu0 %2148 }
0x10d1   :  { %v4729_v25 = vadd.f32 %v2149_v21, %v2114_v36  ;;  %v1650_v36 = vmul.f32 %v5164_v54, %v5163_v34  ;;  %v1968_v21 = vmul.f32 %v4547_v16, %v4653_v3 }
0x10d4   :  { %v2151_v37 = vpop.permute.xlu1 %2150 }
0x10d5   :  { %v4731_v0 = vadd.f32 %v2151_v37, %v2115_v52 }
0x10d6   :  { %v2178_v20 = vpop.permute.xlu2 %2177 }
0x10d8   :  { %v2168_v57 = vpop.permute.xlu0 %2167 }
0x10d9   :  { %v2181_v6 = vmul.f32 %v2168_v57, %v5156_v38 }
0x10dc   :  { %v2173_v29 = vpop.permute.xlu1 %2172 }
0x10dd   :  { %v2182_v44 = vmul.f32 %v2173_v29, %v5157_v50  ;;  %v2183_v29 = vmul.f32 %v2178_v20, %v5155_v23  ;;  %v1969_v20 = vmul.f32 %v4572_v55, %v4649_v12  ;;  %v5167_v12 = vld [vmem:[#allocation37_spill] sm:$0xff] }
0x10df   :  { %v2192_v32 = vpop.permute.xlu2 %2191 }
0x10e0   :  { %v2205_v58 = vmul.f32 %v2192_v32, %v5156_v38 }
0x10e1   :  { %v2197_v18 = vpop.permute.xlu0 %2196 }
0x10e2   :  { %2214 = vrot.lane.b32.xlu1 %v2205_v58, %s3075_s12  ;;  %v2206_v56 = vmul.f32 %v2197_v18, %v5157_v50  ;;  %v1971_v58 = vmul.f32 %v4557_v35, %v4659_v28  ;;  %v3089_v28 = vmov 8  }
0x10e5   :  { %v2187_v60 = vpop.permute.xlu1 %2186 }
0x10e6   :  { %v2204_v4 = vmul.f32 %v2187_v60, %v5154_v43 }
0x10e8   :  { %2212 = vrot.lane.b32.xlu2 %v2204_v4, %s3075_s12 }
0x10ea   :  { %2230 = vperm.xlu1 %2824, %v1648_v10  }
0x10ed   :  { %v2202_v52 = vpop.permute.xlu1 %2201 }
0x10ee   :  { %v2207_v62 = vmul.f32 %v2202_v52, %v5155_v23 }
0x10f0   :  { %2218 = vrot.lane.b32.xlu0 %v2207_v62, %s3075_s12  ;;  %2216 = vrot.lane.b32.xlu2 %v2206_v56, %s3075_s12 }
0x10f2   :  { %2245 = vperm.xlu1 %2824, %v1651_v27   ;;  %v1024_v27 = vmul.f32 %v5168_v5, %v5167_v12 }
0x10f8   :  { %2240 = vperm.xlu0 %2826, %v1650_v36   ;;  %2235 = vperm.xlu2 %2825, %v1649_v19   ;;  %v1027_v19 = vmul.f32 %v5170_v14, %v5169_v22  ;;  %v5185_v14 = vld [vmem:[#allocation22_spill] sm:$0xff] }
0x10fa   :  { %2827 = vset.pattern.permute.xlu1 %v3088_v7 }
0x1100   :  { %2829 = vset.pattern.permute.xlu0 %v3088_v7  ;;  %2828 = vset.pattern.permute.xlu2 %v3088_v7  ;;  %v5171_v7 = vld [vmem:[#allocation41_spill] sm:$0xff] }
0x1142   :  { %v2213_v39 = vpop.permute.xlu2 %2212 }
0x1143   :  { %v2224_v46 = vadd.f32 %v2213_v39, %v2180_v48  ;;  %v5172_v48 = vld [vmem:[#allocation32_spill] sm:$0xff] }
0x1144   :  { %v1026_v39 = vmul.f32 %v5172_v48, %v5171_v7 }
0x114a   :  { %v2217_v33 = vpop.permute.xlu2 %2216 }
0x114b   :  { %v2226_v17 = vadd.f32 %v2217_v33, %v2182_v44  ;;  %v5173_v33 = vld [vmem:[#allocation17_spill] sm:$0xff] }
0x1152   :  { %v2236_v63 = vpop.permute.xlu2 %2235 }
0x1153   :  { %v2249_v42 = vmul.f32 %v2236_v63, %v5156_v38 }
0x1154   :  { %v2215_v49 = vpop.permute.xlu1 %2214 }
0x1155   :  { %v2225_v15 = vadd.f32 %v2215_v49, %v2181_v6  ;;  %2258 = vrot.lane.b32.xlu1 %v2249_v42, %s3076_s15  ;;  %v5175_v6 = vld [vmem:[#allocation53_spill] sm:$0xff] }
0x1156   :  { %v5176_v42 = vld [vmem:[#allocation49_spill] sm:$0xff] }
0x1157   :  { %v1347_v49 = vmul.f32 %v5176_v42, %v5175_v6 }
0x115c   :  { %v2231_v37 = vpop.permute.xlu1 %2230 }
0x115d   :  { %v2248_v59 = vmul.f32 %v2231_v37, %v5154_v43  ;;  %2274 = vperm.xlu1 %2827, %v1968_v21   ;;  %v5178_v21 = vld [vmem:[#allocation12_spill] sm:$0xff] }
0x115f   :  { %2256 = vrot.lane.b32.xlu2 %v2248_v59, %s3076_s15  ;;  %v3090_v59 = vmov 9  }
0x1162   :  { %v2219_v32 = vpop.permute.xlu0 %2218 }
0x1163   :  { %v2227_v57 = vadd.f32 %v2219_v32, %v2183_v29  ;;  %v5179_v29 = vld [vmem:[#allocation19_spill] sm:$0xff]  ;;  %v5180_v32 = vld [vmem:[#allocation66_spill] sm:$0xff] }
0x1164   :  { %v2246_v60 = vpop.permute.xlu1 %2245 }
0x1165   :  { %v2251_v4 = vmul.f32 %v2246_v60, %v5155_v23  ;;  %2289 = vperm.xlu1 %2827, %v1971_v58   ;;  %v1664_v58 = vmul.f32 %v5180_v32, %v5179_v29  ;;  %v5182_v60 = vld [vmem:[#allocation48_spill] sm:$0xff] }
0x1167   :  { %2262 = vrot.lane.b32.xlu0 %v2251_v4, %s3076_s15 }
0x116a   :  { %v2241_v16 = vpop.permute.xlu0 %2240 }
0x116b   :  { %v2250_v3 = vmul.f32 %v2241_v16, %v5157_v50  ;;  %v3091_v16 = vmov 10  }
0x116d   :  { %2260 = vrot.lane.b32.xlu2 %v2250_v3, %s3076_s15  ;;  %2830 = vset.pattern.permute.xlu1 %v3089_v28  ;;  %v5183_v3 = vld [vmem:[#allocation55_spill] sm:$0xff] }
0x116f   :  { %2284 = vperm.xlu0 %2829, %v1970_v45   ;;  %v5184_v45 = vld [vmem:[#allocation46_spill] sm:$0xff] }
0x1175   :  { %2279 = vperm.xlu2 %2828, %v1969_v20   ;;  %v1346_v20 = vmul.f32 %v5184_v45, %v5183_v3 }
0x1177   :  { %2832 = vset.pattern.permute.xlu0 %v3089_v28 }
0x117d   :  { %2831 = vset.pattern.permute.xlu2 %v3089_v28 }
0x11b9   :  { %v2257_v35 = vpop.permute.xlu2 %2256 }
0x11ba   :  { %v2268_v40 = vadd.f32 %v2257_v35, %v2224_v46 }
0x11c7   :  { %v2259_v10 = vpop.permute.xlu1 %2258  ;;  %v2261_v18 = vpop.permute.xlu2 %2260 }
0x11c8   :  { %v2269_v52 = vadd.f32 %v2259_v10, %v2225_v15  ;;  %v2270_v56 = vadd.f32 %v2261_v18, %v2226_v17  ;;  %v5174_v17 = vld [vmem:[#allocation13_spill] sm:$0xff]  ;;  %v5177_v15 = vld [vmem:[#allocation16_spill] sm:$0xff] }
0x11c9   :  { %v1345_v63 = vmul.f32 %v5174_v17, %v5173_v33  ;;  %v1025_v37 = vmul.f32 %v5178_v21, %v5177_v15  ;;  %v5189_v33 = vld [vmem:[#allocation70_spill] sm:$0xff]  ;;  %v5190_v17 = vld [vmem:[#allocation63_spill] sm:$0xff] }
0x11cf   :  { %v2275_v62 = vpop.permute.xlu1 %2274  ;;  %v2280_v26 = vpop.permute.xlu2 %2279 }
0x11d0   :  { %v2292_v51 = vmul.f32 %v2275_v62, %v5154_v43  ;;  %v2293_v13 = vmul.f32 %v2280_v26, %v5156_v38 }
0x11d2   :  { %2300 = vrot.lane.b32.xlu2 %v2292_v51, %s3074_s2  ;;  %2302 = vrot.lane.b32.xlu1 %v2293_v13, %s3074_s2 }
0x11d7   :  { %v2290_v55 = vpop.permute.xlu1 %2289 }
0x11d8   :  { %v2295_v34 = vmul.f32 %v2290_v55, %v5155_v23 }
0x11d9   :  { %v2263_v54 = vpop.permute.xlu0 %2262 }
0x11da   :  { %v2271_v36 = vadd.f32 %v2263_v54, %v2227_v57  ;;  %2306 = vrot.lane.b32.xlu0 %v2295_v34, %s3074_s2  ;;  %2318 = vperm.xlu1 %2830, %v1024_v27   ;;  %v5181_v57 = vld [vmem:[#allocation51_spill] sm:$0xff] }
0x11db   :  { %v1344_v4 = vmul.f32 %v5182_v60, %v5181_v57 }
0x11e1   :  { %v2285_v46 = vpop.permute.xlu0 %2284 }
0x11e2   :  { %v2294_v44 = vmul.f32 %v2285_v46, %v5157_v50  ;;  %2328 = vperm.xlu0 %2832, %v1026_v39   ;;  %2333 = vperm.xlu1 %2830, %v1027_v19   ;;  %v5186_v19 = vld [vmem:[#allocation58_spill] sm:$0xff]  ;;  %v5187_v39 = vld [vmem:[#allocation27_spill] sm:$0xff] }
0x11e3   :  { %v1665_v7 = vmul.f32 %v5186_v19, %v5185_v14  ;;  %v5188_v46 = vld [vmem:[#allocation67_spill] sm:$0xff] }
0x11e4   :  { %2304 = vrot.lane.b32.xlu2 %v2294_v44, %s3074_s2  ;;  %v1667_v44 = vmul.f32 %v5188_v46, %v5187_v39  ;;  %v5195_v39 = vld [vmem:[#allocation38_spill] sm:$0xff]  ;;  %v5196_v46 = vld [vmem:[#allocation29_spill] sm:$0xff] }
0x11ea   :  { %2835 = vset.pattern.permute.xlu0 %v3090_v59  ;;  %2834 = vset.pattern.permute.xlu1 %v3090_v59 }
0x11eb   :  { %2357 = vperm.xlu0 %2835, %v1347_v49   ;;  %2347 = vperm.xlu1 %2834, %v1345_v63   ;;  %v1666_v63 = vmul.f32 %v5190_v17, %v5189_v33  ;;  %v3092_v49 = vmov 11   ;;  %v5197_v17 = vld [vmem:[#allocation40_spill] sm:$0xff] }
0x11ec   :  { %2323 = vperm.xlu2 %2831, %v1025_v37  }
0x11f3   :  { %2836 = vset.pattern.permute.xlu0 %v3091_v16  ;;  %2837 = vset.pattern.permute.xlu1 %v3091_v16 }
0x11f4   :  { %2386 = vperm.xlu0 %2836, %v1664_v58   ;;  %2833 = vset.pattern.permute.xlu2 %v3090_v59 }
0x11f5   :  { %2342 = vperm.xlu2 %2833, %v1344_v4  }
0x11fc   :  { %2839 = vset.pattern.permute.xlu0 %v3092_v49 }
0x11fd   :  { %2352 = vperm.xlu2 %2833, %v1346_v20  }
0x1205   :  { %2838 = vset.pattern.permute.xlu2 %v3091_v16 }
0x122c   :  { %v2301_v35 = vpop.permute.xlu2 %2300 }
0x122d   :  { %v4795_v28 = vadd.f32 %v2301_v35, %v2268_v40  ;;  %v1985_v35 = vmul.f32 %v4542_v1, %v4651_v53  ;;  %v5192_v1 = vld [vmem:[#allocation15_spill] sm:$0xff] }
0x122e   :  { %v1986_v53 = vmul.f32 %v5192_v1, %v4665_v47  ;;  %v5193_v47 = vld [vmem:[#allocation43_spill] sm:$0xff] }
0x123e   :  { %v2305_v10 = vpop.permute.xlu2 %2304 }
0x123f   :  { %v4797_v18 = vadd.f32 %v2305_v10, %v2270_v56 }
0x1244   :  { %v2303_v62 = vpop.permute.xlu1 %2302 }
0x1245   :  { %v4799_v26 = vadd.f32 %v2303_v62, %v2269_v52 }
0x1246   :  { %v2324_v51 = vpop.permute.xlu2 %2323 }
0x1247   :  { %v2337_v15 = vmul.f32 %v2324_v51, %v5156_v38  ;;  %v1987_v51 = vmul.f32 %v4586_v41, %v4661_v24 }
0x124c   :  { %v2319_v13 = vpop.permute.xlu1 %2318  ;;  %v2307_v55 = vpop.permute.xlu0 %2306 }
0x124d   :  { %v4801_v12 = vadd.f32 %v2307_v55, %v2271_v36  ;;  %v2336_v32 = vmul.f32 %v2319_v13, %v5154_v43  ;;  %v5191_v55 = vld [vmem:[#allocation73_spill] sm:$0xff] }
0x124f   :  { %v2343_v5 = vpop.permute.xlu2 %2342 }
0x1250   :  { %v2360_v27 = vmul.f32 %v2343_v5, %v5154_v43  ;;  %v1984_v5 = vmul.f32 %v5191_v55, %v4655_v11 }
0x1252   :  { %2368 = vrot.lane.b32.xlu1 %v2360_v27, %s3075_s12 }
0x1254   :  { %v2334_v34 = vpop.permute.xlu1 %2333  ;;  %v2329_v22 = vpop.permute.xlu0 %2328 }
0x1255   :  { %v2339_v59 = vmul.f32 %v2334_v34, %v5155_v23  ;;  %v2338_v16 = vmul.f32 %v2329_v22, %v5157_v50  ;;  %v3093_v34 = vmov 12  }
0x1257   :  { %v2353_v54 = vpop.permute.xlu2 %2352 }
0x1258   :  { %v2362_v40 = vmul.f32 %v2353_v54, %v5157_v50 }
0x125a   :  { %2372 = vrot.lane.b32.xlu1 %v2362_v40, %s3075_s12 }
0x125d   :  { %v2348_v56 = vpop.permute.xlu1 %2347  ;;  %v2358_v36 = vpop.permute.xlu0 %2357 }
0x125e   :  { %v2361_v52 = vmul.f32 %v2348_v56, %v5156_v38  ;;  %v2363_v48 = vmul.f32 %v2358_v36, %v5155_v23 }
0x1260   :  { %2370 = vrot.lane.b32.xlu2 %v2361_v52, %s3075_s12 }
0x1262   :  { %2391 = vperm.xlu1 %2837, %v1665_v7   ;;  %v5194_v7 = vld [vmem:[#allocation33_spill] sm:$0xff] }
0x1263   :  { %v1041_v36 = vmul.f32 %v5194_v7, %v5193_v47 }
0x1266   :  { %v2387_v6 = vpop.permute.xlu0 %2386 }
0x1267   :  { %v2404_v42 = vmul.f32 %v2387_v6, %v5154_v43 }
0x1268   :  { %2374 = vrot.lane.b32.xlu2 %v2363_v48, %s3075_s12 }
0x126a   :  { %2401 = vperm.xlu1 %2837, %v1667_v44   ;;  %v1040_v44 = vmul.f32 %v5196_v46, %v5195_v39  ;;  %v5211_v46 = vld [vmem:[#allocation72_spill] sm:$0xff] }
0x1270   :  { %2396 = vperm.xlu2 %2838, %v1666_v63   ;;  %v5198_v63 = vld [vmem:[#allocation31_spill] sm:$0xff] }
0x1271   :  { %v1043_v6 = vmul.f32 %v5198_v63, %v5197_v17  ;;  %v5213_v17 = vld [vmem:[#allocation69_spill] sm:$0xff]  ;;  %v5214_v63 = vld [vmem:[#allocation62_spill] sm:$0xff] }
0x1272   :  { %2840 = vset.pattern.permute.xlu1 %v3092_v49 }
0x1278   :  { %2412 = vrot.lane.b32.xlu2 %v2404_v42, %s3076_s15 }
0x1279   :  { %2841 = vset.pattern.permute.xlu2 %v3092_v49 }
0x12ba   :  { %v2371_v21 = vpop.permute.xlu2 %2370 }
0x12bb   :  { %v2381_v37 = vadd.f32 %v2371_v21, %v2337_v15  ;;  %v5199_v15 = vld [vmem:[#allocation57_spill] sm:$0xff]  ;;  %v5200_v21 = vld [vmem:[#allocation47_spill] sm:$0xff] }
0x12c2   :  { %v2375_v29 = vpop.permute.xlu2 %2374 }
0x12c3   :  { %v2383_v58 = vadd.f32 %v2375_v29, %v2339_v59  ;;  %v3094_v29 = vmov 13  }
0x12c4   :  { %v2369_v57 = vpop.permute.xlu1 %2368 }
0x12c5   :  { %v4822_v60 = vadd.f32 %v2369_v57, %v2336_v32  ;;  %v5201_v32 = vld [vmem:[#allocation56_spill] sm:$0xff] }
0x12ca   :  { %v2397_v4 = vpop.permute.xlu2 %2396 }
0x12cb   :  { %v2406_v3 = vmul.f32 %v2397_v4, %v5157_v50  ;;  %v5203_v4 = vld [vmem:[#allocation42_spill] sm:$0xff] }
0x12cc   :  { %v2373_v45 = vpop.permute.xlu1 %2372 }
0x12cd   :  { %v2382_v20 = vadd.f32 %v2373_v45, %v2338_v16  ;;  %2416 = vrot.lane.b32.xlu1 %v2406_v3, %s3076_s15  ;;  %v5204_v16 = vld [vmem:[#allocation36_spill] sm:$0xff] }
0x12ce   :  { %v1042_v3 = vmul.f32 %v5204_v16, %v5203_v4  ;;  %v5205_v45 = vld [vmem:[#allocation52_spill] sm:$0xff]  ;;  %v5220_v16 = vld [vmem:[#allocation74_spill] sm:$0xff] }
0x12d2   :  { %v2413_v54 = vpop.permute.xlu2 %2412 }
0x12d4   :  { %v2392_v10 = vpop.permute.xlu1 %2391 }
0x12d5   :  { %v2405_v62 = vmul.f32 %v2392_v10, %v5156_v38  ;;  %2435 = vperm.xlu1 %2840, %v1985_v35   ;;  %v5207_v10 = vld [vmem:[#allocation54_spill] sm:$0xff] }
0x12d7   :  { %2414 = vrot.lane.b32.xlu0 %v2405_v62, %s3076_s15  ;;  %v5208_v62 = vld [vmem:[#allocation45_spill] sm:$0xff] }
0x12dc   :  { %v2402_v13 = vpop.permute.xlu1 %2401 }
0x12dd   :  { %v2407_v27 = vmul.f32 %v2402_v13, %v5155_v23  ;;  %2445 = vperm.xlu1 %2840, %v1987_v51   ;;  %v1363_v51 = vmul.f32 %v5208_v62, %v5207_v10  ;;  %v2424_v13 = vadd.f32 %v2413_v54, %v4822_v60 }
0x12df   :  { %2430 = vperm.xlu0 %2839, %v1984_v5   ;;  %2418 = vrot.lane.b32.xlu2 %v2407_v27, %s3076_s15  ;;  %v3095_v27 = vmov 14  }
0x12e5   :  { %2843 = vset.pattern.permute.xlu1 %v3093_v34 }
0x12e7   :  { %2440 = vperm.xlu2 %2841, %v1986_v53   ;;  %2842 = vset.pattern.permute.xlu0 %v3093_v34 }
0x12ef   :  { %2844 = vset.pattern.permute.xlu2 %v3093_v34 }
0x1339   :  { %v2419_v41 = vpop.permute.xlu2 %2418 }
0x133a   :  { %v2427_v24 = vadd.f32 %v2419_v41, %v2383_v58  ;;  %v5202_v58 = vld [vmem:[#allocation50_spill] sm:$0xff] }
0x133b   :  { %v1362_v57 = vmul.f32 %v5202_v58, %v5201_v32  ;;  %v5219_v58 = vld [vmem:[#allocation25_spill] sm:$0xff] }
0x133f   :  { %v2417_v40 = vpop.permute.xlu1 %2416 }
0x1340   :  { %v2426_v22 = vadd.f32 %v2417_v40, %v2382_v20  ;;  %v5206_v20 = vld [vmem:[#allocation44_spill] sm:$0xff] }
0x1341   :  { %v2441_v11 = vpop.permute.xlu2 %2440  ;;  %v1360_v35 = vmul.f32 %v5206_v20, %v5205_v45 }
0x1342   :  { %v2450_v56 = vmul.f32 %v2441_v11, %v5157_v50 }
0x1344   :  { %2460 = vrot.lane.b32.xlu1 %v2450_v56, %s3074_s2 }
0x1347   :  { %v2436_v52 = vpop.permute.xlu1 %2435 }
0x1348   :  { %v2449_v14 = vmul.f32 %v2436_v52, %v5156_v38 }
0x1349   :  { %v2415_v19 = vpop.permute.xlu0 %2414 }
0x134a   :  { %v2425_v48 = vadd.f32 %v2415_v19, %v2381_v37  ;;  %2458 = vrot.lane.b32.xlu0 %v2449_v14, %s3074_s2  ;;  %v1361_v37 = vmul.f32 %v5200_v21, %v5199_v15  ;;  %v5217_v21 = vld [vmem:[#allocation23_spill] sm:$0xff] }
0x134c   :  { %2479 = vperm.xlu1 %2843, %v1041_v36   ;;  %v5209_v36 = vld [vmem:[#allocation21_spill] sm:$0xff] }
0x134f   :  { %v2446_v49 = vpop.permute.xlu1 %2445 }
0x1350   :  { %v2451_v59 = vmul.f32 %v2446_v49, %v5155_v23  ;;  %v5216_v49 = vld [vmem:[#allocation68_spill] sm:$0xff] }
0x1351   :  { %v2431_v33 = vpop.permute.xlu0 %2430 }
0x1352   :  { %v2448_v42 = vmul.f32 %v2431_v33, %v5154_v43  ;;  %2474 = vperm.xlu0 %2842, %v1040_v44   ;;  %v5212_v44 = vld [vmem:[#allocation65_spill] sm:$0xff] }
0x1353   :  { %v1681_v33 = vmul.f32 %v5212_v44, %v5211_v46 }
0x1354   :  { %2489 = vperm.xlu1 %2843, %v1043_v6   ;;  %2456 = vrot.lane.b32.xlu2 %v2448_v42, %s3074_s2  ;;  %v1683_v6 = vmul.f32 %v5214_v63, %v5213_v17  ;;  %v5215_v42 = vld [vmem:[#allocation71_spill] sm:$0xff] }
0x1355   :  { %v1682_v15 = vmul.f32 %v5216_v49, %v5215_v42 }
0x135a   :  { %2846 = vset.pattern.permute.xlu0 %v3094_v29 }
0x135b   :  { %2503 = vperm.xlu0 %2846, %v1361_v37   ;;  %v2000_v37 = vmul.f32 %v5217_v21, %v4657_v9 }
0x135c   :  { %2847 = vset.pattern.permute.xlu1 %v3094_v29  ;;  %2462 = vrot.lane.b32.xlu2 %v2451_v59, %s3074_s2  ;;  %v3096_v59 = vmov 15  }
0x135d   :  { %2508 = vperm.xlu1 %2847, %v1362_v57   ;;  %v2001_v57 = vmul.f32 %v5219_v58, %v4669_v2 }
0x1363   :  { %2850 = vset.pattern.permute.xlu0 %v3095_v27 }
0x1364   :  { %2484 = vperm.xlu2 %2844, %v1042_v3   ;;  %v2002_v3 = vmul.f32 %v5220_v16, %v4667_v8 }
0x1365   :  { %2848 = vset.pattern.permute.xlu1 %v3095_v27 }
0x136c   :  { %2845 = vset.pattern.permute.xlu2 %v3094_v29  ;;  %v5218_v29 = vld [vmem:[#allocation26_spill] sm:$0xff] }
0x136d   :  { %2498 = vperm.xlu2 %2845, %v1360_v35   ;;  %v2003_v32 = vmul.f32 %v5218_v29, %v4663_v31 }
0x1375   :  { %2513 = vperm.xlu2 %2845, %v1363_v51  }
0x137d   :  { %2849 = vset.pattern.permute.xlu2 %v3095_v27 }
0x13ae   :  { %v2457_v55 = vpop.permute.xlu2 %2456 }
0x13af   :  { %v4864_v5 = vadd.f32 %v2457_v55, %v2424_v13 }
0x13b6   :  { %v2461_v1 = vpop.permute.xlu1 %2460  ;;  %v2463_v53 = vpop.permute.xlu2 %2462 }
0x13b7   :  { %v4866_v34 = vadd.f32 %v2461_v1, %v2426_v22  ;;  %v4868_v41 = vadd.f32 %v2463_v53, %v2427_v24  ;;  %v5210_v24 = vld [vmem:[#allocation60_spill] sm:$0xff] }
0x13b8   :  { %v1680_v39 = vmul.f32 %v5210_v24, %v5209_v36 }
0x13bc   :  { %v2459_v40 = vpop.permute.xlu0 %2458 }
0x13bd   :  { %v4870_v11 = vadd.f32 %v2459_v40, %v2425_v48 }
0x13be   :  { %v2480_v56 = vpop.permute.xlu1 %2479  ;;  %v2485_v52 = vpop.permute.xlu2 %2484 }
0x13bf   :  { %v2493_v9 = vmul.f32 %v2480_v56, %v5156_v38  ;;  %v2494_v55 = vmul.f32 %v2485_v52, %v5157_v50 }
0x13c4   :  { %v2475_v14 = vpop.permute.xlu0 %2474 }
0x13c5   :  { %v2492_v10 = vmul.f32 %v2475_v14, %v5154_v43 }
0x13c6   :  { %v4872_v60 = vpop.permute.xlu1 %2489 }
0x13c7   :  { %v2499_v54 = vpop.permute.xlu2 %2498 }
0x13c8   :  { %v2516_v19 = vmul.f32 %v2499_v54, %v5154_v43 }
0x13ca   :  { %2524 = vrot.lane.b32.xlu1 %v2516_v19, %s3075_s12 }
0x13cd   :  { %v2504_v47 = vpop.permute.xlu0 %2503 }
0x13ce   :  { %v2517_v7 = vmul.f32 %v2504_v47, %v5156_v38 }
0x13cf   :  { %v2509_v22 = vpop.permute.xlu1 %2508  ;;  %v2514_v4 = vpop.permute.xlu2 %2513 }
0x13d0   :  { %v2518_v48 = vmul.f32 %v2509_v22, %v5157_v50  ;;  %2526 = vrot.lane.b32.xlu2 %v2517_v7, %s3075_s12  ;;  %v2519_v45 = vmul.f32 %v2514_v4, %v5155_v23 }
0x13d2   :  { %2528 = vrot.lane.b32.xlu0 %v2518_v48, %s3075_s12  ;;  %2542 = vperm.xlu1 %2848, %v1680_v39  }
0x13d8   :  { %2547 = vperm.xlu2 %2849, %v1681_v33  }
0x13da   :  { %2552 = vperm.xlu0 %2850, %v1682_v15   ;;  %2557 = vperm.xlu1 %2848, %v1683_v6  }
0x13e0   :  { %2851 = vset.pattern.permute.xlu2 %v3096_v59 }
0x13e1   :  { %2586 = vperm.xlu2 %2851, %v2000_v37  }
0x13e2   :  { %2853 = vset.pattern.permute.xlu0 %v3096_v59  ;;  %2852 = vset.pattern.permute.xlu1 %v3096_v59 }
0x13e3   :  { %2601 = vperm.xlu0 %2853, %v2003_v32   ;;  %2591 = vperm.xlu1 %2852, %v2001_v57  }
0x13e9   :  { %2596 = vperm.xlu2 %2851, %v2002_v3  }
0x13eb   :  { %2530 = vrot.lane.b32.xlu1 %v2519_v45, %s3075_s12 }
0x142a   :  { %v2527_v31 = vpop.permute.xlu2 %2526 }
0x142b   :  { %v2537_v20 = vadd.f32 %v2527_v31, %v2493_v9 }
0x1432   :  { %v2548_v35 = vpop.permute.xlu2 %2547 }
0x1433   :  { %v2561_v2 = vmul.f32 %v2548_v35, %v5156_v38 }
0x1435   :  { %2570 = vrot.lane.b32.xlu1 %v2561_v2, %s3076_s15 }
0x143b   :  { %v2587_v62 = vpop.permute.xlu2 %2586 }
0x143c   :  { %v2604_v51 = vmul.f32 %v2587_v62, %v5154_v43  ;;  %v2525_v8 = vpop.permute.xlu1 %2524 }
0x143d   :  { %v2536_v13 = vadd.f32 %v2525_v8, %v2492_v10 }
0x143e   :  { %2612 = vrot.lane.b32.xlu1 %v2604_v51, %s3074_s2 }
0x1443   :  { %v2597_v47 = vpop.permute.xlu2 %2596 }
0x1444   :  { %v2543_v27 = vpop.permute.xlu1 %2542  ;;  %v2529_v1 = vpop.permute.xlu0 %2528  ;;  %v2606_v52 = vmul.f32 %v2597_v47, %v5157_v50 }
0x1445   :  { %v2560_v53 = vmul.f32 %v2543_v27, %v5154_v43  ;;  %v2538_v40 = vadd.f32 %v2529_v1, %v2494_v55 }
0x1447   :  { %2568 = vrot.lane.b32.xlu2 %v2560_v53, %s3076_s15 }
0x144c   :  { %v2558_v56 = vpop.permute.xlu1 %2557  ;;  %v2553_v54 = vpop.permute.xlu0 %2552 }
0x144d   :  { %v2563_v14 = vmul.f32 %v2558_v56, %v5155_v23  ;;  %v2562_v19 = vmul.f32 %v2553_v54, %v5157_v50 }
0x144f   :  { %2574 = vrot.lane.b32.xlu0 %v2563_v14, %s3076_s15  ;;  %2572 = vrot.lane.b32.xlu2 %v2562_v19, %s3076_s15 }
0x1455   :  { %v2592_v7 = vpop.permute.xlu1 %2591  ;;  %v2602_v22 = vpop.permute.xlu0 %2601 }
0x1456   :  { %v2605_v43 = vmul.f32 %v2592_v7, %v5156_v38  ;;  %v2607_v36 = vmul.f32 %v2602_v22, %v5155_v23 }
0x1457   :  { %2616 = vrot.lane.b32.xlu0 %v2606_v52, %s3074_s2 }
0x1458   :  { %2614 = vrot.lane.b32.xlu2 %v2605_v43, %s3074_s2  ;;  %2618 = vrot.lane.b32.xlu1 %v2607_v36, %s3074_s2  ;;  %s2717_s2 = sshll.u32 %s4968_s4, 4  ;;  %s2718_s2 = int_to_ptr.hbm [resolvable:$true] %s2717_s2 }
0x145d   :  { %v2531_v38 = vpop.permute.xlu1 %2530 }
0x145f   :  { %2634 = vrot.lane.b32.xlu0 %v4725_v30, %s3097_s8 }
0x1460   :  { %2632 = vrot.lane.b32.xlu2 %v4727_v61, %s3097_s8  ;;  %2636 = vrot.lane.b32.xlu1 %v4729_v25, %s3097_s8 }
0x1467   :  { %2648 = vrot.lane.b32.xlu0 %v4795_v28, %s3073_s11 }
0x1468   :  { %2638 = vrot.lane.b32.xlu2 %v4731_v0, %s3097_s8  ;;  %2650 = vrot.lane.b32.xlu1 %v4799_v26, %s3073_s11 }
0x146f   :  { %2654 = vrot.lane.b32.xlu0 %v4801_v12, %s3073_s11 }
0x1470   :  { %2652 = vrot.lane.b32.xlu2 %v4797_v18, %s3073_s11  ;;  %2664 = vrot.lane.b32.xlu1 %v4864_v5, %s3070_s9 }
0x1477   :  { %2668 = vrot.lane.b32.xlu0 %v4866_v34, %s3070_s9  ;;  %v2495_v34 = vmul.f32 %v4872_v60, %v5155_v23 }
0x1478   :  { %2666 = vrot.lane.b32.xlu2 %v4870_v11, %s3070_s9  ;;  %2670 = vrot.lane.b32.xlu1 %v4868_v41, %s3070_s9  ;;  %s3098_s9 = smov [#allocation5]  }
0x1479   :  { %v2539_v11 = vadd.f32 %v2531_v38, %v2495_v34 }
0x14a1   :  { %v2569_v50 = vpop.permute.xlu2 %2568 }
0x14a2   :  { %v2580_v25 = vadd.f32 %v2569_v50, %v2536_v13 }
0x14a7   :  { %v2571_v30 = vpop.permute.xlu1 %2570 }
0x14a8   :  { %v2581_v28 = vadd.f32 %v2571_v30, %v2537_v20 }
0x14a9   :  { %v2573_v61 = vpop.permute.xlu2 %2572 }
0x14aa   :  { %v2582_v41 = vadd.f32 %v2573_v61, %v2538_v40 }
0x14b0   :  { %v2613_v0 = vpop.permute.xlu1 %2612 }
0x14b1   :  { %v2624_v18 = vadd.f32 %v2613_v0, %v2580_v25 }
0x14b2   :  { %v2615_v26 = vpop.permute.xlu2 %2614 }
0x14b3   :  { %v2625_v12 = vadd.f32 %v2615_v26, %v2581_v28  ;;  %2680 = vrot.lane.b32.xlu2 %v2624_v18, %s3071_s10 }
0x14b5   :  { %2682 = vrot.lane.b32.xlu0 %v2625_v12, %s3071_s10 }
0x14ba   :  { %v2633_v33 = vpop.permute.xlu2 %2632 }
0x14c1   :  { %v2575_v5 = vpop.permute.xlu0 %2574 }
0x14c2   :  { %v2583_v24 = vadd.f32 %v2575_v5, %v2539_v11  ;;  %v2639_v17 = vpop.permute.xlu2 %2638 }
0x14c9   :  { %v2617_v39 = vpop.permute.xlu0 %2616 }
0x14ca   :  { %v2626_v48 = vadd.f32 %v2617_v39, %v2582_v41  ;;  %v2619_v46 = vpop.permute.xlu1 %2618  ;;  %v2653_v6 = vpop.permute.xlu2 %2652 }
0x14cb   :  { %v2627_v44 = vadd.f32 %v2619_v46, %v2583_v24 }
0x14cc   :  { %2684 = vrot.lane.b32.xlu1 %v2626_v48, %s3071_s10 }
0x14cd   :  { %2686 = vrot.lane.b32.xlu2 %v2627_v44, %s3071_s10  ;;  %s2715_s10 = sshll.u32 %s3098_s9, 4  ;;  %s2716_s10 = int_to_ptr.vmem [resolvable:$true] %s2715_s10 }
0x14d1   :  { %v2635_v42 = vpop.permute.xlu0 %2634 }
0x14d2   :  { %v2637_v63 = vpop.permute.xlu1 %2636  ;;  %v2667_v15 = vpop.permute.xlu2 %2666 }
0x14d3   :  { %v2694_v2 = vsel %vm118_vm1, %v2637_v63, %v2653_v6 }
0x14d9   :  { %v2649_v21 = vpop.permute.xlu0 %2648 }
0x14da   :  { %v2651_v49 = vpop.permute.xlu1 %2650  ;;  %v2692_v60 = vsel %vm118_vm1, %v2633_v33, %v2649_v21 }
0x14db   :  { %v2693_v57 = vsel %vm118_vm1, %v2635_v42, %v2651_v49 }
0x14dc   :  { %v2697_v9 = vsel %vm718_vm2, %v2693_v57, %v2667_v15 }
0x14e1   :  { %v2655_v32 = vpop.permute.xlu0 %2654 }
0x14e2   :  { %v2665_v23 = vpop.permute.xlu1 %2664  ;;  %v2695_v16 = vsel %vm118_vm1, %v2639_v17, %v2655_v32 }
0x14e3   :  { %v2696_v37 = vsel %vm718_vm2, %v2692_v60, %v2665_v23 }
0x14e9   :  { %v2669_v58 = vpop.permute.xlu0 %2668 }
0x14ea   :  { %v2671_v4 = vpop.permute.xlu1 %2670  ;;  %v2698_v10 = vsel %vm718_vm2, %v2694_v2, %v2669_v58 }
0x14eb   :  { %v2699_v3 = vsel %vm718_vm2, %v2695_v16, %v2671_v4 }
0x150d   :  { %v2681_v59 = vpop.permute.xlu2 %2680 }
0x150e   :  { %v2701_v29 = vsel %vm2700_vm12, %v2696_v37, %v2681_v59 }
0x150f   :  { %2706 = vst.msk [vmem:[#allocation5] sm:$0xff] %vm2705_vm13, %v2701_v29 }
0x1527   :  { %v2687_v45 = vpop.permute.xlu2 %2686  ;;  %v2683_v31 = vpop.permute.xlu0 %2682 }
0x1528   :  { %v2704_v20 = vsel %vm2700_vm12, %v2699_v3, %v2687_v45  ;;  %v2702_v35 = vsel %vm2700_vm12, %v2697_v9, %v2683_v31 }
0x1529   :  { %2710 = vst.msk [vmem:[#allocation5 + $0x18] sm:$0xf] %vm2709_vm14, %v2704_v20 }
0x152a   :  { %2707 = vst.msk [vmem:[#allocation5 + $0x8] sm:$0xff] %vm2705_vm13, %v2702_v35 }
0x153e   :  { %v2685_v62 = vpop.permute.xlu1 %2684 }
0x153f   :  { %v2703_v51 = vsel %vm2700_vm12, %v2698_v10, %v2685_v62 }
0x1540   :  { %2708 = vst.msk [vmem:[#allocation5 + $0x10] sm:$0xff] %vm2705_vm13, %v2703_v51 }
0x1541   :  { %2723 = dma.vmem_to_hbm [thread:$0]  %s2716_s10, 512, %s2718_s2, [#allocation4], %s3068_s23, %s3068_s23, %s3069_s24  }
0x1542   :  { %3065 = dma.done.wait [#allocation4], 512  }
0x1543   :  { %3066 = vsyncadd [#allocation4], 4294966784 }
0x1544   :  { %2732 = vsyncpa [#allocation3], 1 }
0x1545   :  { %2733 = vsyncpa [#allocation4], 1 }

</bundles_post_ra>
